<compile_context>
chip_gen: v7x
topology: tpu7x:2x2x1
jax: 0.10.0
libtpu: 0.0.40
codegen_flags: <defaults>
</compile_context>

<pallas_src>
import jax
import jax.numpy as jnp
from jax.experimental import pallas as pl
from jax.experimental.pallas import tpu as pltpu

VMEM_SPEC = pl.BlockSpec(memory_space=pltpu.MemorySpace.VMEM)


# ----------------------------------------------------------------------------
# helpers
# ----------------------------------------------------------------------------
def _round_up(v, m):
    return (v + m - 1) // m * m


def _pick_div(n, candidates):
    for c in candidates:
        if n % c == 0:
            return c
    return n


def _pad_to(x, shape, dtype):
    if tuple(x.shape) == tuple(shape):
        return x.astype(dtype)
    buf = jnp.zeros(shape, dtype)
    return buf.at[tuple(slice(0, d) for d in x.shape)].set(x.astype(dtype))


def _w2mat(w):
    # PyTorch OIHW -> (kh*kw*Cin, Cout), matching im2col column order.
    cout, cin, kh, kw = w.shape
    return jnp.transpose(w, (2, 3, 1, 0)).reshape(kh * kw * cin, cout)


# ----------------------------------------------------------------------------
# Pallas kernels
# ----------------------------------------------------------------------------
def _gemm_kernel(a_ref, w_ref, b_ref, m_ref, o_ref, acc_ref):
    """Tiled GEMM: bf16 A @ bf16 W -> f32 acc, fused bias + per-column ReLU."""
    kk = pl.program_id(2)

    @pl.when(kk == 0)
    def _():
        acc_ref[...] = jnp.zeros_like(acc_ref)

    acc_ref[...] += jnp.dot(a_ref[...], w_ref[...],
                            preferred_element_type=jnp.float32)

    @pl.when(kk == pl.num_programs(2) - 1)
    def _():
        y = acc_ref[...] + b_ref[...]                       # (tm, tn) + (1, tn)
        y = jnp.where(m_ref[...] != 0.0, jnp.maximum(y, 0.0), y)
        o_ref[...] = y.astype(o_ref.dtype)


def _in_relu_kernel(x_ref, o_ref):
    # x_ref: (1, HW, C) for one batch element; InstanceNorm(affine=False)+ReLU.
    x = x_ref[...]
    mean = jnp.mean(x, axis=1, keepdims=True)
    xc = x - mean
    var = jnp.mean(xc * xc, axis=1, keepdims=True)
    o_ref[...] = jnp.maximum(xc * jax.lax.rsqrt(var + 1e-5), 0.0)


def _gap_kernel(x_ref, o_ref):
    # x_ref: (B, HW, C) -> per-(batch, channel) mean over HW.
    o_ref[...] = jnp.mean(x_ref[...], axis=1)


# ----------------------------------------------------------------------------
# Pallas wrappers
# ----------------------------------------------------------------------------
def pallas_gemm(a, w, bias, relu_mask):
    """a:(M,K) w:(K,N) bias:(N,) relu_mask:(N,) -> (M,N) f32 (bias + masked ReLU)."""
    M, K = a.shape
    Kw, N = w.shape
    assert K == Kw

    Kp = _round_up(K, 128)
    Np = _round_up(N, 128)
    tm = min(512, _round_up(M, 8))
    Mp = _round_up(M, tm)
    tk = _pick_div(Kp, (512, 256, 128))
    tn = _pick_div(Np, (256, 128))

    a_p = _pad_to(a, (Mp, Kp), jnp.bfloat16)
    w_p = _pad_to(w, (Kp, Np), jnp.bfloat16)
    b_p = _pad_to(bias.reshape(1, N), (1, Np), jnp.float32)
    m_p = _pad_to(relu_mask.reshape(1, N), (1, Np), jnp.float32)

    grid = (Mp // tm, Np // tn, Kp // tk)
    out = pl.pallas_call(
        _gemm_kernel,
        out_shape=jax.ShapeDtypeStruct((Mp, Np), jnp.float32),
        grid_spec=pltpu.PrefetchScalarGridSpec(
            num_scalar_prefetch=0,
            grid=grid,
            in_specs=[
                pl.BlockSpec((tm, tk), lambda i, j, kk: (i, kk)),
                pl.BlockSpec((tk, tn), lambda i, j, kk: (kk, j)),
                pl.BlockSpec((1, tn), lambda i, j, kk: (0, j)),
                pl.BlockSpec((1, tn), lambda i, j, kk: (0, j)),
            ],
            out_specs=pl.BlockSpec((tm, tn), lambda i, j, kk: (i, j)),
            scratch_shapes=[pltpu.VMEM((tm, tn), jnp.float32)],
        ),
        compiler_params=pltpu.CompilerParams(
            dimension_semantics=("parallel", "parallel", "arbitrary"),
            vmem_limit_bytes=32 * 1024 * 1024,
        ),
        cost_estimate=pl.CostEstimate(
            flops=2 * Mp * Np * Kp,
            transcendentals=0,
            bytes_accessed=Mp * Kp * 2 + Kp * Np * 2 + Mp * Np * 4,
        ),
    )(a_p, w_p, b_p, m_p)
    return out[:M, :N]


def pallas_instance_norm_relu(y2d, batch, hw):
    # y2d: (batch*hw, C) f32, rows ordered batch-major -> same shape out.
    C = y2d.shape[1]
    x3 = y2d.reshape(batch, hw, C)
    out = pl.pallas_call(
        _in_relu_kernel,
        out_shape=jax.ShapeDtypeStruct((batch, hw, C), jnp.float32),
        grid=(batch,),
        in_specs=[pl.BlockSpec((1, hw, C), lambda b: (b, 0, 0))],
        out_specs=pl.BlockSpec((1, hw, C), lambda b: (b, 0, 0)),
        compiler_params=pltpu.CompilerParams(
            dimension_semantics=("parallel",)),
    )(x3)
    return out.reshape(batch * hw, C)


def pallas_global_avg_pool(y2d, batch, hw):
    # y2d: (batch*hw, C) f32 -> (batch, C) f32
    C = y2d.shape[1]
    x3 = y2d.reshape(batch, hw, C)
    return pl.pallas_call(
        _gap_kernel,
        out_shape=jax.ShapeDtypeStruct((batch, C), jnp.float32),
        in_specs=[VMEM_SPEC],
        out_specs=VMEM_SPEC,
    )(x3)


# ----------------------------------------------------------------------------
# Convolution = NHWC im2col (JAX glue, bf16) + tiled Pallas GEMM
# ----------------------------------------------------------------------------
def _im2col_nhwc(x, kh, kw, stride, pad):
    # x: (B, H, W, C) -> (B*OH*OW, kh*kw*C), OH, OW  (channel stays lane-fast)
    B, H, W, C = x.shape
    xp = jnp.pad(x, ((0, 0), (pad, pad), (pad, pad), (0, 0)))
    OH = (H + 2 * pad - kh) // stride + 1
    OW = (W + 2 * pad - kw) // stride + 1
    patches = []
    for i in range(kh):
        for j in range(kw):
            patches.append(xp[:, i:i + (OH - 1) * stride + 1:stride,
                               j:j + (OW - 1) * stride + 1:stride, :])
    cols = jnp.stack(patches, axis=3)                 # (B, OH, OW, kh*kw, C)
    return cols.reshape(B * OH * OW, kh * kw * C), OH, OW


def conv_gemm(a, conv_params, relu):
    w, b = conv_params
    cout = w.shape[0]
    mask = jnp.full((cout,), 1.0 if relu else 0.0, jnp.float32)
    return pallas_gemm(a, _w2mat(w), b, mask)          # (B*OH*OW, Cout) f32


# ----------------------------------------------------------------------------
# Encoder forward
# ----------------------------------------------------------------------------
def init_params(key, in_channels, initial, style_size):
    ks = jax.random.split(key, 8)

    def conv_p(k, cout, cin, kh, kw):
        scale = 1.0 / jnp.sqrt(cin * kh * kw)
        return (jax.random.normal(k, (cout, cin, kh, kw), jnp.float32) * scale,
                jnp.zeros((cout,), jnp.float32))

    p = {}
    # content encoder
    p["c1"] = conv_p(ks[0], initial,     in_channels, 7, 7)
    p["c2"] = conv_p(ks[1], initial * 2, initial,     4, 4)
    p["c3"] = conv_p(ks[2], initial * 4, initial * 2, 4, 4)
    # style encoder
    p["s1"] = conv_p(ks[3], initial,     in_channels, 7, 7)
    p["s2"] = conv_p(ks[4], initial * 2, initial,     4, 4)
    p["s3"] = conv_p(ks[5], initial * 4, initial * 2, 4, 4)
    p["fc_w"] = jax.random.normal(ks[6], (initial * 4, style_size),
                                  jnp.float32) / jnp.sqrt(initial * 4)
    p["fc_b"] = jnp.zeros((style_size,), jnp.float32)
    return p


def encoder_forward(params, x):
    B, Cin, H, W = x.shape
    k = params["c1"][0].shape[0]                       # 'initial'
    xh = jnp.transpose(x, (0, 2, 3, 1))                # NHWC internally

    # ---- fused layer 1: content-conv1 and style-conv1 share the same input ----
    a1, OH1, OW1 = _im2col_nhwc(xh.astype(jnp.bfloat16), 7, 7, 1, 3)
    w_c1, b_c1 = params["c1"]
    w_s1, b_s1 = params["s1"]
    wm1 = jnp.concatenate([_w2mat(w_c1), _w2mat(w_s1)], axis=1)    # (K, 2k)
    bb1 = jnp.concatenate([b_c1, b_s1])
    mk1 = jnp.concatenate([jnp.zeros((k,), jnp.float32),           # content: no ReLU
                           jnp.ones((k,), jnp.float32)])           # style: ReLU fused
    y1 = pallas_gemm(a1, wm1, bb1, mk1)                # (B*H*W, 2k) f32
    c = y1[:, :k]
    s = y1[:, k:]                                      # style conv1 + ReLU

    # ---- content path: conv -> IN -> ReLU (x3) ----
    c = pallas_instance_norm_relu(c, B, OH1 * OW1)
    a, OH2, OW2 = _im2col_nhwc(c.reshape(B, OH1, OW1, k).astype(jnp.bfloat16),
                               4, 4, 2, 1)
    c = conv_gemm(a, params["c2"], relu=False)
    c = pallas_instance_norm_relu(c, B, OH2 * OW2)
    a, OH3, OW3 = _im2col_nhwc(c.reshape(B, OH2, OW2, 2 * k).astype(jnp.bfloat16),
                               4, 4, 2, 1)
    c = conv_gemm(a, params["c3"], relu=False)
    c = pallas_instance_norm_relu(c, B, OH3 * OW3)
    content = c.reshape(B, OH3, OW3, 4 * k).transpose(0, 3, 1, 2)  # NCHW out

    # ---- style path: conv -> ReLU (x3, ReLU fused in GEMM) -> GAP -> FC ----
    a, _, _ = _im2col_nhwc(s.reshape(B, OH1, OW1, k).astype(jnp.bfloat16),
                           4, 4, 2, 1)
    s = conv_gemm(a, params["s2"], relu=True)
    a, _, _ = _im2col_nhwc(s.reshape(B, OH2, OW2, 2 * k).astype(jnp.bfloat16),
                           4, 4, 2, 1)
    s = conv_gemm(a, params["s3"], relu=True)
    s = pallas_global_avg_pool(s, B, OH3 * OW3)        # (B, 4k)
    style = pallas_gemm(s, params["fc_w"], params["fc_b"],
                        jnp.zeros((params["fc_w"].shape[1],), jnp.float32))
    return content, style


# ----------------------------------------------------------------------------
# Pure-JAX reference (bf16-fed matmuls to match the MXU path numerically)
# ----------------------------------------------------------------------------
def _ref_conv(x, conv_params, stride, pad):
    w, b = conv_params
    y = jax.lax.conv_general_dilated(
        x.astype(jnp.bfloat16), w.astype(jnp.bfloat16),
        (stride, stride), ((pad, pad), (pad, pad)),
        dimension_numbers=("NCHW", "OIHW", "NCHW"),
        preferred_element_type=jnp.float32)
    return y + b.reshape(1, -1, 1, 1)


def _ref_in_relu(x):
    mean = jnp.mean(x, axis=(2, 3), keepdims=True)
    var = jnp.mean((x - mean) ** 2, axis=(2, 3), keepdims=True)
    return jnp.maximum((x - mean) * jax.lax.rsqrt(var + 1e-5), 0.0)


def encoder_reference(params, x):
    h = _ref_in_relu(_ref_conv(x, params["c1"], 1, 3))
    h = _ref_in_relu(_ref_conv(h, params["c2"], 2, 1))
    content = _ref_in_relu(_ref_conv(h, params["c3"], 2, 1))

    s = jnp.maximum(_ref_conv(x, params["s1"], 1, 3), 0.0)
    s = jnp.maximum(_ref_conv(s, params["s2"], 2, 1), 0.0)
    s = jnp.maximum(_ref_conv(s, params["s3"], 2, 1), 0.0)
    s = jnp.mean(s, axis=(2, 3))
    style = jnp.dot(s.astype(jnp.bfloat16), params["fc_w"].astype(jnp.bfloat16),
                    preferred_element_type=jnp.float32) + params["fc_b"]
    return content, style


# ----------------------------------------------------------------------------
if __name__ == "__main__":
    B, Cin, H, W = 2, 3, 16, 16
    initial, style_size = 8, 8

    key = jax.random.PRNGKey(0)
    k_x, k_p = jax.random.split(key)
    x = jax.random.normal(k_x, (B, Cin, H, W), jnp.float32)
    params = init_params(k_p, Cin, initial, style_size)

    fwd = jax.jit(encoder_forward)
    content, style = jax.block_until_ready(fwd(params, x))

    ref = jax.jit(encoder_reference)
    content_ref, style_ref = jax.block_until_ready(ref(params, x))

    assert content.shape == (B, initial * 4, H // 4, W // 4), content.shape
    assert style.shape == (B, style_size), style.shape
    assert jnp.allclose(content, content_ref, atol=2e-2, rtol=2e-2), (
        float(jnp.max(jnp.abs(content - content_ref))))
    assert jnp.allclose(style, style_ref, atol=2e-2, rtol=2e-2), (
        float(jnp.max(jnp.abs(style - style_ref))))

    print("KERNEL_OK")
</pallas_src>

<mosaic_0001>
module attributes {stable_mosaic.version = 11 : i64} {
  func.func @_gemm_kernel(%arg0: i32, %arg1: i32, %arg2: i32, %arg3: memref<512x256xbf16, #tpu.memory_space<vmem>>, %arg4: memref<256x128xbf16, #tpu.memory_space<vmem>>, %arg5: memref<1x128xf32, #tpu.memory_space<vmem>>, %arg6: memref<1x128xf32, #tpu.memory_space<vmem>>, %arg7: memref<512x128xf32, #tpu.memory_space<vmem>>, %arg8: memref<512x128xf32, #tpu.memory_space<vmem>>) attributes {dimension_semantics = [#tpu.dimension_semantics<parallel>, #tpu.dimension_semantics<parallel>, #tpu.dimension_semantics<arbitrary>], iteration_bounds = array<i64: 1, 1, 1>, scalar_prefetch = 0 : i64, scratch_operands = 1 : i64, tpu.core_type = #tpu.core_type<tc>, window_params = [{transform_indices = @transform_0, window_bounds = array<i64: 512, 256>}, {transform_indices = @transform_1, window_bounds = array<i64: 256, 128>}, {transform_indices = @transform_2, window_bounds = array<i64: 1, 128>}, {transform_indices = @transform_3, window_bounds = array<i64: 1, 128>}, {transform_indices = @transform_4, window_bounds = array<i64: 512, 128>}]} {
    %c0_i32 = arith.constant 0 : i32
    %0 = arith.cmpi eq, %arg2, %c0_i32 : i32
    %1 = arith.extui %0 : i1 to i32
    %c0_i32_0 = arith.constant 0 : i32
    %2 = arith.cmpi ne, %1, %c0_i32_0 : i32
    scf.if %2 {
      %cst_10 = arith.constant 0.000000e+00 : f32
      %12 = vector.broadcast %cst_10 : f32 to vector<512x128xf32>
      %c0_11 = arith.constant 0 : index
      %c0_12 = arith.constant 0 : index
      %13 = vector.load %arg8[%c0_11, %c0_12] : memref<512x128xf32, #tpu.memory_space<vmem>>, vector<512x128xf32>
      tpu.vector_store %arg8[%c0_11, %c0_12], %12 {strides = array<i32>} : memref<512x128xf32, #tpu.memory_space<vmem>>, vector<512x128xf32>,
    } else {
    }
    %c0 = arith.constant 0 : index
    %c0_1 = arith.constant 0 : index
    %3 = vector.load %arg8[%c0, %c0_1] : memref<512x128xf32, #tpu.memory_space<vmem>>, vector<512x128xf32>
    %c0_2 = arith.constant 0 : index
    %c0_3 = arith.constant 0 : index
    %4 = vector.load %arg3[%c0_2, %c0_3] : memref<512x256xbf16, #tpu.memory_space<vmem>>, vector<512x256xbf16>
    %c0_4 = arith.constant 0 : index
    %c0_5 = arith.constant 0 : index
    %5 = vector.load %arg4[%c0_4, %c0_5] : memref<256x128xbf16, #tpu.memory_space<vmem>>, vector<256x128xbf16>
    %cst = arith.constant dense<0.000000e+00> : vector<512x128xf32>
    %6 = tpu.matmul %4, %5, %cst {dimension_numbers = #tpu.dot_dimension_numbers<[1], [0], [0], [1], [0, 0, 1, 1], [], []>} : vector<512x256xbf16>, vector<256x128xbf16>, vector<512x128xf32> -> vector<512x128xf32>
    %7 = arith.addf %3, %6 : vector<512x128xf32>
    %c0_6 = arith.constant 0 : index
    %c0_7 = arith.constant 0 : index
    %8 = vector.load %arg8[%c0_6, %c0_7] : memref<512x128xf32, #tpu.memory_space<vmem>>, vector<512x128xf32>
    tpu.vector_store %arg8[%c0_6, %c0_7], %7 {strides = array<i32>} : memref<512x128xf32, #tpu.memory_space<vmem>>, vector<512x128xf32>,
    %c0_i32_8 = arith.constant 0 : i32
    %9 = arith.cmpi eq, %arg2, %c0_i32_8 : i32
    %10 = arith.extui %9 : i1 to i32
    %c0_i32_9 = arith.constant 0 : i32
    %11 = arith.cmpi ne, %10, %c0_i32_9 : i32
    scf.if %11 {
      %c0_10 = arith.constant 0 : index
      %c0_11 = arith.constant 0 : index
      %12 = vector.load %arg8[%c0_10, %c0_11] : memref<512x128xf32, #tpu.memory_space<vmem>>, vector<512x128xf32>
      %c0_12 = arith.constant 0 : index
      %c0_13 = arith.constant 0 : index
      %13 = vector.load %arg5[%c0_12, %c0_13] : memref<1x128xf32, #tpu.memory_space<vmem>>, vector<1x128xf32>
      %14 = vector.broadcast %13 : vector<1x128xf32> to vector<512x128xf32>
      %15 = arith.addf %12, %14 : vector<512x128xf32>
      %c0_14 = arith.constant 0 : index
      %c0_15 = arith.constant 0 : index
      %16 = vector.load %arg6[%c0_14, %c0_15] : memref<1x128xf32, #tpu.memory_space<vmem>>, vector<1x128xf32>
      %cst_16 = arith.constant 0.000000e+00 : f32
      %17 = vector.broadcast %cst_16 : f32 to vector<1x128xf32>
      %18 = arith.cmpf one, %16, %17 : vector<1x128xf32>
      %cst_17 = arith.constant 0.000000e+00 : f32
      %19 = vector.broadcast %cst_17 : f32 to vector<512x128xf32>
      %20 = arith.maximumf %15, %19 : vector<512x128xf32>
      %21 = vector.shape_cast %18 : vector<1x128xi1> to vector<1x128xi1>
      %22 = vector.broadcast %21 : vector<1x128xi1> to vector<512x128xi1>
      %23 = arith.select %22, %20, %15 : vector<512x128xi1>, vector<512x128xf32>
      %c0_18 = arith.constant 0 : index
      %c0_19 = arith.constant 0 : index
      %24 = vector.load %arg7[%c0_18, %c0_19] : memref<512x128xf32, #tpu.memory_space<vmem>>, vector<512x128xf32>
      tpu.vector_store %arg7[%c0_18, %c0_19], %23 {strides = array<i32>} : memref<512x128xf32, #tpu.memory_space<vmem>>, vector<512x128xf32>,
    } else {
    }
    return
  }
  func.func @transform_0(%arg0: i32, %arg1: i32, %arg2: i32) -> (i32, i32) {
    %c0_i32 = arith.constant 0 : i32
    return %arg0, %arg2 : i32, i32
  }
  func.func @transform_1(%arg0: i32, %arg1: i32, %arg2: i32) -> (i32, i32) {
    %c0_i32 = arith.constant 0 : i32
    return %arg2, %arg1 : i32, i32
  }
  func.func @transform_2(%arg0: i32, %arg1: i32, %arg2: i32) -> (i32, i32) {
    %c0_i32 = arith.constant 0 : i32
    %c0_i32_0 = arith.constant 0 : i32
    return %c0_i32, %arg1 : i32, i32
  }
  func.func @transform_3(%arg0: i32, %arg1: i32, %arg2: i32) -> (i32, i32) {
    %c0_i32 = arith.constant 0 : i32
    %c0_i32_0 = arith.constant 0 : i32
    return %c0_i32, %arg1 : i32, i32
  }
  func.func @transform_4(%arg0: i32, %arg1: i32, %arg2: i32) -> (i32, i32) {
    %c0_i32 = arith.constant 0 : i32
    return %arg0, %arg1 : i32, i32
  }
}

module attributes {stable_mosaic.version = 11 : i64} {
  func.func @_gemm_kernel(%arg0: i32, %arg1: i32, %arg2: i32, %arg3: memref<128x128xbf16, #tpu.memory_space<vmem>>, %arg4: memref<128x128xbf16, #tpu.memory_space<vmem>>, %arg5: memref<1x128xf32, #tpu.memory_space<vmem>>, %arg6: memref<1x128xf32, #tpu.memory_space<vmem>>, %arg7: memref<128x128xf32, #tpu.memory_space<vmem>>, %arg8: memref<128x128xf32, #tpu.memory_space<vmem>>) attributes {dimension_semantics = [#tpu.dimension_semantics<parallel>, #tpu.dimension_semantics<parallel>, #tpu.dimension_semantics<arbitrary>], iteration_bounds = array<i64: 1, 1, 1>, scalar_prefetch = 0 : i64, scratch_operands = 1 : i64, tpu.core_type = #tpu.core_type<tc>, window_params = [{transform_indices = @transform_0, window_bounds = array<i64: 128, 128>}, {transform_indices = @transform_1, window_bounds = array<i64: 128, 128>}, {transform_indices = @transform_2, window_bounds = array<i64: 1, 128>}, {transform_indices = @transform_3, window_bounds = array<i64: 1, 128>}, {transform_indices = @transform_4, window_bounds = array<i64: 128, 128>}]} {
    %c0_i32 = arith.constant 0 : i32
    %0 = arith.cmpi eq, %arg2, %c0_i32 : i32
    %1 = arith.extui %0 : i1 to i32
    %c0_i32_0 = arith.constant 0 : i32
    %2 = arith.cmpi ne, %1, %c0_i32_0 : i32
    scf.if %2 {
      %cst_10 = arith.constant 0.000000e+00 : f32
      %12 = vector.broadcast %cst_10 : f32 to vector<128x128xf32>
      %c0_11 = arith.constant 0 : index
      %c0_12 = arith.constant 0 : index
      %13 = vector.load %arg8[%c0_11, %c0_12] : memref<128x128xf32, #tpu.memory_space<vmem>>, vector<128x128xf32>
      tpu.vector_store %arg8[%c0_11, %c0_12], %12 {strides = array<i32>} : memref<128x128xf32, #tpu.memory_space<vmem>>, vector<128x128xf32>,
    } else {
    }
    %c0 = arith.constant 0 : index
    %c0_1 = arith.constant 0 : index
    %3 = vector.load %arg8[%c0, %c0_1] : memref<128x128xf32, #tpu.memory_space<vmem>>, vector<128x128xf32>
    %c0_2 = arith.constant 0 : index
    %c0_3 = arith.constant 0 : index
    %4 = vector.load %arg3[%c0_2, %c0_3] : memref<128x128xbf16, #tpu.memory_space<vmem>>, vector<128x128xbf16>
    %c0_4 = arith.constant 0 : index
    %c0_5 = arith.constant 0 : index
    %5 = vector.load %arg4[%c0_4, %c0_5] : memref<128x128xbf16, #tpu.memory_space<vmem>>, vector<128x128xbf16>
    %cst = arith.constant dense<0.000000e+00> : vector<128x128xf32>
    %6 = tpu.matmul %4, %5, %cst {dimension_numbers = #tpu.dot_dimension_numbers<[1], [0], [0], [1], [0, 0, 1, 1], [], []>} : vector<128x128xbf16>, vector<128x128xbf16>, vector<128x128xf32> -> vector<128x128xf32>
    %7 = arith.addf %3, %6 : vector<128x128xf32>
    %c0_6 = arith.constant 0 : index
    %c0_7 = arith.constant 0 : index
    %8 = vector.load %arg8[%c0_6, %c0_7] : memref<128x128xf32, #tpu.memory_space<vmem>>, vector<128x128xf32>
    tpu.vector_store %arg8[%c0_6, %c0_7], %7 {strides = array<i32>} : memref<128x128xf32, #tpu.memory_space<vmem>>, vector<128x128xf32>,
    %c0_i32_8 = arith.constant 0 : i32
    %9 = arith.cmpi eq, %arg2, %c0_i32_8 : i32
    %10 = arith.extui %9 : i1 to i32
    %c0_i32_9 = arith.constant 0 : i32
    %11 = arith.cmpi ne, %10, %c0_i32_9 : i32
    scf.if %11 {
      %c0_10 = arith.constant 0 : index
      %c0_11 = arith.constant 0 : index
      %12 = vector.load %arg8[%c0_10, %c0_11] : memref<128x128xf32, #tpu.memory_space<vmem>>, vector<128x128xf32>
      %c0_12 = arith.constant 0 : index
      %c0_13 = arith.constant 0 : index
      %13 = vector.load %arg5[%c0_12, %c0_13] : memref<1x128xf32, #tpu.memory_space<vmem>>, vector<1x128xf32>
      %14 = vector.broadcast %13 : vector<1x128xf32> to vector<128x128xf32>
      %15 = arith.addf %12, %14 : vector<128x128xf32>
      %c0_14 = arith.constant 0 : index
      %c0_15 = arith.constant 0 : index
      %16 = vector.load %arg6[%c0_14, %c0_15] : memref<1x128xf32, #tpu.memory_space<vmem>>, vector<1x128xf32>
      %cst_16 = arith.constant 0.000000e+00 : f32
      %17 = vector.broadcast %cst_16 : f32 to vector<1x128xf32>
      %18 = arith.cmpf one, %16, %17 : vector<1x128xf32>
      %cst_17 = arith.constant 0.000000e+00 : f32
      %19 = vector.broadcast %cst_17 : f32 to vector<128x128xf32>
      %20 = arith.maximumf %15, %19 : vector<128x128xf32>
      %21 = vector.shape_cast %18 : vector<1x128xi1> to vector<1x128xi1>
      %22 = vector.broadcast %21 : vector<1x128xi1> to vector<128x128xi1>
      %23 = arith.select %22, %20, %15 : vector<128x128xi1>, vector<128x128xf32>
      %c0_18 = arith.constant 0 : index
      %c0_19 = arith.constant 0 : index
      %24 = vector.load %arg7[%c0_18, %c0_19] : memref<128x128xf32, #tpu.memory_space<vmem>>, vector<128x128xf32>
      tpu.vector_store %arg7[%c0_18, %c0_19], %23 {strides = array<i32>} : memref<128x128xf32, #tpu.memory_space<vmem>>, vector<128x128xf32>,
    } else {
    }
    return
  }
  func.func @transform_0(%arg0: i32, %arg1: i32, %arg2: i32) -> (i32, i32) {
    %c0_i32 = arith.constant 0 : i32
    return %arg0, %arg2 : i32, i32
  }
  func.func @transform_1(%arg0: i32, %arg1: i32, %arg2: i32) -> (i32, i32) {
    %c0_i32 = arith.constant 0 : i32
    return %arg2, %arg1 : i32, i32
  }
  func.func @transform_2(%arg0: i32, %arg1: i32, %arg2: i32) -> (i32, i32) {
    %c0_i32 = arith.constant 0 : i32
    %c0_i32_0 = arith.constant 0 : i32
    return %c0_i32, %arg1 : i32, i32
  }
  func.func @transform_3(%arg0: i32, %arg1: i32, %arg2: i32) -> (i32, i32) {
    %c0_i32 = arith.constant 0 : i32
    %c0_i32_0 = arith.constant 0 : i32
    return %c0_i32, %arg1 : i32, i32
  }
  func.func @transform_4(%arg0: i32, %arg1: i32, %arg2: i32) -> (i32, i32) {
    %c0_i32 = arith.constant 0 : i32
    return %arg0, %arg1 : i32, i32
  }
}

module attributes {stable_mosaic.version = 11 : i64} {
  func.func @_gap_kernel(%arg0: memref<2x16x32xf32, #tpu.memory_space<vmem>>, %arg1: memref<2x32xf32, #tpu.memory_space<vmem>>) attributes {dimension_semantics = [], scalar_prefetch = 0 : i64, scratch_operands = 0 : i64, tpu.core_type = #tpu.core_type<tc>} {
    %c0 = arith.constant 0 : index
    %c0_0 = arith.constant 0 : index
    %c0_1 = arith.constant 0 : index
    %0 = vector.load %arg0[%c0, %c0_0, %c0_1] : memref<2x16x32xf32, #tpu.memory_space<vmem>>, vector<2x16x32xf32>
    %cst = arith.constant dense<0.000000e+00> : vector<2x32xf32>
    %1 = vector.multi_reduction <add>, %0, %cst [1] : vector<2x16x32xf32> to vector<2x32xf32>
    %cst_2 = arith.constant 1.600000e+01 : f32
    %2 = vector.broadcast %cst_2 : f32 to vector<2x32xf32>
    %3 = arith.divf %1, %2 : vector<2x32xf32>
    %c0_3 = arith.constant 0 : index
    %c0_4 = arith.constant 0 : index
    %4 = vector.load %arg1[%c0_3, %c0_4] : memref<2x32xf32, #tpu.memory_space<vmem>>, vector<2x32xf32>
    tpu.vector_store %arg1[%c0_3, %c0_4], %3 {strides = array<i32>} : memref<2x32xf32, #tpu.memory_space<vmem>>, vector<2x32xf32>,
    return
  }
}

module attributes {stable_mosaic.version = 11 : i64} {
  func.func @_gemm_kernel(%arg0: i32, %arg1: i32, %arg2: i32, %arg3: memref<32x256xbf16, #tpu.memory_space<vmem>>, %arg4: memref<256x128xbf16, #tpu.memory_space<vmem>>, %arg5: memref<1x128xf32, #tpu.memory_space<vmem>>, %arg6: memref<1x128xf32, #tpu.memory_space<vmem>>, %arg7: memref<32x128xf32, #tpu.memory_space<vmem>>, %arg8: memref<32x128xf32, #tpu.memory_space<vmem>>) attributes {dimension_semantics = [#tpu.dimension_semantics<parallel>, #tpu.dimension_semantics<parallel>, #tpu.dimension_semantics<arbitrary>], iteration_bounds = array<i64: 1, 1, 1>, scalar_prefetch = 0 : i64, scratch_operands = 1 : i64, tpu.core_type = #tpu.core_type<tc>, window_params = [{transform_indices = @transform_0, window_bounds = array<i64: 32, 256>}, {transform_indices = @transform_1, window_bounds = array<i64: 256, 128>}, {transform_indices = @transform_2, window_bounds = array<i64: 1, 128>}, {transform_indices = @transform_3, window_bounds = array<i64: 1, 128>}, {transform_indices = @transform_4, window_bounds = array<i64: 32, 128>}]} {
    %c0_i32 = arith.constant 0 : i32
    %0 = arith.cmpi eq, %arg2, %c0_i32 : i32
    %1 = arith.extui %0 : i1 to i32
    %c0_i32_0 = arith.constant 0 : i32
    %2 = arith.cmpi ne, %1, %c0_i32_0 : i32
    scf.if %2 {
      %cst_10 = arith.constant 0.000000e+00 : f32
      %12 = vector.broadcast %cst_10 : f32 to vector<32x128xf32>
      %c0_11 = arith.constant 0 : index
      %c0_12 = arith.constant 0 : index
      %13 = vector.load %arg8[%c0_11, %c0_12] : memref<32x128xf32, #tpu.memory_space<vmem>>, vector<32x128xf32>
      tpu.vector_store %arg8[%c0_11, %c0_12], %12 {strides = array<i32>} : memref<32x128xf32, #tpu.memory_space<vmem>>, vector<32x128xf32>,
    } else {
    }
    %c0 = arith.constant 0 : index
    %c0_1 = arith.constant 0 : index
    %3 = vector.load %arg8[%c0, %c0_1] : memref<32x128xf32, #tpu.memory_space<vmem>>, vector<32x128xf32>
    %c0_2 = arith.constant 0 : index
    %c0_3 = arith.constant 0 : index
    %4 = vector.load %arg3[%c0_2, %c0_3] : memref<32x256xbf16, #tpu.memory_space<vmem>>, vector<32x256xbf16>
    %c0_4 = arith.constant 0 : index
    %c0_5 = arith.constant 0 : index
    %5 = vector.load %arg4[%c0_4, %c0_5] : memref<256x128xbf16, #tpu.memory_space<vmem>>, vector<256x128xbf16>
    %cst = arith.constant dense<0.000000e+00> : vector<32x128xf32>
    %6 = tpu.matmul %4, %5, %cst {dimension_numbers = #tpu.dot_dimension_numbers<[1], [0], [0], [1], [0, 0, 1, 1], [], []>} : vector<32x256xbf16>, vector<256x128xbf16>, vector<32x128xf32> -> vector<32x128xf32>
    %7 = arith.addf %3, %6 : vector<32x128xf32>
    %c0_6 = arith.constant 0 : index
    %c0_7 = arith.constant 0 : index
    %8 = vector.load %arg8[%c0_6, %c0_7] : memref<32x128xf32, #tpu.memory_space<vmem>>, vector<32x128xf32>
    tpu.vector_store %arg8[%c0_6, %c0_7], %7 {strides = array<i32>} : memref<32x128xf32, #tpu.memory_space<vmem>>, vector<32x128xf32>,
    %c0_i32_8 = arith.constant 0 : i32
    %9 = arith.cmpi eq, %arg2, %c0_i32_8 : i32
    %10 = arith.extui %9 : i1 to i32
    %c0_i32_9 = arith.constant 0 : i32
    %11 = arith.cmpi ne, %10, %c0_i32_9 : i32
    scf.if %11 {
      %c0_10 = arith.constant 0 : index
      %c0_11 = arith.constant 0 : index
      %12 = vector.load %arg8[%c0_10, %c0_11] : memref<32x128xf32, #tpu.memory_space<vmem>>, vector<32x128xf32>
      %c0_12 = arith.constant 0 : index
      %c0_13 = arith.constant 0 : index
      %13 = vector.load %arg5[%c0_12, %c0_13] : memref<1x128xf32, #tpu.memory_space<vmem>>, vector<1x128xf32>
      %14 = vector.broadcast %13 : vector<1x128xf32> to vector<32x128xf32>
      %15 = arith.addf %12, %14 : vector<32x128xf32>
      %c0_14 = arith.constant 0 : index
      %c0_15 = arith.constant 0 : index
      %16 = vector.load %arg6[%c0_14, %c0_15] : memref<1x128xf32, #tpu.memory_space<vmem>>, vector<1x128xf32>
      %cst_16 = arith.constant 0.000000e+00 : f32
      %17 = vector.broadcast %cst_16 : f32 to vector<1x128xf32>
      %18 = arith.cmpf one, %16, %17 : vector<1x128xf32>
      %cst_17 = arith.constant 0.000000e+00 : f32
      %19 = vector.broadcast %cst_17 : f32 to vector<32x128xf32>
      %20 = arith.maximumf %15, %19 : vector<32x128xf32>
      %21 = vector.shape_cast %18 : vector<1x128xi1> to vector<1x128xi1>
      %22 = vector.broadcast %21 : vector<1x128xi1> to vector<32x128xi1>
      %23 = arith.select %22, %20, %15 : vector<32x128xi1>, vector<32x128xf32>
      %c0_18 = arith.constant 0 : index
      %c0_19 = arith.constant 0 : index
      %24 = vector.load %arg7[%c0_18, %c0_19] : memref<32x128xf32, #tpu.memory_space<vmem>>, vector<32x128xf32>
      tpu.vector_store %arg7[%c0_18, %c0_19], %23 {strides = array<i32>} : memref<32x128xf32, #tpu.memory_space<vmem>>, vector<32x128xf32>,
    } else {
    }
    return
  }
  func.func @transform_0(%arg0: i32, %arg1: i32, %arg2: i32) -> (i32, i32) {
    %c0_i32 = arith.constant 0 : i32
    return %arg0, %arg2 : i32, i32
  }
  func.func @transform_1(%arg0: i32, %arg1: i32, %arg2: i32) -> (i32, i32) {
    %c0_i32 = arith.constant 0 : i32
    return %arg2, %arg1 : i32, i32
  }
  func.func @transform_2(%arg0: i32, %arg1: i32, %arg2: i32) -> (i32, i32) {
    %c0_i32 = arith.constant 0 : i32
    %c0_i32_0 = arith.constant 0 : i32
    return %c0_i32, %arg1 : i32, i32
  }
  func.func @transform_3(%arg0: i32, %arg1: i32, %arg2: i32) -> (i32, i32) {
    %c0_i32 = arith.constant 0 : i32
    %c0_i32_0 = arith.constant 0 : i32
    return %c0_i32, %arg1 : i32, i32
  }
  func.func @transform_4(%arg0: i32, %arg1: i32, %arg2: i32) -> (i32, i32) {
    %c0_i32 = arith.constant 0 : i32
    return %arg0, %arg1 : i32, i32
  }
}

module attributes {stable_mosaic.version = 11 : i64} {
  func.func @_gemm_kernel(%arg0: i32, %arg1: i32, %arg2: i32, %arg3: memref<8x128xbf16, #tpu.memory_space<vmem>>, %arg4: memref<128x128xbf16, #tpu.memory_space<vmem>>, %arg5: memref<1x128xf32, #tpu.memory_space<vmem>>, %arg6: memref<1x128xf32, #tpu.memory_space<vmem>>, %arg7: memref<8x128xf32, #tpu.memory_space<vmem>>, %arg8: memref<8x128xf32, #tpu.memory_space<vmem>>) attributes {dimension_semantics = [#tpu.dimension_semantics<parallel>, #tpu.dimension_semantics<parallel>, #tpu.dimension_semantics<arbitrary>], iteration_bounds = array<i64: 1, 1, 1>, scalar_prefetch = 0 : i64, scratch_operands = 1 : i64, tpu.core_type = #tpu.core_type<tc>, window_params = [{transform_indices = @transform_0, window_bounds = array<i64: 8, 128>}, {transform_indices = @transform_1, window_bounds = array<i64: 128, 128>}, {transform_indices = @transform_2, window_bounds = array<i64: 1, 128>}, {transform_indices = @transform_3, window_bounds = array<i64: 1, 128>}, {transform_indices = @transform_4, window_bounds = array<i64: 8, 128>}]} {
    %c0_i32 = arith.constant 0 : i32
    %0 = arith.cmpi eq, %arg2, %c0_i32 : i32
    %1 = arith.extui %0 : i1 to i32
    %c0_i32_0 = arith.constant 0 : i32
    %2 = arith.cmpi ne, %1, %c0_i32_0 : i32
    scf.if %2 {
      %cst_10 = arith.constant 0.000000e+00 : f32
      %12 = vector.broadcast %cst_10 : f32 to vector<8x128xf32>
      %c0_11 = arith.constant 0 : index
      %c0_12 = arith.constant 0 : index
      %13 = vector.load %arg8[%c0_11, %c0_12] : memref<8x128xf32, #tpu.memory_space<vmem>>, vector<8x128xf32>
      tpu.vector_store %arg8[%c0_11, %c0_12], %12 {strides = array<i32>} : memref<8x128xf32, #tpu.memory_space<vmem>>, vector<8x128xf32>,
    } else {
    }
    %c0 = arith.constant 0 : index
    %c0_1 = arith.constant 0 : index
    %3 = vector.load %arg8[%c0, %c0_1] : memref<8x128xf32, #tpu.memory_space<vmem>>, vector<8x128xf32>
    %c0_2 = arith.constant 0 : index
    %c0_3 = arith.constant 0 : index
    %4 = vector.load %arg3[%c0_2, %c0_3] : memref<8x128xbf16, #tpu.memory_space<vmem>>, vector<8x128xbf16>
    %c0_4 = arith.constant 0 : index
    %c0_5 = arith.constant 0 : index
    %5 = vector.load %arg4[%c0_4, %c0_5] : memref<128x128xbf16, #tpu.memory_space<vmem>>, vector<128x128xbf16>
    %cst = arith.constant dense<0.000000e+00> : vector<8x128xf32>
    %6 = tpu.matmul %4, %5, %cst {dimension_numbers = #tpu.dot_dimension_numbers<[1], [0], [0], [1], [0, 0, 1, 1], [], []>} : vector<8x128xbf16>, vector<128x128xbf16>, vector<8x128xf32> -> vector<8x128xf32>
    %7 = arith.addf %3, %6 : vector<8x128xf32>
    %c0_6 = arith.constant 0 : index
    %c0_7 = arith.constant 0 : index
    %8 = vector.load %arg8[%c0_6, %c0_7] : memref<8x128xf32, #tpu.memory_space<vmem>>, vector<8x128xf32>
    tpu.vector_store %arg8[%c0_6, %c0_7], %7 {strides = array<i32>} : memref<8x128xf32, #tpu.memory_space<vmem>>, vector<8x128xf32>,
    %c0_i32_8 = arith.constant 0 : i32
    %9 = arith.cmpi eq, %arg2, %c0_i32_8 : i32
    %10 = arith.extui %9 : i1 to i32
    %c0_i32_9 = arith.constant 0 : i32
    %11 = arith.cmpi ne, %10, %c0_i32_9 : i32
    scf.if %11 {
      %c0_10 = arith.constant 0 : index
      %c0_11 = arith.constant 0 : index
      %12 = vector.load %arg8[%c0_10, %c0_11] : memref<8x128xf32, #tpu.memory_space<vmem>>, vector<8x128xf32>
      %c0_12 = arith.constant 0 : index
      %c0_13 = arith.constant 0 : index
      %13 = vector.load %arg5[%c0_12, %c0_13] : memref<1x128xf32, #tpu.memory_space<vmem>>, vector<1x128xf32>
      %14 = vector.broadcast %13 : vector<1x128xf32> to vector<8x128xf32>
      %15 = arith.addf %12, %14 : vector<8x128xf32>
      %c0_14 = arith.constant 0 : index
      %c0_15 = arith.constant 0 : index
      %16 = vector.load %arg6[%c0_14, %c0_15] : memref<1x128xf32, #tpu.memory_space<vmem>>, vector<1x128xf32>
      %cst_16 = arith.constant 0.000000e+00 : f32
      %17 = vector.broadcast %cst_16 : f32 to vector<1x128xf32>
      %18 = arith.cmpf one, %16, %17 : vector<1x128xf32>
      %cst_17 = arith.constant 0.000000e+00 : f32
      %19 = vector.broadcast %cst_17 : f32 to vector<8x128xf32>
      %20 = arith.maximumf %15, %19 : vector<8x128xf32>
      %21 = vector.shape_cast %18 : vector<1x128xi1> to vector<1x128xi1>
      %22 = vector.broadcast %21 : vector<1x128xi1> to vector<8x128xi1>
      %23 = arith.select %22, %20, %15 : vector<8x128xi1>, vector<8x128xf32>
      %c0_18 = arith.constant 0 : index
      %c0_19 = arith.constant 0 : index
      %24 = vector.load %arg7[%c0_18, %c0_19] : memref<8x128xf32, #tpu.memory_space<vmem>>, vector<8x128xf32>
      tpu.vector_store %arg7[%c0_18, %c0_19], %23 {strides = array<i32>} : memref<8x128xf32, #tpu.memory_space<vmem>>, vector<8x128xf32>,
    } else {
    }
    return
  }
  func.func @transform_0(%arg0: i32, %arg1: i32, %arg2: i32) -> (i32, i32) {
    %c0_i32 = arith.constant 0 : i32
    return %arg0, %arg2 : i32, i32
  }
  func.func @transform_1(%arg0: i32, %arg1: i32, %arg2: i32) -> (i32, i32) {
    %c0_i32 = arith.constant 0 : i32
    return %arg2, %arg1 : i32, i32
  }
  func.func @transform_2(%arg0: i32, %arg1: i32, %arg2: i32) -> (i32, i32) {
    %c0_i32 = arith.constant 0 : i32
    %c0_i32_0 = arith.constant 0 : i32
    return %c0_i32, %arg1 : i32, i32
  }
  func.func @transform_3(%arg0: i32, %arg1: i32, %arg2: i32) -> (i32, i32) {
    %c0_i32 = arith.constant 0 : i32
    %c0_i32_0 = arith.constant 0 : i32
    return %c0_i32, %arg1 : i32, i32
  }
  func.func @transform_4(%arg0: i32, %arg1: i32, %arg2: i32) -> (i32, i32) {
    %c0_i32 = arith.constant 0 : i32
    return %arg0, %arg1 : i32, i32
  }
}

module attributes {stable_mosaic.version = 11 : i64} {
  func.func @_in_relu_kernel(%arg0: i32, %arg1: memref<1x256x8xf32, #tpu.memory_space<vmem>>, %arg2: memref<1x256x8xf32, #tpu.memory_space<vmem>>) attributes {dimension_semantics = [#tpu.dimension_semantics<parallel>], iteration_bounds = array<i64: 2>, scalar_prefetch = 0 : i64, scratch_operands = 0 : i64, tpu.core_type = #tpu.core_type<tc>, window_params = [{transform_indices = @transform_0, window_bounds = array<i64: 1, 256, 8>}, {transform_indices = @transform_1, window_bounds = array<i64: 1, 256, 8>}]} {
    %c0 = arith.constant 0 : index
    %c0_0 = arith.constant 0 : index
    %c0_1 = arith.constant 0 : index
    %0 = vector.load %arg1[%c0, %c0_0, %c0_1] : memref<1x256x8xf32, #tpu.memory_space<vmem>>, vector<1x256x8xf32>
    %cst = arith.constant dense<0.000000e+00> : vector<1x8xf32>
    %1 = vector.multi_reduction <add>, %0, %cst [1] : vector<1x256x8xf32> to vector<1x8xf32>
    %2 = vector.shape_cast %1 : vector<1x8xf32> to vector<1x1x8xf32>
    %cst_2 = arith.constant 2.560000e+02 : f32
    %3 = vector.broadcast %cst_2 : f32 to vector<1x1x8xf32>
    %4 = arith.divf %2, %3 : vector<1x1x8xf32>
    %5 = vector.broadcast %4 : vector<1x1x8xf32> to vector<1x256x8xf32>
    %6 = arith.subf %0, %5 : vector<1x256x8xf32>
    %7 = arith.mulf %6, %6 : vector<1x256x8xf32>
    %cst_3 = arith.constant dense<0.000000e+00> : vector<1x8xf32>
    %8 = vector.multi_reduction <add>, %7, %cst_3 [1] : vector<1x256x8xf32> to vector<1x8xf32>
    %9 = vector.shape_cast %8 : vector<1x8xf32> to vector<1x1x8xf32>
    %cst_4 = arith.constant 2.560000e+02 : f32
    %10 = vector.broadcast %cst_4 : f32 to vector<1x1x8xf32>
    %11 = arith.divf %9, %10 : vector<1x1x8xf32>
    %cst_5 = arith.constant 9.99999974E-6 : f32
    %12 = vector.broadcast %cst_5 : f32 to vector<1x1x8xf32>
    %13 = arith.addf %11, %12 : vector<1x1x8xf32>
    %14 = math.rsqrt %13 : vector<1x1x8xf32>
    %15 = vector.broadcast %14 : vector<1x1x8xf32> to vector<1x256x8xf32>
    %16 = arith.mulf %6, %15 : vector<1x256x8xf32>
    %cst_6 = arith.constant 0.000000e+00 : f32
    %17 = vector.broadcast %cst_6 : f32 to vector<1x256x8xf32>
    %18 = arith.maximumf %16, %17 : vector<1x256x8xf32>
    %c0_7 = arith.constant 0 : index
    %c0_8 = arith.constant 0 : index
    %c0_9 = arith.constant 0 : index
    %19 = vector.load %arg2[%c0_7, %c0_8, %c0_9] : memref<1x256x8xf32, #tpu.memory_space<vmem>>, vector<1x256x8xf32>
    tpu.vector_store %arg2[%c0_7, %c0_8, %c0_9], %18 {strides = array<i32>} : memref<1x256x8xf32, #tpu.memory_space<vmem>>, vector<1x256x8xf32>,
    return
  }
  func.func @transform_0(%arg0: i32) -> (i32, i32, i32) {
    %c0_i32 = arith.constant 0 : i32
    %c0_i32_0 = arith.constant 0 : i32
    %c0_i32_1 = arith.constant 0 : i32
    return %arg0, %c0_i32, %c0_i32_0 : i32, i32, i32
  }
  func.func @transform_1(%arg0: i32) -> (i32, i32, i32) {
    %c0_i32 = arith.constant 0 : i32
    %c0_i32_0 = arith.constant 0 : i32
    %c0_i32_1 = arith.constant 0 : i32
    return %arg0, %c0_i32, %c0_i32_0 : i32, i32, i32
  }
}

module attributes {stable_mosaic.version = 11 : i64} {
  func.func @_in_relu_kernel(%arg0: i32, %arg1: memref<1x64x16xf32, #tpu.memory_space<vmem>>, %arg2: memref<1x64x16xf32, #tpu.memory_space<vmem>>) attributes {dimension_semantics = [#tpu.dimension_semantics<parallel>], iteration_bounds = array<i64: 2>, scalar_prefetch = 0 : i64, scratch_operands = 0 : i64, tpu.core_type = #tpu.core_type<tc>, window_params = [{transform_indices = @transform_0, window_bounds = array<i64: 1, 64, 16>}, {transform_indices = @transform_1, window_bounds = array<i64: 1, 64, 16>}]} {
    %c0 = arith.constant 0 : index
    %c0_0 = arith.constant 0 : index
    %c0_1 = arith.constant 0 : index
    %0 = vector.load %arg1[%c0, %c0_0, %c0_1] : memref<1x64x16xf32, #tpu.memory_space<vmem>>, vector<1x64x16xf32>
    %cst = arith.constant dense<0.000000e+00> : vector<1x16xf32>
    %1 = vector.multi_reduction <add>, %0, %cst [1] : vector<1x64x16xf32> to vector<1x16xf32>
    %2 = vector.shape_cast %1 : vector<1x16xf32> to vector<1x1x16xf32>
    %cst_2 = arith.constant 6.400000e+01 : f32
    %3 = vector.broadcast %cst_2 : f32 to vector<1x1x16xf32>
    %4 = arith.divf %2, %3 : vector<1x1x16xf32>
    %5 = vector.broadcast %4 : vector<1x1x16xf32> to vector<1x64x16xf32>
    %6 = arith.subf %0, %5 : vector<1x64x16xf32>
    %7 = arith.mulf %6, %6 : vector<1x64x16xf32>
    %cst_3 = arith.constant dense<0.000000e+00> : vector<1x16xf32>
    %8 = vector.multi_reduction <add>, %7, %cst_3 [1] : vector<1x64x16xf32> to vector<1x16xf32>
    %9 = vector.shape_cast %8 : vector<1x16xf32> to vector<1x1x16xf32>
    %cst_4 = arith.constant 6.400000e+01 : f32
    %10 = vector.broadcast %cst_4 : f32 to vector<1x1x16xf32>
    %11 = arith.divf %9, %10 : vector<1x1x16xf32>
    %cst_5 = arith.constant 9.99999974E-6 : f32
    %12 = vector.broadcast %cst_5 : f32 to vector<1x1x16xf32>
    %13 = arith.addf %11, %12 : vector<1x1x16xf32>
    %14 = math.rsqrt %13 : vector<1x1x16xf32>
    %15 = vector.broadcast %14 : vector<1x1x16xf32> to vector<1x64x16xf32>
    %16 = arith.mulf %6, %15 : vector<1x64x16xf32>
    %cst_6 = arith.constant 0.000000e+00 : f32
    %17 = vector.broadcast %cst_6 : f32 to vector<1x64x16xf32>
    %18 = arith.maximumf %16, %17 : vector<1x64x16xf32>
    %c0_7 = arith.constant 0 : index
    %c0_8 = arith.constant 0 : index
    %c0_9 = arith.constant 0 : index
    %19 = vector.load %arg2[%c0_7, %c0_8, %c0_9] : memref<1x64x16xf32, #tpu.memory_space<vmem>>, vector<1x64x16xf32>
    tpu.vector_store %arg2[%c0_7, %c0_8, %c0_9], %18 {strides = array<i32>} : memref<1x64x16xf32, #tpu.memory_space<vmem>>, vector<1x64x16xf32>,
    return
  }
  func.func @transform_0(%arg0: i32) -> (i32, i32, i32) {
    %c0_i32 = arith.constant 0 : i32
    %c0_i32_0 = arith.constant 0 : i32
    %c0_i32_1 = arith.constant 0 : i32
    return %arg0, %c0_i32, %c0_i32_0 : i32, i32, i32
  }
  func.func @transform_1(%arg0: i32) -> (i32, i32, i32) {
    %c0_i32 = arith.constant 0 : i32
    %c0_i32_0 = arith.constant 0 : i32
    %c0_i32_1 = arith.constant 0 : i32
    return %arg0, %c0_i32, %c0_i32_0 : i32, i32, i32
  }
}

module attributes {stable_mosaic.version = 11 : i64} {
  func.func @_in_relu_kernel(%arg0: i32, %arg1: memref<1x16x32xf32, #tpu.memory_space<vmem>>, %arg2: memref<1x16x32xf32, #tpu.memory_space<vmem>>) attributes {dimension_semantics = [#tpu.dimension_semantics<parallel>], iteration_bounds = array<i64: 2>, scalar_prefetch = 0 : i64, scratch_operands = 0 : i64, tpu.core_type = #tpu.core_type<tc>, window_params = [{transform_indices = @transform_0, window_bounds = array<i64: 1, 16, 32>}, {transform_indices = @transform_1, window_bounds = array<i64: 1, 16, 32>}]} {
    %c0 = arith.constant 0 : index
    %c0_0 = arith.constant 0 : index
    %c0_1 = arith.constant 0 : index
    %0 = vector.load %arg1[%c0, %c0_0, %c0_1] : memref<1x16x32xf32, #tpu.memory_space<vmem>>, vector<1x16x32xf32>
    %cst = arith.constant dense<0.000000e+00> : vector<1x32xf32>
    %1 = vector.multi_reduction <add>, %0, %cst [1] : vector<1x16x32xf32> to vector<1x32xf32>
    %2 = vector.shape_cast %1 : vector<1x32xf32> to vector<1x1x32xf32>
    %cst_2 = arith.constant 1.600000e+01 : f32
    %3 = vector.broadcast %cst_2 : f32 to vector<1x1x32xf32>
    %4 = arith.divf %2, %3 : vector<1x1x32xf32>
    %5 = vector.broadcast %4 : vector<1x1x32xf32> to vector<1x16x32xf32>
    %6 = arith.subf %0, %5 : vector<1x16x32xf32>
    %7 = arith.mulf %6, %6 : vector<1x16x32xf32>
    %cst_3 = arith.constant dense<0.000000e+00> : vector<1x32xf32>
    %8 = vector.multi_reduction <add>, %7, %cst_3 [1] : vector<1x16x32xf32> to vector<1x32xf32>
    %9 = vector.shape_cast %8 : vector<1x32xf32> to vector<1x1x32xf32>
    %cst_4 = arith.constant 1.600000e+01 : f32
    %10 = vector.broadcast %cst_4 : f32 to vector<1x1x32xf32>
    %11 = arith.divf %9, %10 : vector<1x1x32xf32>
    %cst_5 = arith.constant 9.99999974E-6 : f32
    %12 = vector.broadcast %cst_5 : f32 to vector<1x1x32xf32>
    %13 = arith.addf %11, %12 : vector<1x1x32xf32>
    %14 = math.rsqrt %13 : vector<1x1x32xf32>
    %15 = vector.broadcast %14 : vector<1x1x32xf32> to vector<1x16x32xf32>
    %16 = arith.mulf %6, %15 : vector<1x16x32xf32>
    %cst_6 = arith.constant 0.000000e+00 : f32
    %17 = vector.broadcast %cst_6 : f32 to vector<1x16x32xf32>
    %18 = arith.maximumf %16, %17 : vector<1x16x32xf32>
    %c0_7 = arith.constant 0 : index
    %c0_8 = arith.constant 0 : index
    %c0_9 = arith.constant 0 : index
    %19 = vector.load %arg2[%c0_7, %c0_8, %c0_9] : memref<1x16x32xf32, #tpu.memory_space<vmem>>, vector<1x16x32xf32>
    tpu.vector_store %arg2[%c0_7, %c0_8, %c0_9], %18 {strides = array<i32>} : memref<1x16x32xf32, #tpu.memory_space<vmem>>, vector<1x16x32xf32>,
    return
  }
  func.func @transform_0(%arg0: i32) -> (i32, i32, i32) {
    %c0_i32 = arith.constant 0 : i32
    %c0_i32_0 = arith.constant 0 : i32
    %c0_i32_1 = arith.constant 0 : i32
    return %arg0, %c0_i32, %c0_i32_0 : i32, i32, i32
  }
  func.func @transform_1(%arg0: i32) -> (i32, i32, i32) {
    %c0_i32 = arith.constant 0 : i32
    %c0_i32_0 = arith.constant 0 : i32
    %c0_i32_1 = arith.constant 0 : i32
    return %arg0, %c0_i32, %c0_i32_0 : i32, i32, i32
  }
}

</mosaic_0001>

<bundles_post_ra>
// kernel: encoder_forward.10
= control target key start
LH: loop header
LB: loop body
LE: loop exit
PB: predicated region body
PF: predicated region fallthrough
CT: control target
= control target key end

     0   :  { %v1647_v0 = vmov 0   ;;  %s2341_s1 = inlined_call_operand.vmem [shape: bf16[256,128], index: 1, kind: input, shape index: {}]   ;;  %s2342_s0 = inlined_call_operand.vmem [shape: bf16[512,256], index: 0, kind: input, shape index: {}]   ;;  %s2343_s3 = inlined_call_operand.vmem [shape: f32[1,128], index: 3, kind: input, shape index: {}]   ;;  %s2344_s2 = inlined_call_operand.vmem [shape: f32[1,128], index: 2, kind: input, shape index: {}]   ;;  %s2345_s4 = inlined_call_operand.vmem [shape: f32[512,128], index: 4, kind: output, shape index: {}]  }
   0x1   :  { %662 = vmatprep.subr.bf16.mxu0 %v1647_v0  ;;  %1502 = vmatprep.subr.bf16.mxu1 %v1647_v0  ;;  %v1535_v1 = vld [vmem:[%s2341_s1] sm:$0xff]   ;;  %v1536_v2 = vld [vmem:[%s2341_s1 + $0x8] sm:$0xff]   ;;  %v1537_v3 = vld [vmem:[%s2341_s1 + $0x10] sm:$0xff]  }
   0x2   :  { %663 = vmatpush1.bf16.msra.mxu0 %v1535_v1  ;;  %1518 = vmatpush1.bf16.msra.mxu1 %v1535_v1  ;;  %v1538_v4 = vld [vmem:[%s2341_s1 + $0x18] sm:$0xff]   ;;  %v1539_v5 = vld [vmem:[%s2341_s1 + $0x20] sm:$0xff]   ;;  %v1540_v7 = vld [vmem:[%s2341_s1 + $0x28] sm:$0xff]  }
   0x3   :  { %664 = vmatprep.subr.bf16.mxu0 %v1647_v0  ;;  %1503 = vmatprep.subr.bf16.mxu1 %v1647_v0  ;;  %v1553_v6 = vld [vmem:[%s2342_s0 + $0x4] ss:$8 sps:$4 sm:$0xff]   ;;  %v1541_v9 = vld [vmem:[%s2341_s1 + $0x30] sm:$0xff]   ;;  %v1542_v10 = vld [vmem:[%s2341_s1 + $0x38] sm:$0xff]  }
   0x4   :  { %v1556_v8 = vld [vmem:[%s2342_s0 + $0x104] ss:$8 sps:$4 sm:$0xff]   ;;  %694 = vmatprep.mubr.bf16.mxu0 %v1553_v6  ;;  %v1545_v13 = vld [vmem:[%s2341_s1 + $0x50] sm:$0xff]   ;;  %v1546_v14 = vld [vmem:[%s2341_s1 + $0x58] sm:$0xff]  }
   0x5   :  { %822 = vmatprep.mubr.bf16.mxu1 %v1556_v8  ;;  %v1543_v11 = vld [vmem:[%s2341_s1 + $0x40] sm:$0xff]   ;;  %v1544_v12 = vld [vmem:[%s2341_s1 + $0x48] sm:$0xff]   ;;  %v1549_v17 = vld [vmem:[%s2341_s1 + $0x70] sm:$0xff]  }
   0x6   :  { %665 = vmatpush1.bf16.msra.mxu0 %v1536_v2  ;;  %1519 = vmatpush1.bf16.msra.mxu1 %v1536_v2  ;;  %v1547_v15 = vld [vmem:[%s2341_s1 + $0x60] sm:$0xff]   ;;  %v1548_v16 = vld [vmem:[%s2341_s1 + $0x68] sm:$0xff]   ;;  %v1550_v18 = vld [vmem:[%s2341_s1 + $0x78] sm:$0xff]  }
   0x7   :  { %666 = vmatprep.subr.bf16.mxu0 %v1647_v0  ;;  %1504 = vmatprep.subr.bf16.mxu1 %v1647_v0  ;;  %v1551_v19 = vld [vmem:[%s2342_s0] ss:$8 sps:$4 sm:$0xff]   ;;  %v1557_v21 = vld [vmem:[%s2342_s0 + $0x14] ss:$8 sps:$4 sm:$0xff]   ;;  %v1561_v23 = vld [vmem:[%s2342_s0 + $0x10] ss:$8 sps:$4 sm:$0xff]  }
   0x8   :  { %v1554_v20 = vld [vmem:[%s2342_s0 + $0x100] ss:$8 sps:$4 sm:$0xff]   ;;  %v1559_v22 = vld [vmem:[%s2342_s0 + $0x114] ss:$8 sps:$4 sm:$0xff]   ;;  %v1562_v24 = vld [vmem:[%s2342_s0 + $0x110] ss:$8 sps:$4 sm:$0xff]  }
   0x9   :  { %v1563_v25 = vld [vmem:[%s2342_s0 + $0x24] ss:$8 sps:$4 sm:$0xff]   ;;  %v1567_v27 = vld [vmem:[%s2342_s0 + $0x20] ss:$8 sps:$4 sm:$0xff]   ;;  %v1569_v29 = vld [vmem:[%s2342_s0 + $0x34] ss:$8 sps:$4 sm:$0xff]  }
   0xa   :  { %667 = vmatpush1.bf16.msra.mxu0 %v1537_v3  ;;  %1520 = vmatpush1.bf16.msra.mxu1 %v1537_v3  ;;  %v1565_v26 = vld [vmem:[%s2342_s0 + $0x124] ss:$8 sps:$4 sm:$0xff]   ;;  %v1568_v28 = vld [vmem:[%s2342_s0 + $0x120] ss:$8 sps:$4 sm:$0xff]   ;;  %v1571_v30 = vld [vmem:[%s2342_s0 + $0x134] ss:$8 sps:$4 sm:$0xff]  }
   0xb   :  { %668 = vmatprep.subr.bf16.mxu0 %v1647_v0  ;;  %1505 = vmatprep.subr.bf16.mxu1 %v1647_v0  ;;  %v1573_v31 = vld [vmem:[%s2342_s0 + $0x30] ss:$8 sps:$4 sm:$0xff]   ;;  %v1575_v33 = vld [vmem:[%s2342_s0 + $0x44] ss:$8 sps:$4 sm:$0xff]   ;;  %v1579_v35 = vld [vmem:[%s2342_s0 + $0x40] ss:$8 sps:$4 sm:$0xff]  }
   0xc   :  { %v1574_v32 = vld [vmem:[%s2342_s0 + $0x130] ss:$8 sps:$4 sm:$0xff]   ;;  %v1577_v34 = vld [vmem:[%s2342_s0 + $0x144] ss:$8 sps:$4 sm:$0xff]   ;;  %v1580_v36 = vld [vmem:[%s2342_s0 + $0x140] ss:$8 sps:$4 sm:$0xff]  }
   0xd   :  { %v1581_v37 = vld [vmem:[%s2342_s0 + $0x54] ss:$8 sps:$4 sm:$0xff]   ;;  %v1585_v39 = vld [vmem:[%s2342_s0 + $0x50] ss:$8 sps:$4 sm:$0xff]   ;;  %v1587_v41 = vld [vmem:[%s2342_s0 + $0x64] ss:$8 sps:$4 sm:$0xff]  }
   0xe   :  { %669 = vmatpush1.bf16.msra.mxu0 %v1538_v4  ;;  %1521 = vmatpush1.bf16.msra.mxu1 %v1538_v4  ;;  %v1583_v38 = vld [vmem:[%s2342_s0 + $0x154] ss:$8 sps:$4 sm:$0xff]   ;;  %v1586_v40 = vld [vmem:[%s2342_s0 + $0x150] ss:$8 sps:$4 sm:$0xff]   ;;  %v1589_v42 = vld [vmem:[%s2342_s0 + $0x164] ss:$8 sps:$4 sm:$0xff]  }
   0xf   :  { %670 = vmatprep.subr.bf16.mxu0 %v1647_v0  ;;  %1506 = vmatprep.subr.bf16.mxu1 %v1647_v0  ;;  %v1591_v43 = vld [vmem:[%s2342_s0 + $0x60] ss:$8 sps:$4 sm:$0xff]   ;;  %v1593_v45 = vld [vmem:[%s2342_s0 + $0x74] ss:$8 sps:$4 sm:$0xff]   ;;  %v1597_v47 = vld [vmem:[%s2342_s0 + $0x70] ss:$8 sps:$4 sm:$0xff]  }
  0x10   :  { %v1592_v44 = vld [vmem:[%s2342_s0 + $0x160] ss:$8 sps:$4 sm:$0xff]   ;;  %v1595_v46 = vld [vmem:[%s2342_s0 + $0x174] ss:$8 sps:$4 sm:$0xff]   ;;  %v1598_v48 = vld [vmem:[%s2342_s0 + $0x170] ss:$8 sps:$4 sm:$0xff]  }
  0x11   :  { %v1599_v49 = vld [vmem:[%s2342_s0 + $0x84] ss:$8 sps:$4 sm:$0xff]   ;;  %v1603_v51 = vld [vmem:[%s2342_s0 + $0x80] ss:$8 sps:$4 sm:$0xff]   ;;  %v1605_v53 = vld [vmem:[%s2342_s0 + $0x94] ss:$8 sps:$4 sm:$0xff]  }
  0x12   :  { %671 = vmatpush1.bf16.msra.mxu0 %v1539_v5  ;;  %1522 = vmatpush1.bf16.msra.mxu1 %v1539_v5  ;;  %v1601_v50 = vld [vmem:[%s2342_s0 + $0x184] ss:$8 sps:$4 sm:$0xff]   ;;  %v1604_v52 = vld [vmem:[%s2342_s0 + $0x180] ss:$8 sps:$4 sm:$0xff]   ;;  %v1607_v54 = vld [vmem:[%s2342_s0 + $0x194] ss:$8 sps:$4 sm:$0xff]  }
  0x13   :  { %672 = vmatprep.subr.bf16.mxu0 %v1647_v0  ;;  %1507 = vmatprep.subr.bf16.mxu1 %v1647_v0  ;;  %v1609_v55 = vld [vmem:[%s2342_s0 + $0x90] ss:$8 sps:$4 sm:$0xff]   ;;  %v1611_v57 = vld [vmem:[%s2342_s0 + $0xa4] ss:$8 sps:$4 sm:$0xff]   ;;  %v1615_v59 = vld [vmem:[%s2342_s0 + $0xa0] ss:$8 sps:$4 sm:$0xff]  }
  0x14   :  { %v1610_v56 = vld [vmem:[%s2342_s0 + $0x190] ss:$8 sps:$4 sm:$0xff]   ;;  %v1613_v58 = vld [vmem:[%s2342_s0 + $0x1a4] ss:$8 sps:$4 sm:$0xff]   ;;  %v1616_v60 = vld [vmem:[%s2342_s0 + $0x1a0] ss:$8 sps:$4 sm:$0xff]  }
  0x15   :  { %v1617_v61 = vld [vmem:[%s2342_s0 + $0xb4] ss:$8 sps:$4 sm:$0xff]   ;;  %v1621_v63 = vld [vmem:[%s2342_s0 + $0xb0] ss:$8 sps:$4 sm:$0xff]   ;;  %v1623_v2 = vld [vmem:[%s2342_s0 + $0xc4] ss:$8 sps:$4 sm:$0xff]  }
  0x16   :  { %673 = vmatpush1.bf16.msra.mxu0 %v1540_v7  ;;  %1523 = vmatpush1.bf16.msra.mxu1 %v1540_v7  ;;  %v1619_v62 = vld [vmem:[%s2342_s0 + $0x1b4] ss:$8 sps:$4 sm:$0xff]   ;;  %v1622_v1 = vld [vmem:[%s2342_s0 + $0x1b0] ss:$8 sps:$4 sm:$0xff]   ;;  %v1625_v3 = vld [vmem:[%s2342_s0 + $0x1c4] ss:$8 sps:$4 sm:$0xff]  }
  0x17   :  { %674 = vmatprep.subr.bf16.mxu0 %v1647_v0  ;;  %1508 = vmatprep.subr.bf16.mxu1 %v1647_v0  ;;  %v1627_v4 = vld [vmem:[%s2342_s0 + $0xc0] ss:$8 sps:$4 sm:$0xff]   ;;  %v1629_v6 = vld [vmem:[%s2342_s0 + $0xd4] ss:$8 sps:$4 sm:$0xff]   ;;  %v1633_v8 = vld [vmem:[%s2342_s0 + $0xd0] ss:$8 sps:$4 sm:$0xff]  }
  0x18   :  { %v1628_v5 = vld [vmem:[%s2342_s0 + $0x1c0] ss:$8 sps:$4 sm:$0xff]   ;;  %v1631_v7 = vld [vmem:[%s2342_s0 + $0x1d4] ss:$8 sps:$4 sm:$0xff]  }
  0x1a   :  { %675 = vmatpush1.bf16.msra.mxu0 %v1541_v9  ;;  %1524 = vmatpush1.bf16.msra.mxu1 %v1541_v9  ;;  %v1634_v9 = vld [vmem:[%s2342_s0 + $0x1d0] ss:$8 sps:$4 sm:$0xff]  }
  0x1b   :  { %676 = vmatprep.subr.bf16.mxu0 %v1647_v0  ;;  %1509 = vmatprep.subr.bf16.mxu1 %v1647_v0 }
  0x1e   :  { %677 = vmatpush1.bf16.msra.mxu0 %v1542_v10  ;;  %1525 = vmatpush1.bf16.msra.mxu1 %v1542_v10  ;;  %v1635_v10 = vld [vmem:[%s2342_s0 + $0xe4] ss:$8 sps:$4 sm:$0xff]  }
  0x1f   :  { %678 = vmatprep.subr.bf16.mxu0 %v1647_v0  ;;  %1510 = vmatprep.subr.bf16.mxu1 %v1647_v0 }
  0x22   :  { %679 = vmatpush1.bf16.msra.mxu0 %v1543_v11  ;;  %1526 = vmatpush1.bf16.msra.mxu1 %v1543_v11  ;;  %v1637_v11 = vld [vmem:[%s2342_s0 + $0x1e4] ss:$8 sps:$4 sm:$0xff]  }
  0x23   :  { %680 = vmatprep.subr.bf16.mxu0 %v1647_v0  ;;  %1511 = vmatprep.subr.bf16.mxu1 %v1647_v0 }
  0x26   :  { %681 = vmatpush1.bf16.msra.mxu0 %v1544_v12  ;;  %1527 = vmatpush1.bf16.msra.mxu1 %v1544_v12  ;;  %v1639_v12 = vld [vmem:[%s2342_s0 + $0xe0] ss:$8 sps:$4 sm:$0xff]  }
  0x27   :  { %682 = vmatprep.subr.bf16.mxu0 %v1647_v0  ;;  %1512 = vmatprep.subr.bf16.mxu1 %v1647_v0 }
  0x2a   :  { %683 = vmatpush1.bf16.msra.mxu0 %v1545_v13  ;;  %1528 = vmatpush1.bf16.msra.mxu1 %v1545_v13  ;;  %v1640_v13 = vld [vmem:[%s2342_s0 + $0x1e0] ss:$8 sps:$4 sm:$0xff]  }
  0x2b   :  { %684 = vmatprep.subr.bf16.mxu0 %v1647_v0  ;;  %1513 = vmatprep.subr.bf16.mxu1 %v1647_v0 }
  0x2e   :  { %685 = vmatpush1.bf16.msra.mxu0 %v1546_v14  ;;  %1529 = vmatpush1.bf16.msra.mxu1 %v1546_v14  ;;  %v1641_v14 = vld [vmem:[%s2342_s0 + $0xf4] ss:$8 sps:$4 sm:$0xff]  }
  0x2f   :  { %686 = vmatprep.subr.bf16.mxu0 %v1647_v0  ;;  %1514 = vmatprep.subr.bf16.mxu1 %v1647_v0 }
  0x32   :  { %687 = vmatpush1.bf16.msra.mxu0 %v1547_v15  ;;  %1530 = vmatpush1.bf16.msra.mxu1 %v1547_v15  ;;  %v1643_v15 = vld [vmem:[%s2342_s0 + $0x1f4] ss:$8 sps:$4 sm:$0xff]  }
  0x33   :  { %688 = vmatprep.subr.bf16.mxu0 %v1647_v0  ;;  %1515 = vmatprep.subr.bf16.mxu1 %v1647_v0 }
  0x36   :  { %689 = vmatpush1.bf16.msra.mxu0 %v1548_v16  ;;  %1531 = vmatpush1.bf16.msra.mxu1 %v1548_v16  ;;  %v1645_v16 = vld [vmem:[%s2342_s0 + $0xf0] ss:$8 sps:$4 sm:$0xff]  }
  0x37   :  { %690 = vmatprep.subr.bf16.mxu0 %v1647_v0  ;;  %1516 = vmatprep.subr.bf16.mxu1 %v1647_v0 }
  0x3a   :  { %691 = vmatpush1.bf16.msra.mxu0 %v1549_v17  ;;  %1532 = vmatpush1.bf16.msra.mxu1 %v1549_v17  ;;  %v1646_v17 = vld [vmem:[%s2342_s0 + $0x1f0] ss:$8 sps:$4 sm:$0xff]  }
  0x3b   :  { %692 = vmatprep.subr.bf16.mxu0 %v1647_v0  ;;  %1517 = vmatprep.subr.bf16.mxu1 %v1647_v0 }
  0x3e   :  { %693 = vmatpush1.bf16.msra.mxu0 %v1550_v18  ;;  %1533 = vmatpush1.bf16.msra.mxu1 %v1550_v18  ;;  %v1284_v18 = vlaneseq }
  0x41   :  { %695 = vmatmul.mubr.bf16.vlgmr.msra.gmra.mrb[0].mxu0 %v1551_v19  ;;  %823 = vmatmul.mubr.bf16.vlgmr.msra.gmra.mrb[0].mxu1 %v1554_v20  ;;  %v1217_v19 = vld [vmem:[%s2343_s3] sm:$0x1]  ;;  %v1285_v20 = vshrl.u32 %v1284_v18, 7 }
  0x42   :  { %702 = vmatprep.mubr.bf16.mxu0 %v1557_v21  ;;  %830 = vmatprep.mubr.bf16.mxu1 %v1559_v22  ;;  %vm1218_vm0 = vcmp.ne.f32.partialorder %v1217_v19, 0.0 }
  0x43   :  { %v1286_v21 = vsub.s32 0, %v1285_v20  ;;  %v1283_v22 = vsel %vm1218_vm0, 1, %v1647_v0 }
  0x49   :  { %703 = vmatmul.mubr.bf16.gmra.mrb[4].mxu0 %v1561_v23  ;;  %831 = vmatmul.mubr.bf16.gmra.mrb[4].mxu1 %v1562_v24  ;;  %v1952_v23 = vld [vmem:[%s2344_s2] ss:$0 sm:$0xff]  ;;  %v1954_v24 = vrot.slane %v1283_v22, %v1286_v21 }
  0x4a   :  { %710 = vmatprep.mubr.bf16.mxu0 %v1563_v25  ;;  %838 = vmatprep.mubr.bf16.mxu1 %v1565_v26 }
  0x4b   :  { %vm1288_vm1 = vcmp.eq.s32.totalorder %v1954_v24, 1 }
  0x51   :  { %711 = vmatmul.mubr.bf16.gmra.mrb[8].mxu0 %v1567_v27  ;;  %839 = vmatmul.mubr.bf16.gmra.mrb[8].mxu1 %v1568_v28 }
  0x52   :  { %718 = vmatprep.mubr.bf16.mxu0 %v1569_v29  ;;  %846 = vmatprep.mubr.bf16.mxu1 %v1571_v30 }
  0x59   :  { %719 = vmatmul.mubr.bf16.gmra.mrb[12].mxu0 %v1573_v31  ;;  %847 = vmatmul.mubr.bf16.gmra.mrb[12].mxu1 %v1574_v32 }
  0x5a   :  { %726 = vmatprep.mubr.bf16.mxu0 %v1575_v33  ;;  %854 = vmatprep.mubr.bf16.mxu1 %v1577_v34 }
  0x61   :  { %727 = vmatmul.mubr.bf16.gmra.mrb[16].mxu0 %v1579_v35  ;;  %855 = vmatmul.mubr.bf16.gmra.mrb[16].mxu1 %v1580_v36 }
  0x62   :  { %734 = vmatprep.mubr.bf16.mxu0 %v1581_v37  ;;  %862 = vmatprep.mubr.bf16.mxu1 %v1583_v38 }
  0x69   :  { %735 = vmatmul.mubr.bf16.gmra.mrb[20].mxu0 %v1585_v39  ;;  %863 = vmatmul.mubr.bf16.gmra.mrb[20].mxu1 %v1586_v40 }
  0x6a   :  { %742 = vmatprep.mubr.bf16.mxu0 %v1587_v41  ;;  %870 = vmatprep.mubr.bf16.mxu1 %v1589_v42 }
  0x71   :  { %743 = vmatmul.mubr.bf16.gmra.mrb[24].mxu0 %v1591_v43  ;;  %871 = vmatmul.mubr.bf16.gmra.mrb[24].mxu1 %v1592_v44 }
  0x72   :  { %750 = vmatprep.mubr.bf16.mxu0 %v1593_v45  ;;  %878 = vmatprep.mubr.bf16.mxu1 %v1595_v46 }
  0x79   :  { %751 = vmatmul.mubr.bf16.gmra.mrb[28].mxu0 %v1597_v47  ;;  %879 = vmatmul.mubr.bf16.gmra.mrb[28].mxu1 %v1598_v48 }
  0x7a   :  { %758 = vmatprep.mubr.bf16.mxu0 %v1599_v49  ;;  %886 = vmatprep.mubr.bf16.mxu1 %v1601_v50 }
  0x81   :  { %759 = vmatmul.mubr.bf16.gmra.mrb[32].mxu0 %v1603_v51  ;;  %887 = vmatmul.mubr.bf16.gmra.mrb[32].mxu1 %v1604_v52 }
  0x82   :  { %766 = vmatprep.mubr.bf16.mxu0 %v1605_v53  ;;  %894 = vmatprep.mubr.bf16.mxu1 %v1607_v54 }
  0x89   :  { %767 = vmatmul.mubr.bf16.gmra.mrb[36].mxu0 %v1609_v55  ;;  %895 = vmatmul.mubr.bf16.gmra.mrb[36].mxu1 %v1610_v56 }
  0x8a   :  { %774 = vmatprep.mubr.bf16.mxu0 %v1611_v57  ;;  %902 = vmatprep.mubr.bf16.mxu1 %v1613_v58 }
  0x91   :  { %775 = vmatmul.mubr.bf16.gmra.mrb[40].mxu0 %v1615_v59  ;;  %903 = vmatmul.mubr.bf16.gmra.mrb[40].mxu1 %v1616_v60 }
  0x92   :  { %782 = vmatprep.mubr.bf16.mxu0 %v1617_v61  ;;  %910 = vmatprep.mubr.bf16.mxu1 %v1619_v62 }
  0x99   :  { %783 = vmatmul.mubr.bf16.gmra.mrb[44].mxu0 %v1621_v63  ;;  %911 = vmatmul.mubr.bf16.gmra.mrb[44].mxu1 %v1622_v1 }
  0x9a   :  { %790 = vmatprep.mubr.bf16.mxu0 %v1623_v2  ;;  %918 = vmatprep.mubr.bf16.mxu1 %v1625_v3 }
  0xa1   :  { %791 = vmatmul.mubr.bf16.gmra.mrb[48].mxu0 %v1627_v4  ;;  %919 = vmatmul.mubr.bf16.gmra.mrb[48].mxu1 %v1628_v5 }
  0xa2   :  { %798 = vmatprep.mubr.bf16.mxu0 %v1629_v6  ;;  %926 = vmatprep.mubr.bf16.mxu1 %v1631_v7 }
  0xa9   :  { %799 = vmatmul.mubr.bf16.gmra.mrb[52].mxu0 %v1633_v8  ;;  %927 = vmatmul.mubr.bf16.gmra.mrb[52].mxu1 %v1634_v9 }
  0xaa   :  { %806 = vmatprep.mubr.bf16.mxu0 %v1635_v10  ;;  %934 = vmatprep.mubr.bf16.mxu1 %v1637_v11 }
  0xb1   :  { %807 = vmatmul.mubr.bf16.gmra.mrb[56].mxu0 %v1639_v12  ;;  %935 = vmatmul.mubr.bf16.gmra.mrb[56].mxu1 %v1640_v13 }
  0xb2   :  { %814 = vmatprep.mubr.bf16.mxu0 %v1641_v14  ;;  %942 = vmatprep.mubr.bf16.mxu1 %v1643_v15 }
  0xb9   :  { %815 = vmatmul.mubr.bf16.gmra.mrb[60].mxu0 %v1645_v16  ;;  %943 = vmatmul.mubr.bf16.gmra.mrb[60].mxu1 %v1646_v17 }
 0x114   :  { %v696_v25 = vpop.f32.mrb[0].mxu0  ;;  %v824_v26 = vpop.f32.mrb[0].mxu1 }
 0x115   :  { %v1153_v27 = vadd.f32 %v1952_v23, %v696_v25  ;;  %v1185_v28 = vadd.f32 %v1952_v23, %v824_v26  ;;  %v698_v29 = vpop.f32.mrb[1].mxu0  ;;  %v826_v30 = vpop.f32.mrb[1].mxu1 }
 0x116   :  { %v699_v31 = vpop.f32.mrb[2].mxu0  ;;  %v827_v32 = vpop.f32.mrb[2].mxu1 }
 0x117   :  { %v1219_v0 = vmax.f32 %v1153_v27, 0.0  ;;  %v1251_v33 = vmax.f32 %v1185_v28, 0.0  ;;  %v1154_v34 = vadd.f32 %v1952_v23, %v699_v31  ;;  %v1186_v35 = vadd.f32 %v1952_v23, %v827_v32  ;;  %v701_v36 = vpop.f32.mrb[3].mxu0  ;;  %v829_v37 = vpop.f32.mrb[3].mxu1 }
 0x119   :  { %v1289_v38 = vsel %vm1288_vm1, %v1219_v0, %v1153_v27  ;;  %v1321_v39 = vsel %vm1288_vm1, %v1251_v33, %v1185_v28  ;;  %v1220_v40 = vmax.f32 %v1154_v34, 0.0  ;;  %v1252_v41 = vmax.f32 %v1186_v35, 0.0 }
 0x11a   :  { %1353 = vst [vmem:[%s2345_s4] sm:$0xff] %v1289_v38  ;;  %1385 = vst [vmem:[%s2345_s4 + $0x100] sm:$0xff] %v1321_v39 }
 0x11b   :  { %v1290_v42 = vsel %vm1288_vm1, %v1220_v40, %v1154_v34  ;;  %v1322_v43 = vsel %vm1288_vm1, %v1252_v41, %v1186_v35 }
 0x11c   :  { %1354 = vst [vmem:[%s2345_s4 + $0x8] sm:$0xff] %v1290_v42  ;;  %1386 = vst [vmem:[%s2345_s4 + $0x108] sm:$0xff] %v1322_v43  ;;  %v704_v44 = vpop.f32.mrb[4].mxu0  ;;  %v832_v45 = vpop.f32.mrb[4].mxu1 }
 0x11d   :  { %v1155_v46 = vadd.f32 %v1952_v23, %v704_v44  ;;  %v1187_v47 = vadd.f32 %v1952_v23, %v832_v45  ;;  %v706_v48 = vpop.f32.mrb[5].mxu0  ;;  %v834_v49 = vpop.f32.mrb[5].mxu1 }
 0x11e   :  { %v707_v50 = vpop.f32.mrb[6].mxu0  ;;  %v835_v51 = vpop.f32.mrb[6].mxu1 }
 0x11f   :  { %v1221_v52 = vmax.f32 %v1155_v46, 0.0  ;;  %v1253_v53 = vmax.f32 %v1187_v47, 0.0  ;;  %v1156_v54 = vadd.f32 %v1952_v23, %v707_v50  ;;  %v1188_v55 = vadd.f32 %v1952_v23, %v835_v51  ;;  %v709_v56 = vpop.f32.mrb[7].mxu0  ;;  %v837_v57 = vpop.f32.mrb[7].mxu1 }
 0x121   :  { %v1291_v58 = vsel %vm1288_vm1, %v1221_v52, %v1155_v46  ;;  %v1323_v59 = vsel %vm1288_vm1, %v1253_v53, %v1187_v47  ;;  %v1222_v60 = vmax.f32 %v1156_v54, 0.0  ;;  %v1254_v61 = vmax.f32 %v1188_v55, 0.0 }
 0x122   :  { %1355 = vst [vmem:[%s2345_s4 + $0x10] sm:$0xff] %v1291_v58  ;;  %1387 = vst [vmem:[%s2345_s4 + $0x110] sm:$0xff] %v1323_v59 }
 0x123   :  { %v1292_v62 = vsel %vm1288_vm1, %v1222_v60, %v1156_v54  ;;  %v1324_v63 = vsel %vm1288_vm1, %v1254_v61, %v1188_v55 }
 0x124   :  { %1356 = vst [vmem:[%s2345_s4 + $0x18] sm:$0xff] %v1292_v62  ;;  %1388 = vst [vmem:[%s2345_s4 + $0x118] sm:$0xff] %v1324_v63  ;;  %v712_v1 = vpop.f32.mrb[8].mxu0  ;;  %v840_v2 = vpop.f32.mrb[8].mxu1 }
 0x125   :  { %v1157_v3 = vadd.f32 %v1952_v23, %v712_v1  ;;  %v1189_v4 = vadd.f32 %v1952_v23, %v840_v2  ;;  %v714_v5 = vpop.f32.mrb[9].mxu0  ;;  %v842_v6 = vpop.f32.mrb[9].mxu1 }
 0x126   :  { %v715_v7 = vpop.f32.mrb[10].mxu0  ;;  %v843_v8 = vpop.f32.mrb[10].mxu1 }
 0x127   :  { %v1223_v9 = vmax.f32 %v1157_v3, 0.0  ;;  %v1255_v10 = vmax.f32 %v1189_v4, 0.0  ;;  %v1158_v11 = vadd.f32 %v1952_v23, %v715_v7  ;;  %v1190_v12 = vadd.f32 %v1952_v23, %v843_v8  ;;  %v717_v13 = vpop.f32.mrb[11].mxu0  ;;  %v845_v14 = vpop.f32.mrb[11].mxu1 }
 0x129   :  { %v1293_v15 = vsel %vm1288_vm1, %v1223_v9, %v1157_v3  ;;  %v1325_v16 = vsel %vm1288_vm1, %v1255_v10, %v1189_v4  ;;  %v1224_v17 = vmax.f32 %v1158_v11, 0.0  ;;  %v1256_v18 = vmax.f32 %v1190_v12, 0.0 }
 0x12a   :  { %1357 = vst [vmem:[%s2345_s4 + $0x20] sm:$0xff] %v1293_v15  ;;  %1389 = vst [vmem:[%s2345_s4 + $0x120] sm:$0xff] %v1325_v16 }
 0x12b   :  { %v1294_v19 = vsel %vm1288_vm1, %v1224_v17, %v1158_v11  ;;  %v1326_v20 = vsel %vm1288_vm1, %v1256_v18, %v1190_v12 }
 0x12c   :  { %1358 = vst [vmem:[%s2345_s4 + $0x28] sm:$0xff] %v1294_v19  ;;  %1390 = vst [vmem:[%s2345_s4 + $0x128] sm:$0xff] %v1326_v20  ;;  %v720_v21 = vpop.f32.mrb[12].mxu0  ;;  %v848_v22 = vpop.f32.mrb[12].mxu1 }
 0x12d   :  { %v1159_v25 = vadd.f32 %v1952_v23, %v720_v21  ;;  %v1191_v26 = vadd.f32 %v1952_v23, %v848_v22  ;;  %v722_v27 = vpop.f32.mrb[13].mxu0  ;;  %v850_v28 = vpop.f32.mrb[13].mxu1 }
 0x12e   :  { %v723_v29 = vpop.f32.mrb[14].mxu0  ;;  %v851_v30 = vpop.f32.mrb[14].mxu1 }
 0x12f   :  { %v1225_v31 = vmax.f32 %v1159_v25, 0.0  ;;  %v1257_v32 = vmax.f32 %v1191_v26, 0.0  ;;  %v1160_v0 = vadd.f32 %v1952_v23, %v723_v29  ;;  %v1192_v33 = vadd.f32 %v1952_v23, %v851_v30  ;;  %v725_v34 = vpop.f32.mrb[15].mxu0  ;;  %v853_v35 = vpop.f32.mrb[15].mxu1 }
 0x131   :  { %v1295_v36 = vsel %vm1288_vm1, %v1225_v31, %v1159_v25  ;;  %v1327_v37 = vsel %vm1288_vm1, %v1257_v32, %v1191_v26  ;;  %v1226_v38 = vmax.f32 %v1160_v0, 0.0  ;;  %v1258_v39 = vmax.f32 %v1192_v33, 0.0 }
 0x132   :  { %1359 = vst [vmem:[%s2345_s4 + $0x30] sm:$0xff] %v1295_v36  ;;  %1391 = vst [vmem:[%s2345_s4 + $0x130] sm:$0xff] %v1327_v37 }
 0x133   :  { %v1296_v40 = vsel %vm1288_vm1, %v1226_v38, %v1160_v0  ;;  %v1328_v41 = vsel %vm1288_vm1, %v1258_v39, %v1192_v33 }
 0x134   :  { %1360 = vst [vmem:[%s2345_s4 + $0x38] sm:$0xff] %v1296_v40  ;;  %1392 = vst [vmem:[%s2345_s4 + $0x138] sm:$0xff] %v1328_v41  ;;  %v728_v42 = vpop.f32.mrb[16].mxu0  ;;  %v856_v43 = vpop.f32.mrb[16].mxu1 }
 0x135   :  { %v1161_v44 = vadd.f32 %v1952_v23, %v728_v42  ;;  %v1193_v45 = vadd.f32 %v1952_v23, %v856_v43  ;;  %v730_v46 = vpop.f32.mrb[17].mxu0  ;;  %v858_v47 = vpop.f32.mrb[17].mxu1 }
 0x136   :  { %v731_v48 = vpop.f32.mrb[18].mxu0  ;;  %v859_v49 = vpop.f32.mrb[18].mxu1 }
 0x137   :  { %v1227_v50 = vmax.f32 %v1161_v44, 0.0  ;;  %v1259_v51 = vmax.f32 %v1193_v45, 0.0  ;;  %v1162_v52 = vadd.f32 %v1952_v23, %v731_v48  ;;  %v1194_v53 = vadd.f32 %v1952_v23, %v859_v49  ;;  %v733_v54 = vpop.f32.mrb[19].mxu0  ;;  %v861_v55 = vpop.f32.mrb[19].mxu1 }
 0x139   :  { %v1297_v56 = vsel %vm1288_vm1, %v1227_v50, %v1161_v44  ;;  %v1329_v57 = vsel %vm1288_vm1, %v1259_v51, %v1193_v45  ;;  %v1228_v58 = vmax.f32 %v1162_v52, 0.0  ;;  %v1260_v59 = vmax.f32 %v1194_v53, 0.0 }
 0x13a   :  { %1361 = vst [vmem:[%s2345_s4 + $0x40] sm:$0xff] %v1297_v56  ;;  %1393 = vst [vmem:[%s2345_s4 + $0x140] sm:$0xff] %v1329_v57 }
 0x13b   :  { %v1298_v60 = vsel %vm1288_vm1, %v1228_v58, %v1162_v52  ;;  %v1330_v61 = vsel %vm1288_vm1, %v1260_v59, %v1194_v53 }
 0x13c   :  { %1362 = vst [vmem:[%s2345_s4 + $0x48] sm:$0xff] %v1298_v60  ;;  %1394 = vst [vmem:[%s2345_s4 + $0x148] sm:$0xff] %v1330_v61  ;;  %v736_v62 = vpop.f32.mrb[20].mxu0  ;;  %v864_v63 = vpop.f32.mrb[20].mxu1 }
 0x13d   :  { %v1163_v1 = vadd.f32 %v1952_v23, %v736_v62  ;;  %v1195_v2 = vadd.f32 %v1952_v23, %v864_v63  ;;  %v738_v3 = vpop.f32.mrb[21].mxu0  ;;  %v866_v4 = vpop.f32.mrb[21].mxu1 }
 0x13e   :  { %v739_v5 = vpop.f32.mrb[22].mxu0  ;;  %v867_v6 = vpop.f32.mrb[22].mxu1 }
 0x13f   :  { %v1229_v7 = vmax.f32 %v1163_v1, 0.0  ;;  %v1261_v8 = vmax.f32 %v1195_v2, 0.0  ;;  %v1164_v9 = vadd.f32 %v1952_v23, %v739_v5  ;;  %v1196_v10 = vadd.f32 %v1952_v23, %v867_v6  ;;  %v741_v11 = vpop.f32.mrb[23].mxu0  ;;  %v869_v12 = vpop.f32.mrb[23].mxu1 }
 0x141   :  { %v1299_v13 = vsel %vm1288_vm1, %v1229_v7, %v1163_v1  ;;  %v1331_v14 = vsel %vm1288_vm1, %v1261_v8, %v1195_v2  ;;  %v1230_v15 = vmax.f32 %v1164_v9, 0.0  ;;  %v1262_v16 = vmax.f32 %v1196_v10, 0.0 }
 0x142   :  { %1363 = vst [vmem:[%s2345_s4 + $0x50] sm:$0xff] %v1299_v13  ;;  %1395 = vst [vmem:[%s2345_s4 + $0x150] sm:$0xff] %v1331_v14 }
 0x143   :  { %v1300_v17 = vsel %vm1288_vm1, %v1230_v15, %v1164_v9  ;;  %v1332_v18 = vsel %vm1288_vm1, %v1262_v16, %v1196_v10 }
 0x144   :  { %1364 = vst [vmem:[%s2345_s4 + $0x58] sm:$0xff] %v1300_v17  ;;  %1396 = vst [vmem:[%s2345_s4 + $0x158] sm:$0xff] %v1332_v18  ;;  %v744_v19 = vpop.f32.mrb[24].mxu0  ;;  %v872_v20 = vpop.f32.mrb[24].mxu1 }
 0x145   :  { %v1165_v21 = vadd.f32 %v1952_v23, %v744_v19  ;;  %v1197_v22 = vadd.f32 %v1952_v23, %v872_v20  ;;  %v746_v25 = vpop.f32.mrb[25].mxu0  ;;  %v874_v26 = vpop.f32.mrb[25].mxu1 }
 0x146   :  { %v747_v27 = vpop.f32.mrb[26].mxu0  ;;  %v875_v28 = vpop.f32.mrb[26].mxu1 }
 0x147   :  { %v1231_v29 = vmax.f32 %v1165_v21, 0.0  ;;  %v1263_v30 = vmax.f32 %v1197_v22, 0.0  ;;  %v1166_v31 = vadd.f32 %v1952_v23, %v747_v27  ;;  %v1198_v32 = vadd.f32 %v1952_v23, %v875_v28  ;;  %v749_v0 = vpop.f32.mrb[27].mxu0  ;;  %v877_v33 = vpop.f32.mrb[27].mxu1 }
 0x149   :  { %v1301_v34 = vsel %vm1288_vm1, %v1231_v29, %v1165_v21  ;;  %v1333_v35 = vsel %vm1288_vm1, %v1263_v30, %v1197_v22  ;;  %v1232_v36 = vmax.f32 %v1166_v31, 0.0  ;;  %v1264_v37 = vmax.f32 %v1198_v32, 0.0 }
 0x14a   :  { %1365 = vst [vmem:[%s2345_s4 + $0x60] sm:$0xff] %v1301_v34  ;;  %1397 = vst [vmem:[%s2345_s4 + $0x160] sm:$0xff] %v1333_v35 }
 0x14b   :  { %v1302_v38 = vsel %vm1288_vm1, %v1232_v36, %v1166_v31  ;;  %v1334_v39 = vsel %vm1288_vm1, %v1264_v37, %v1198_v32 }
 0x14c   :  { %1366 = vst [vmem:[%s2345_s4 + $0x68] sm:$0xff] %v1302_v38  ;;  %1398 = vst [vmem:[%s2345_s4 + $0x168] sm:$0xff] %v1334_v39  ;;  %v752_v40 = vpop.f32.mrb[28].mxu0  ;;  %v880_v41 = vpop.f32.mrb[28].mxu1 }
 0x14d   :  { %v1167_v42 = vadd.f32 %v1952_v23, %v752_v40  ;;  %v1199_v43 = vadd.f32 %v1952_v23, %v880_v41  ;;  %v754_v44 = vpop.f32.mrb[29].mxu0  ;;  %v882_v45 = vpop.f32.mrb[29].mxu1 }
 0x14e   :  { %v755_v46 = vpop.f32.mrb[30].mxu0  ;;  %v883_v47 = vpop.f32.mrb[30].mxu1 }
 0x14f   :  { %v1233_v48 = vmax.f32 %v1167_v42, 0.0  ;;  %v1265_v49 = vmax.f32 %v1199_v43, 0.0  ;;  %v1168_v50 = vadd.f32 %v1952_v23, %v755_v46  ;;  %v1200_v51 = vadd.f32 %v1952_v23, %v883_v47  ;;  %v757_v52 = vpop.f32.mrb[31].mxu0  ;;  %v885_v53 = vpop.f32.mrb[31].mxu1 }
 0x151   :  { %v1303_v54 = vsel %vm1288_vm1, %v1233_v48, %v1167_v42  ;;  %v1335_v55 = vsel %vm1288_vm1, %v1265_v49, %v1199_v43  ;;  %v1234_v56 = vmax.f32 %v1168_v50, 0.0  ;;  %v1266_v57 = vmax.f32 %v1200_v51, 0.0 }
 0x152   :  { %1367 = vst [vmem:[%s2345_s4 + $0x70] sm:$0xff] %v1303_v54  ;;  %1399 = vst [vmem:[%s2345_s4 + $0x170] sm:$0xff] %v1335_v55 }
 0x153   :  { %v1304_v58 = vsel %vm1288_vm1, %v1234_v56, %v1168_v50  ;;  %v1336_v59 = vsel %vm1288_vm1, %v1266_v57, %v1200_v51 }
 0x154   :  { %1368 = vst [vmem:[%s2345_s4 + $0x78] sm:$0xff] %v1304_v58  ;;  %1400 = vst [vmem:[%s2345_s4 + $0x178] sm:$0xff] %v1336_v59  ;;  %v760_v60 = vpop.f32.mrb[32].mxu0  ;;  %v888_v61 = vpop.f32.mrb[32].mxu1 }
 0x155   :  { %v1169_v62 = vadd.f32 %v1952_v23, %v760_v60  ;;  %v1201_v63 = vadd.f32 %v1952_v23, %v888_v61  ;;  %v762_v1 = vpop.f32.mrb[33].mxu0  ;;  %v890_v2 = vpop.f32.mrb[33].mxu1 }
 0x156   :  { %v763_v3 = vpop.f32.mrb[34].mxu0  ;;  %v891_v4 = vpop.f32.mrb[34].mxu1 }
 0x157   :  { %v1235_v5 = vmax.f32 %v1169_v62, 0.0  ;;  %v1267_v6 = vmax.f32 %v1201_v63, 0.0  ;;  %v1170_v7 = vadd.f32 %v1952_v23, %v763_v3  ;;  %v1202_v8 = vadd.f32 %v1952_v23, %v891_v4  ;;  %v765_v9 = vpop.f32.mrb[35].mxu0  ;;  %v893_v10 = vpop.f32.mrb[35].mxu1 }
 0x159   :  { %v1305_v11 = vsel %vm1288_vm1, %v1235_v5, %v1169_v62  ;;  %v1337_v12 = vsel %vm1288_vm1, %v1267_v6, %v1201_v63  ;;  %v1236_v13 = vmax.f32 %v1170_v7, 0.0  ;;  %v1268_v14 = vmax.f32 %v1202_v8, 0.0 }
 0x15a   :  { %1369 = vst [vmem:[%s2345_s4 + $0x80] sm:$0xff] %v1305_v11  ;;  %1401 = vst [vmem:[%s2345_s4 + $0x180] sm:$0xff] %v1337_v12 }
 0x15b   :  { %v1306_v15 = vsel %vm1288_vm1, %v1236_v13, %v1170_v7  ;;  %v1338_v16 = vsel %vm1288_vm1, %v1268_v14, %v1202_v8 }
 0x15c   :  { %1370 = vst [vmem:[%s2345_s4 + $0x88] sm:$0xff] %v1306_v15  ;;  %1402 = vst [vmem:[%s2345_s4 + $0x188] sm:$0xff] %v1338_v16  ;;  %v768_v17 = vpop.f32.mrb[36].mxu0  ;;  %v896_v18 = vpop.f32.mrb[36].mxu1 }
 0x15d   :  { %v1171_v19 = vadd.f32 %v1952_v23, %v768_v17  ;;  %v1203_v20 = vadd.f32 %v1952_v23, %v896_v18  ;;  %v770_v21 = vpop.f32.mrb[37].mxu0  ;;  %v898_v22 = vpop.f32.mrb[37].mxu1 }
 0x15e   :  { %v771_v25 = vpop.f32.mrb[38].mxu0  ;;  %v899_v26 = vpop.f32.mrb[38].mxu1 }
 0x15f   :  { %v1237_v27 = vmax.f32 %v1171_v19, 0.0  ;;  %v1269_v28 = vmax.f32 %v1203_v20, 0.0  ;;  %v1172_v29 = vadd.f32 %v1952_v23, %v771_v25  ;;  %v1204_v30 = vadd.f32 %v1952_v23, %v899_v26  ;;  %v773_v31 = vpop.f32.mrb[39].mxu0  ;;  %v901_v32 = vpop.f32.mrb[39].mxu1 }
 0x161   :  { %v1307_v0 = vsel %vm1288_vm1, %v1237_v27, %v1171_v19  ;;  %v1339_v33 = vsel %vm1288_vm1, %v1269_v28, %v1203_v20  ;;  %v1238_v34 = vmax.f32 %v1172_v29, 0.0  ;;  %v1270_v35 = vmax.f32 %v1204_v30, 0.0 }
 0x162   :  { %1371 = vst [vmem:[%s2345_s4 + $0x90] sm:$0xff] %v1307_v0  ;;  %1403 = vst [vmem:[%s2345_s4 + $0x190] sm:$0xff] %v1339_v33 }
 0x163   :  { %v1308_v36 = vsel %vm1288_vm1, %v1238_v34, %v1172_v29  ;;  %v1340_v37 = vsel %vm1288_vm1, %v1270_v35, %v1204_v30 }
 0x164   :  { %1372 = vst [vmem:[%s2345_s4 + $0x98] sm:$0xff] %v1308_v36  ;;  %1404 = vst [vmem:[%s2345_s4 + $0x198] sm:$0xff] %v1340_v37  ;;  %v776_v38 = vpop.f32.mrb[40].mxu0  ;;  %v904_v39 = vpop.f32.mrb[40].mxu1 }
 0x165   :  { %v1173_v40 = vadd.f32 %v1952_v23, %v776_v38  ;;  %v1205_v41 = vadd.f32 %v1952_v23, %v904_v39  ;;  %v778_v42 = vpop.f32.mrb[41].mxu0  ;;  %v906_v43 = vpop.f32.mrb[41].mxu1 }
 0x166   :  { %v779_v44 = vpop.f32.mrb[42].mxu0  ;;  %v907_v45 = vpop.f32.mrb[42].mxu1 }
 0x167   :  { %v1239_v46 = vmax.f32 %v1173_v40, 0.0  ;;  %v1271_v47 = vmax.f32 %v1205_v41, 0.0  ;;  %v1174_v48 = vadd.f32 %v1952_v23, %v779_v44  ;;  %v1206_v49 = vadd.f32 %v1952_v23, %v907_v45  ;;  %v781_v50 = vpop.f32.mrb[43].mxu0  ;;  %v909_v51 = vpop.f32.mrb[43].mxu1 }
 0x169   :  { %v1309_v52 = vsel %vm1288_vm1, %v1239_v46, %v1173_v40  ;;  %v1341_v53 = vsel %vm1288_vm1, %v1271_v47, %v1205_v41  ;;  %v1240_v54 = vmax.f32 %v1174_v48, 0.0  ;;  %v1272_v55 = vmax.f32 %v1206_v49, 0.0 }
 0x16a   :  { %1373 = vst [vmem:[%s2345_s4 + $0xa0] sm:$0xff] %v1309_v52  ;;  %1405 = vst [vmem:[%s2345_s4 + $0x1a0] sm:$0xff] %v1341_v53 }
 0x16b   :  { %v1310_v56 = vsel %vm1288_vm1, %v1240_v54, %v1174_v48  ;;  %v1342_v57 = vsel %vm1288_vm1, %v1272_v55, %v1206_v49 }
 0x16c   :  { %1374 = vst [vmem:[%s2345_s4 + $0xa8] sm:$0xff] %v1310_v56  ;;  %1406 = vst [vmem:[%s2345_s4 + $0x1a8] sm:$0xff] %v1342_v57  ;;  %v784_v58 = vpop.f32.mrb[44].mxu0  ;;  %v912_v59 = vpop.f32.mrb[44].mxu1 }
 0x16d   :  { %v1175_v60 = vadd.f32 %v1952_v23, %v784_v58  ;;  %v1207_v61 = vadd.f32 %v1952_v23, %v912_v59  ;;  %v786_v62 = vpop.f32.mrb[45].mxu0  ;;  %v914_v63 = vpop.f32.mrb[45].mxu1 }
 0x16e   :  { %v787_v1 = vpop.f32.mrb[46].mxu0  ;;  %v915_v2 = vpop.f32.mrb[46].mxu1 }
 0x16f   :  { %v1241_v3 = vmax.f32 %v1175_v60, 0.0  ;;  %v1273_v4 = vmax.f32 %v1207_v61, 0.0  ;;  %v1176_v5 = vadd.f32 %v1952_v23, %v787_v1  ;;  %v1208_v6 = vadd.f32 %v1952_v23, %v915_v2  ;;  %v789_v7 = vpop.f32.mrb[47].mxu0  ;;  %v917_v8 = vpop.f32.mrb[47].mxu1 }
 0x171   :  { %v1311_v9 = vsel %vm1288_vm1, %v1241_v3, %v1175_v60  ;;  %v1343_v10 = vsel %vm1288_vm1, %v1273_v4, %v1207_v61  ;;  %v1242_v11 = vmax.f32 %v1176_v5, 0.0  ;;  %v1274_v12 = vmax.f32 %v1208_v6, 0.0 }
 0x172   :  { %1375 = vst [vmem:[%s2345_s4 + $0xb0] sm:$0xff] %v1311_v9  ;;  %1407 = vst [vmem:[%s2345_s4 + $0x1b0] sm:$0xff] %v1343_v10 }
 0x173   :  { %v1312_v13 = vsel %vm1288_vm1, %v1242_v11, %v1176_v5  ;;  %v1344_v14 = vsel %vm1288_vm1, %v1274_v12, %v1208_v6 }
 0x174   :  { %1376 = vst [vmem:[%s2345_s4 + $0xb8] sm:$0xff] %v1312_v13  ;;  %1408 = vst [vmem:[%s2345_s4 + $0x1b8] sm:$0xff] %v1344_v14  ;;  %v792_v15 = vpop.f32.mrb[48].mxu0  ;;  %v920_v16 = vpop.f32.mrb[48].mxu1 }
 0x175   :  { %v1177_v17 = vadd.f32 %v1952_v23, %v792_v15  ;;  %v1209_v18 = vadd.f32 %v1952_v23, %v920_v16  ;;  %v794_v19 = vpop.f32.mrb[49].mxu0  ;;  %v922_v20 = vpop.f32.mrb[49].mxu1 }
 0x176   :  { %v795_v21 = vpop.f32.mrb[50].mxu0  ;;  %v923_v22 = vpop.f32.mrb[50].mxu1 }
 0x177   :  { %v1243_v25 = vmax.f32 %v1177_v17, 0.0  ;;  %v1275_v26 = vmax.f32 %v1209_v18, 0.0  ;;  %v1178_v27 = vadd.f32 %v1952_v23, %v795_v21  ;;  %v1210_v28 = vadd.f32 %v1952_v23, %v923_v22  ;;  %v797_v29 = vpop.f32.mrb[51].mxu0  ;;  %v925_v30 = vpop.f32.mrb[51].mxu1 }
 0x179   :  { %v1313_v31 = vsel %vm1288_vm1, %v1243_v25, %v1177_v17  ;;  %v1345_v32 = vsel %vm1288_vm1, %v1275_v26, %v1209_v18  ;;  %v1244_v0 = vmax.f32 %v1178_v27, 0.0  ;;  %v1276_v33 = vmax.f32 %v1210_v28, 0.0 }
 0x17a   :  { %1377 = vst [vmem:[%s2345_s4 + $0xc0] sm:$0xff] %v1313_v31  ;;  %1409 = vst [vmem:[%s2345_s4 + $0x1c0] sm:$0xff] %v1345_v32 }
 0x17b   :  { %v1314_v34 = vsel %vm1288_vm1, %v1244_v0, %v1178_v27  ;;  %v1346_v35 = vsel %vm1288_vm1, %v1276_v33, %v1210_v28 }
 0x17c   :  { %1378 = vst [vmem:[%s2345_s4 + $0xc8] sm:$0xff] %v1314_v34  ;;  %1410 = vst [vmem:[%s2345_s4 + $0x1c8] sm:$0xff] %v1346_v35  ;;  %v800_v36 = vpop.f32.mrb[52].mxu0  ;;  %v928_v37 = vpop.f32.mrb[52].mxu1 }
 0x17d   :  { %v1179_v38 = vadd.f32 %v1952_v23, %v800_v36  ;;  %v1211_v39 = vadd.f32 %v1952_v23, %v928_v37  ;;  %v802_v40 = vpop.f32.mrb[53].mxu0  ;;  %v930_v41 = vpop.f32.mrb[53].mxu1 }
 0x17e   :  { %v803_v42 = vpop.f32.mrb[54].mxu0  ;;  %v931_v43 = vpop.f32.mrb[54].mxu1 }
 0x17f   :  { %v1245_v44 = vmax.f32 %v1179_v38, 0.0  ;;  %v1277_v45 = vmax.f32 %v1211_v39, 0.0  ;;  %v1180_v46 = vadd.f32 %v1952_v23, %v803_v42  ;;  %v1212_v47 = vadd.f32 %v1952_v23, %v931_v43  ;;  %v805_v48 = vpop.f32.mrb[55].mxu0  ;;  %v933_v49 = vpop.f32.mrb[55].mxu1 }
 0x181   :  { %v1315_v50 = vsel %vm1288_vm1, %v1245_v44, %v1179_v38  ;;  %v1347_v51 = vsel %vm1288_vm1, %v1277_v45, %v1211_v39  ;;  %v1246_v52 = vmax.f32 %v1180_v46, 0.0  ;;  %v1278_v53 = vmax.f32 %v1212_v47, 0.0 }
 0x182   :  { %1379 = vst [vmem:[%s2345_s4 + $0xd0] sm:$0xff] %v1315_v50  ;;  %1411 = vst [vmem:[%s2345_s4 + $0x1d0] sm:$0xff] %v1347_v51 }
 0x183   :  { %v1316_v54 = vsel %vm1288_vm1, %v1246_v52, %v1180_v46  ;;  %v1348_v55 = vsel %vm1288_vm1, %v1278_v53, %v1212_v47 }
 0x184   :  { %1380 = vst [vmem:[%s2345_s4 + $0xd8] sm:$0xff] %v1316_v54  ;;  %1412 = vst [vmem:[%s2345_s4 + $0x1d8] sm:$0xff] %v1348_v55  ;;  %v808_v56 = vpop.f32.mrb[56].mxu0  ;;  %v936_v57 = vpop.f32.mrb[56].mxu1 }
 0x185   :  { %v1181_v58 = vadd.f32 %v1952_v23, %v808_v56  ;;  %v1213_v59 = vadd.f32 %v1952_v23, %v936_v57  ;;  %v810_v60 = vpop.f32.mrb[57].mxu0  ;;  %v938_v61 = vpop.f32.mrb[57].mxu1 }
 0x186   :  { %v811_v62 = vpop.f32.mrb[58].mxu0  ;;  %v939_v63 = vpop.f32.mrb[58].mxu1 }
 0x187   :  { %v1247_v1 = vmax.f32 %v1181_v58, 0.0  ;;  %v1279_v2 = vmax.f32 %v1213_v59, 0.0  ;;  %v1182_v3 = vadd.f32 %v1952_v23, %v811_v62  ;;  %v1214_v4 = vadd.f32 %v1952_v23, %v939_v63  ;;  %v813_v5 = vpop.f32.mrb[59].mxu0  ;;  %v941_v6 = vpop.f32.mrb[59].mxu1 }
 0x189   :  { %v1317_v7 = vsel %vm1288_vm1, %v1247_v1, %v1181_v58  ;;  %v1349_v8 = vsel %vm1288_vm1, %v1279_v2, %v1213_v59  ;;  %v1248_v9 = vmax.f32 %v1182_v3, 0.0  ;;  %v1280_v10 = vmax.f32 %v1214_v4, 0.0 }
 0x18a   :  { %1381 = vst [vmem:[%s2345_s4 + $0xe0] sm:$0xff] %v1317_v7  ;;  %1413 = vst [vmem:[%s2345_s4 + $0x1e0] sm:$0xff] %v1349_v8 }
 0x18b   :  { %v1318_v11 = vsel %vm1288_vm1, %v1248_v9, %v1182_v3  ;;  %v1350_v12 = vsel %vm1288_vm1, %v1280_v10, %v1214_v4 }
 0x18c   :  { %1382 = vst [vmem:[%s2345_s4 + $0xe8] sm:$0xff] %v1318_v11  ;;  %1414 = vst [vmem:[%s2345_s4 + $0x1e8] sm:$0xff] %v1350_v12  ;;  %v816_v13 = vpop.f32.mrb[60].mxu0  ;;  %v944_v14 = vpop.f32.mrb[60].mxu1 }
 0x18d   :  { %v1183_v15 = vadd.f32 %v1952_v23, %v816_v13  ;;  %v1215_v16 = vadd.f32 %v1952_v23, %v944_v14  ;;  %v818_v17 = vpop.f32.mrb[61].mxu0  ;;  %v946_v18 = vpop.f32.mrb[61].mxu1 }
 0x18e   :  { %v819_v19 = vpop.f32.mrb[62].mxu0  ;;  %v947_v20 = vpop.f32.mrb[62].mxu1 }
 0x18f   :  { %v1249_v21 = vmax.f32 %v1183_v15, 0.0  ;;  %v1281_v22 = vmax.f32 %v1215_v16, 0.0  ;;  %v1184_v25 = vadd.f32 %v1952_v23, %v819_v19  ;;  %v1216_v26 = vadd.f32 %v1952_v23, %v947_v20  ;;  %v821_v27 = vpop.f32.mrb[63].mxu0  ;;  %v949_v28 = vpop.f32.mrb[63].mxu1 }
 0x191   :  { %v1319_v29 = vsel %vm1288_vm1, %v1249_v21, %v1183_v15  ;;  %v1351_v30 = vsel %vm1288_vm1, %v1281_v22, %v1215_v16  ;;  %v1250_v31 = vmax.f32 %v1184_v25, 0.0  ;;  %v1282_v32 = vmax.f32 %v1216_v26, 0.0 }
 0x192   :  { %1383 = vst [vmem:[%s2345_s4 + $0xf0] sm:$0xff] %v1319_v29  ;;  %1415 = vst [vmem:[%s2345_s4 + $0x1f0] sm:$0xff] %v1351_v30 }
 0x193   :  { %v1320_v23 = vsel %vm1288_vm1, %v1250_v31, %v1184_v25  ;;  %v1352_v0 = vsel %vm1288_vm1, %v1282_v32, %v1216_v26 }
 0x194   :  { %1384 = vst [vmem:[%s2345_s4 + $0xf8] sm:$0xff] %v1320_v23  ;;  %1416 = vst [vmem:[%s2345_s4 + $0x1f8] sm:$0xff] %v1352_v0 }

// kernel: encoder_forward.16
= control target key start
LH: loop header
LB: loop body
LE: loop exit
PB: predicated region body
PF: predicated region fallthrough
CT: control target
= control target key end

     0   :  { %v372_v16 = vlaneseq  ;;  %v511_v20 = vmov 0   ;;  %s692_s1 = inlined_call_operand.vmem [shape: bf16[128,128], index: 1, kind: input, shape index: {}]   ;;  %s693_s0 = inlined_call_operand.vmem [shape: bf16[128,128], index: 0, kind: input, shape index: {}]   ;;  %s694_s3 = inlined_call_operand.vmem [shape: f32[1,128], index: 3, kind: input, shape index: {}]   ;;  %s695_s2 = inlined_call_operand.vmem [shape: f32[1,128], index: 2, kind: input, shape index: {}]   ;;  %s696_s4 = inlined_call_operand.vmem [shape: f32[128,128], index: 4, kind: output, shape index: {}]  }
   0x1   :  { %v495_v0 = vld [vmem:[%s692_s1] sm:$0xff]   ;;  %v496_v1 = vld [vmem:[%s692_s1 + $0x8] sm:$0xff]   ;;  %v497_v2 = vld [vmem:[%s692_s1 + $0x10] sm:$0xff]  }
   0x2   :  { %446 = vmatprep.subr.bf16.mxu0 %v495_v0  ;;  %478 = vmatprep.subr.bf16.mxu1 %v495_v0  ;;  %v498_v3 = vld [vmem:[%s692_s1 + $0x18] sm:$0xff]   ;;  %v503_v4 = vld [vmem:[%s693_s0] sm:$0xff]   ;;  %v500_v7 = vld [vmem:[%s692_s1 + $0x28] sm:$0xff]   ;;  %v373_v18 = vshrl.u32 %v372_v16, 7 }
   0x3   :  { %447 = vmatpush3.bf16.msra.mxu0 %v495_v0  ;;  %486 = vmatpush3.bf16.msra.mxu1 %v495_v0  ;;  %v504_v5 = vld [vmem:[%s693_s0 + $0x20] sm:$0xff]   ;;  %v501_v8 = vld [vmem:[%s692_s1 + $0x30] sm:$0xff]   ;;  %v502_v9 = vld [vmem:[%s692_s1 + $0x38] sm:$0xff]  }
   0x4   :  { %448 = vmatprep.subr.bf16.mxu0 %v496_v1  ;;  %479 = vmatprep.subr.bf16.mxu1 %v496_v1  ;;  %v499_v6 = vld [vmem:[%s692_s1 + $0x20] sm:$0xff]   ;;  %v505_v10 = vld [vmem:[%s693_s0 + $0x8] sm:$0xff]   ;;  %v507_v12 = vld [vmem:[%s693_s0 + $0x10] sm:$0xff]   ;;  %v374_v19 = vsub.s32 0, %v373_v18 }
   0x5   :  { %462 = vmatprep.mubr.bf16.mxu0 %v503_v4  ;;  %470 = vmatprep.mubr.bf16.mxu1 %v504_v5  ;;  %v506_v11 = vld [vmem:[%s693_s0 + $0x28] sm:$0xff]   ;;  %v508_v13 = vld [vmem:[%s693_s0 + $0x30] sm:$0xff]   ;;  %v509_v14 = vld [vmem:[%s693_s0 + $0x18] sm:$0xff]  }
   0x6   :  { %v510_v15 = vld [vmem:[%s693_s0 + $0x38] sm:$0xff]   ;;  %v353_v17 = vld [vmem:[%s694_s3] sm:$0x1] }
   0x7   :  { %449 = vmatpush3.bf16.msra.mxu0 %v496_v1  ;;  %487 = vmatpush3.bf16.msra.mxu1 %v496_v1  ;;  %vm354_vm0 = vcmp.ne.f32.partialorder %v353_v17, 0.0  ;;  %v591_v22 = vld [vmem:[%s695_s2] ss:$0 sm:$0xff] }
   0x8   :  { %450 = vmatprep.subr.bf16.mxu0 %v497_v2  ;;  %480 = vmatprep.subr.bf16.mxu1 %v497_v2  ;;  %v371_v21 = vsel %vm354_vm0, 1, %v511_v20 }
   0x9   :  { %v593_v23 = vrot.slane %v371_v21, %v374_v19 }
   0xb   :  { %451 = vmatpush3.bf16.msra.mxu0 %v497_v2  ;;  %488 = vmatpush3.bf16.msra.mxu1 %v497_v2  ;;  %vm376_vm1 = vcmp.eq.s32.totalorder %v593_v23, 1 }
   0xc   :  { %452 = vmatprep.subr.bf16.mxu0 %v498_v3  ;;  %481 = vmatprep.subr.bf16.mxu1 %v498_v3 }
   0xf   :  { %453 = vmatpush3.bf16.msra.mxu0 %v498_v3  ;;  %489 = vmatpush3.bf16.msra.mxu1 %v498_v3 }
  0x10   :  { %454 = vmatprep.subr.bf16.mxu0 %v499_v6  ;;  %482 = vmatprep.subr.bf16.mxu1 %v499_v6 }
  0x13   :  { %455 = vmatpush3.bf16.msra.mxu0 %v499_v6  ;;  %490 = vmatpush3.bf16.msra.mxu1 %v499_v6 }
  0x14   :  { %456 = vmatprep.subr.bf16.mxu0 %v500_v7  ;;  %483 = vmatprep.subr.bf16.mxu1 %v500_v7 }
  0x17   :  { %457 = vmatpush3.bf16.msra.mxu0 %v500_v7  ;;  %491 = vmatpush3.bf16.msra.mxu1 %v500_v7 }
  0x18   :  { %458 = vmatprep.subr.bf16.mxu0 %v501_v8  ;;  %484 = vmatprep.subr.bf16.mxu1 %v501_v8 }
  0x1b   :  { %459 = vmatpush3.bf16.msra.mxu0 %v501_v8  ;;  %492 = vmatpush3.bf16.msra.mxu1 %v501_v8 }
  0x1c   :  { %460 = vmatprep.subr.bf16.mxu0 %v502_v9  ;;  %485 = vmatprep.subr.bf16.mxu1 %v502_v9 }
  0x1f   :  { %461 = vmatpush3.bf16.msra.mxu0 %v502_v9  ;;  %493 = vmatpush3.bf16.msra.mxu1 %v502_v9 }
  0x22   :  { %463 = vmatmul.mubr.bf16.vlgmr.msra.gmra.mrb[0].mxu0 %v505_v10  ;;  %471 = vmatmul.mubr.bf16.vlgmr.msra.gmra.mrb[0].mxu1 %v506_v11 }
  0x23   :  { %466 = vmatprep.mubr.bf16.mxu0 %v507_v12  ;;  %474 = vmatprep.mubr.bf16.mxu1 %v508_v13 }
  0x2a   :  { %467 = vmatmul.mubr.bf16.gmra.mrb[4].mxu0 %v509_v14  ;;  %475 = vmatmul.mubr.bf16.gmra.mrb[4].mxu1 %v510_v15 }
  0xf5   :  { %v464_v24 = vpop.f32.mrb[0].mxu0  ;;  %v472_v25 = vpop.f32.mrb[0].mxu1 }
  0xf6   :  { %v339_v26 = vadd.f32 %v464_v24, %v591_v22  ;;  %v347_v27 = vadd.f32 %v472_v25, %v591_v22  ;;  %v216_v28 = vpop.f32.mrb[1].mxu0  ;;  %v248_v29 = vpop.f32.mrb[1].mxu1 }
  0xf7   :  { %v337_v30 = vadd.f32 %v591_v22, %v216_v28  ;;  %v345_v31 = vadd.f32 %v591_v22, %v248_v29  ;;  %v465_v32 = vpop.f32.mrb[2].mxu0  ;;  %v473_v33 = vpop.f32.mrb[2].mxu1 }
  0xf8   :  { %v357_v34 = vmax.f32 %v339_v26, 0.0  ;;  %v365_v35 = vmax.f32 %v347_v27, 0.0  ;;  %v340_v36 = vadd.f32 %v465_v32, %v591_v22  ;;  %v348_v37 = vadd.f32 %v473_v33, %v591_v22  ;;  %v219_v38 = vpop.f32.mrb[3].mxu0  ;;  %v251_v39 = vpop.f32.mrb[3].mxu1 }
  0xf9   :  { %v355_v40 = vmax.f32 %v337_v30, 0.0  ;;  %v363_v41 = vmax.f32 %v345_v31, 0.0  ;;  %v338_v42 = vadd.f32 %v591_v22, %v219_v38  ;;  %v346_v43 = vadd.f32 %v591_v22, %v251_v39 }
  0xfa   :  { %v379_v44 = vsel %vm376_vm1, %v357_v34, %v339_v26  ;;  %v387_v45 = vsel %vm376_vm1, %v365_v35, %v347_v27  ;;  %v358_v46 = vmax.f32 %v340_v36, 0.0  ;;  %v366_v47 = vmax.f32 %v348_v37, 0.0 }
  0xfb   :  { %395 = vst [vmem:[%s696_s4 + $0x10] sm:$0xff] %v379_v44  ;;  %403 = vst [vmem:[%s696_s4 + $0x50] sm:$0xff] %v387_v45  ;;  %v377_v48 = vsel %vm376_vm1, %v355_v40, %v337_v30  ;;  %v385_v49 = vsel %vm376_vm1, %v363_v41, %v345_v31  ;;  %v356_v50 = vmax.f32 %v338_v42, 0.0  ;;  %v364_v51 = vmax.f32 %v346_v43, 0.0 }
  0xfc   :  { %393 = vst [vmem:[%s696_s4] sm:$0xff] %v377_v48  ;;  %401 = vst [vmem:[%s696_s4 + $0x40] sm:$0xff] %v385_v49  ;;  %v380_v52 = vsel %vm376_vm1, %v358_v46, %v340_v36  ;;  %v388_v53 = vsel %vm376_vm1, %v366_v47, %v348_v37 }
  0xfd   :  { %396 = vst [vmem:[%s696_s4 + $0x18] sm:$0xff] %v380_v52  ;;  %404 = vst [vmem:[%s696_s4 + $0x58] sm:$0xff] %v388_v53  ;;  %v378_v54 = vsel %vm376_vm1, %v356_v50, %v338_v42  ;;  %v386_v55 = vsel %vm376_vm1, %v364_v51, %v346_v43  ;;  %v468_v56 = vpop.f32.mrb[4].mxu0  ;;  %v476_v57 = vpop.f32.mrb[4].mxu1 }
  0xfe   :  { %394 = vst [vmem:[%s696_s4 + $0x8] sm:$0xff] %v378_v54  ;;  %402 = vst [vmem:[%s696_s4 + $0x48] sm:$0xff] %v386_v55  ;;  %v343_v58 = vadd.f32 %v468_v56, %v591_v22  ;;  %v351_v59 = vadd.f32 %v476_v57, %v591_v22  ;;  %v232_v60 = vpop.f32.mrb[5].mxu0  ;;  %v264_v61 = vpop.f32.mrb[5].mxu1 }
  0xff   :  { %v341_v62 = vadd.f32 %v591_v22, %v232_v60  ;;  %v349_v63 = vadd.f32 %v591_v22, %v264_v61  ;;  %v469_v0 = vpop.f32.mrb[6].mxu0  ;;  %v477_v1 = vpop.f32.mrb[6].mxu1 }
 0x100   :  { %v361_v2 = vmax.f32 %v343_v58, 0.0  ;;  %v369_v3 = vmax.f32 %v351_v59, 0.0  ;;  %v344_v4 = vadd.f32 %v469_v0, %v591_v22  ;;  %v352_v5 = vadd.f32 %v477_v1, %v591_v22  ;;  %v235_v6 = vpop.f32.mrb[7].mxu0  ;;  %v267_v7 = vpop.f32.mrb[7].mxu1 }
 0x101   :  { %v359_v8 = vmax.f32 %v341_v62, 0.0  ;;  %v367_v9 = vmax.f32 %v349_v63, 0.0  ;;  %v342_v10 = vadd.f32 %v591_v22, %v235_v6  ;;  %v350_v11 = vadd.f32 %v591_v22, %v267_v7 }
 0x102   :  { %v383_v12 = vsel %vm376_vm1, %v361_v2, %v343_v58  ;;  %v391_v13 = vsel %vm376_vm1, %v369_v3, %v351_v59  ;;  %v362_v14 = vmax.f32 %v344_v4, 0.0  ;;  %v370_v15 = vmax.f32 %v352_v5, 0.0 }
 0x103   :  { %399 = vst [vmem:[%s696_s4 + $0x30] sm:$0xff] %v383_v12  ;;  %407 = vst [vmem:[%s696_s4 + $0x70] sm:$0xff] %v391_v13  ;;  %v381_v16 = vsel %vm376_vm1, %v359_v8, %v341_v62  ;;  %v389_v17 = vsel %vm376_vm1, %v367_v9, %v349_v63  ;;  %v360_v18 = vmax.f32 %v342_v10, 0.0  ;;  %v368_v19 = vmax.f32 %v350_v11, 0.0 }
 0x104   :  { %397 = vst [vmem:[%s696_s4 + $0x20] sm:$0xff] %v381_v16  ;;  %405 = vst [vmem:[%s696_s4 + $0x60] sm:$0xff] %v389_v17  ;;  %v384_v20 = vsel %vm376_vm1, %v362_v14, %v344_v4  ;;  %v392_v21 = vsel %vm376_vm1, %v370_v15, %v352_v5 }
 0x105   :  { %400 = vst [vmem:[%s696_s4 + $0x38] sm:$0xff] %v384_v20  ;;  %408 = vst [vmem:[%s696_s4 + $0x78] sm:$0xff] %v392_v21  ;;  %v382_v22 = vsel %vm376_vm1, %v360_v18, %v342_v10  ;;  %v390_v24 = vsel %vm376_vm1, %v368_v19, %v350_v11 }
 0x106   :  { %398 = vst [vmem:[%s696_s4 + $0x28] sm:$0xff] %v382_v22  ;;  %406 = vst [vmem:[%s696_s4 + $0x68] sm:$0xff] %v390_v24 }

// kernel: encoder_forward.18
= control target key start
LH: loop header
LB: loop body
LE: loop exit
PB: predicated region body
PF: predicated region fallthrough
CT: control target
= control target key end

     0   :  { %vm12_vm0 = vcmask 261120   ;;  %vm36_vm1 = vcmask 1041409   ;;  %vm39_vm2 = vcmask 254976   ;;  %s70_s0 = inlined_call_operand.vmem [shape: f32[2,16,32], index: 0, kind: input, shape index: {}]   ;;  %s71_s1 = inlined_call_operand.vmem [shape: f32[2,32], index: 1, kind: output, shape index: {}]  }
   0x1   :  { %v8_v0 = vld [vmem:[%s70_s0] sm:$0xff]  ;;  %v9_v1 = vld [vmem:[%s70_s0 + $0x8] sm:$0xff]  ;;  %v10_v2 = vld [vmem:[%s70_s0 + $0x10] sm:$0xff] }
   0x2   :  { %v11_v3 = vld [vmem:[%s70_s0 + $0x18] sm:$0xff]  ;;  %v13_v4 = vsel %vm12_vm0, %v8_v0, 0.0  ;;  %v14_v5 = vsel %vm12_vm0, %v9_v1, 0.0  ;;  %v22_v6 = vsel %vm12_vm0, %v10_v2, 0.0 }
   0x3   :  { %v15_v7 = vadd.f32 %v14_v5, %v13_v4  ;;  %v23_v8 = vsel %vm12_vm0, %v11_v3, 0.0 }
   0x4   :  { %v24_v9 = vadd.f32 %v23_v8, %v22_v6 }
   0x5   :  { %v16_v10 = vrot.slane %v15_v7, 4 }
   0x6   :  { %v25_v11 = vrot.slane %v24_v9, 4 }
   0x7   :  { %v17_v12 = vadd.f32 %v16_v10, %v15_v7 }
   0x8   :  { %v26_v13 = vadd.f32 %v25_v11, %v24_v9 }
   0x9   :  { %v18_v14 = vrot.slane %v17_v12, 2 }
   0xa   :  { %v27_v15 = vrot.slane %v26_v13, 2 }
   0xb   :  { %v19_v16 = vadd.f32 %v18_v14, %v17_v12 }
   0xc   :  { %v28_v17 = vadd.f32 %v27_v15, %v26_v13 }
   0xd   :  { %v20_v18 = vrot.slane %v19_v16, 1 }
   0xe   :  { %v29_v19 = vrot.slane %v28_v17, 1 }
   0xf   :  { %v21_v20 = vadd.f32 %v20_v18, %v19_v16 }
  0x10   :  { %v30_v21 = vadd.f32 %v29_v19, %v28_v17 }
  0x11   :  { %v32_v22 = vmul.f32 0.0625, %v21_v20 }
  0x12   :  { %v33_v23 = vmul.f32 0.0625, %v30_v21 }
  0x14   :  { %v37_v24 = vsel %vm36_vm1, %v33_v23, %v32_v22 }
  0x15   :  { %40 = vst.msk [vmem:[%s71_s1] sm:$0x3] %vm39_vm2, %v37_v24 }

// kernel: encoder_forward.17
= control target key start
LH: loop header
LB: loop body
LE: loop exit
PB: predicated region body
PF: predicated region fallthrough
CT: control target
= control target key end

     0   :  { %v264_v20 = vlaneseq  ;;  %v369_v24 = vmov 0   ;;  %s473_s1 = inlined_call_operand.vmem [shape: bf16[256,128], index: 1, kind: input, shape index: {}]   ;;  %s474_s0 = inlined_call_operand.vmem [shape: bf16[32,256], index: 0, kind: input, shape index: {}]   ;;  %s475_s3 = inlined_call_operand.vmem [shape: f32[1,128], index: 3, kind: input, shape index: {}]   ;;  %s476_s2 = inlined_call_operand.vmem [shape: f32[1,128], index: 2, kind: input, shape index: {}]   ;;  %s477_s4 = inlined_call_operand.vmem [shape: f32[32,128], index: 4, kind: output, shape index: {}]  }
   0x1   :  { %v347_v0 = vld [vmem:[%s473_s1 + $0x40] sm:$0xff]   ;;  %v349_v2 = vld [vmem:[%s473_s1 + $0x48] sm:$0xff]   ;;  %v351_v4 = vld [vmem:[%s473_s1 + $0x50] sm:$0xff]  }
   0x2   :  { %v348_v1 = vld [vmem:[%s473_s1] sm:$0xff]   ;;  %302 = vmatprep.subr.bf16.mxu0 %v347_v0  ;;  %330 = vmatprep.subr.bf16.mxu1 %v347_v0  ;;  %v350_v3 = vld [vmem:[%s473_s1 + $0x8] sm:$0xff]   ;;  %v352_v5 = vld [vmem:[%s473_s1 + $0x10] sm:$0xff]   ;;  %v265_v22 = vshrl.u32 %v264_v20, 7 }
   0x3   :  { %303 = vmatpush3.bf16.msra.mxu0 %v348_v1  ;;  %338 = vmatpush3.bf16.msra.mxu1 %v348_v1  ;;  %v353_v6 = vld [vmem:[%s473_s1 + $0x58] sm:$0xff]   ;;  %v355_v8 = vld [vmem:[%s473_s1 + $0x60] sm:$0xff]   ;;  %v357_v10 = vld [vmem:[%s473_s1 + $0x68] sm:$0xff]  }
   0x4   :  { %304 = vmatprep.subr.bf16.mxu0 %v349_v2  ;;  %331 = vmatprep.subr.bf16.mxu1 %v349_v2  ;;  %v354_v7 = vld [vmem:[%s473_s1 + $0x18] sm:$0xff]   ;;  %v356_v9 = vld [vmem:[%s473_s1 + $0x20] sm:$0xff]   ;;  %v358_v13 = vld [vmem:[%s473_s1 + $0x28] sm:$0xff]   ;;  %v266_v23 = vsub.s32 0, %v265_v22 }
   0x5   :  { %v365_v11 = vld [vmem:[%s474_s0 + $0x4] ss:$8 sps:$4 sm:$0xff]   ;;  %v368_v12 = vld [vmem:[%s474_s0 + $0x14] ss:$8 sps:$4 sm:$0xff]   ;;  %v363_v18 = vld [vmem:[%s474_s0] ss:$8 sps:$4 sm:$0xff]  }
   0x6   :  { %v359_v14 = vld [vmem:[%s473_s1 + $0x70] sm:$0xff]   ;;  %214 = vmatprep.mubr.bf16.mxu0 %v365_v11  ;;  %222 = vmatprep.mubr.bf16.mxu1 %v368_v12  ;;  %v361_v16 = vld [vmem:[%s473_s1 + $0x78] sm:$0xff]   ;;  %v257_v21 = vld [vmem:[%s475_s3] sm:$0x1] }
   0x7   :  { %305 = vmatpush3.bf16.msra.mxu0 %v350_v3  ;;  %339 = vmatpush3.bf16.msra.mxu1 %v350_v3  ;;  %v360_v15 = vld [vmem:[%s473_s1 + $0x30] sm:$0xff]   ;;  %v362_v17 = vld [vmem:[%s473_s1 + $0x38] sm:$0xff]   ;;  %vm258_vm0 = vcmp.ne.f32.partialorder %v257_v21, 0.0  ;;  %v301_v29 = vld [vmem:[%s476_s2] ss:$0 sm:$0xff] }
   0x8   :  { %306 = vmatprep.subr.bf16.mxu0 %v351_v4  ;;  %332 = vmatprep.subr.bf16.mxu1 %v351_v4  ;;  %v366_v19 = vld [vmem:[%s474_s0 + $0x10] ss:$8 sps:$4 sm:$0xff]   ;;  %v263_v25 = vsel %vm258_vm0, 1, %v369_v24 }
   0x9   :  { %v267_v30 = vrot.slane %v263_v25, %v266_v23 }
   0xb   :  { %307 = vmatpush3.bf16.msra.mxu0 %v352_v5  ;;  %340 = vmatpush3.bf16.msra.mxu1 %v352_v5  ;;  %vm268_vm1 = vcmp.eq.s32.totalorder %v267_v30, 1 }
   0xc   :  { %308 = vmatprep.subr.bf16.mxu0 %v353_v6  ;;  %333 = vmatprep.subr.bf16.mxu1 %v353_v6 }
   0xf   :  { %309 = vmatpush3.bf16.msra.mxu0 %v354_v7  ;;  %341 = vmatpush3.bf16.msra.mxu1 %v354_v7 }
  0x10   :  { %310 = vmatprep.subr.bf16.mxu0 %v355_v8  ;;  %334 = vmatprep.subr.bf16.mxu1 %v355_v8 }
  0x13   :  { %311 = vmatpush3.bf16.msra.mxu0 %v356_v9  ;;  %342 = vmatpush3.bf16.msra.mxu1 %v356_v9 }
  0x14   :  { %312 = vmatprep.subr.bf16.mxu0 %v357_v10  ;;  %335 = vmatprep.subr.bf16.mxu1 %v357_v10 }
  0x17   :  { %313 = vmatpush3.bf16.msra.mxu0 %v358_v13  ;;  %343 = vmatpush3.bf16.msra.mxu1 %v358_v13 }
  0x18   :  { %314 = vmatprep.subr.bf16.mxu0 %v359_v14  ;;  %336 = vmatprep.subr.bf16.mxu1 %v359_v14 }
  0x1b   :  { %315 = vmatpush3.bf16.msra.mxu0 %v360_v15  ;;  %344 = vmatpush3.bf16.msra.mxu1 %v360_v15 }
  0x1c   :  { %316 = vmatprep.subr.bf16.mxu0 %v361_v16  ;;  %337 = vmatprep.subr.bf16.mxu1 %v361_v16 }
  0x1f   :  { %317 = vmatpush3.bf16.msra.mxu0 %v362_v17  ;;  %345 = vmatpush3.bf16.msra.mxu1 %v362_v17 }
  0x22   :  { %215 = vmatmul.mubr.bf16.vlgmr.msra.gmra.mrb[0].mxu0 %v363_v18  ;;  %223 = vmatmul.mubr.bf16.vlgmr.msra.gmra.mrb[0].mxu1 %v366_v19 }
  0xf5   :  { %v318_v26 = vpop.f32.mrb[0].mxu0  ;;  %v324_v27 = vpop.f32.mrb[0].mxu1 }
  0xf6   :  { %v319_v28 = vpop.f32.mrb[1].mxu0  ;;  %v325_v31 = vpop.f32.mrb[1].mxu1 }
  0xf7   :  { %v320_v32 = vadd.f32 %v319_v28, %v318_v26  ;;  %v326_v33 = vadd.f32 %v325_v31, %v324_v27  ;;  %v321_v34 = vpop.f32.mrb[2].mxu0  ;;  %v327_v35 = vpop.f32.mrb[2].mxu1 }
  0xf8   :  { %v322_v36 = vpop.f32.mrb[3].mxu0  ;;  %v328_v37 = vpop.f32.mrb[3].mxu1 }
  0xf9   :  { %v253_v38 = vadd.f32 %v320_v32, %v301_v29  ;;  %v255_v39 = vadd.f32 %v326_v33, %v301_v29  ;;  %v323_v40 = vadd.f32 %v322_v36, %v321_v34  ;;  %v329_v41 = vadd.f32 %v328_v37, %v327_v35 }
  0xfb   :  { %v259_v42 = vmax.f32 %v253_v38, 0.0  ;;  %v261_v43 = vmax.f32 %v255_v39, 0.0  ;;  %v254_v44 = vadd.f32 %v323_v40, %v301_v29  ;;  %v256_v45 = vadd.f32 %v329_v41, %v301_v29 }
  0xfd   :  { %v269_v46 = vsel %vm268_vm1, %v259_v42, %v253_v38  ;;  %v271_v47 = vsel %vm268_vm1, %v261_v43, %v255_v39  ;;  %v260_v48 = vmax.f32 %v254_v44, 0.0  ;;  %v262_v49 = vmax.f32 %v256_v45, 0.0 }
  0xfe   :  { %273 = vst [vmem:[%s477_s4] sm:$0xff] %v269_v46  ;;  %275 = vst [vmem:[%s477_s4 + $0x10] sm:$0xff] %v271_v47 }
  0xff   :  { %v270_v50 = vsel %vm268_vm1, %v260_v48, %v254_v44  ;;  %v272_v51 = vsel %vm268_vm1, %v262_v49, %v256_v45 }
 0x100   :  { %274 = vst [vmem:[%s477_s4 + $0x8] sm:$0xff] %v270_v50  ;;  %276 = vst [vmem:[%s477_s4 + $0x18] sm:$0xff] %v272_v51 }

// kernel: encoder_forward.19
= control target key start
LH: loop header
LB: loop body
LE: loop exit
PB: predicated region body
PF: predicated region fallthrough
CT: control target
= control target key end

     0   :  { %v207_v0 = vmov 0.0   ;;  %vm208_vm0 = vmmov 0   ;;  %v147_v10 = vlaneseq  ;;  %v209_v14 = vmov 0   ;;  %s271_s1 = inlined_call_operand.vmem [shape: bf16[128,128], index: 1, kind: input, shape index: {}]   ;;  %s272_s0 = inlined_call_operand.vmem [shape: bf16[8,128], index: 0, kind: input, shape index: {}]   ;;  %s273_s3 = inlined_call_operand.vmem [shape: f32[1,128], index: 3, kind: input, shape index: {}]   ;;  %s274_s2 = inlined_call_operand.vmem [shape: f32[1,128], index: 2, kind: input, shape index: {}]   ;;  %s275_s4 = inlined_call_operand.vmem [shape: f32[8,128], index: 4, kind: output, shape index: {}]  }
   0x1   :  { %176 = vmatprep.subr.bf16.mxu0 %v207_v0  ;;  %v199_v1 = vld [vmem:[%s271_s1] sm:$0xff]   ;;  %192 = vmatprep.mubr.msk.bf16.mxu0 %vm208_vm0, %v207_v0  ;;  %v200_v2 = vld [vmem:[%s271_s1 + $0x8] sm:$0xff]   ;;  %v201_v3 = vld [vmem:[%s271_s1 + $0x10] sm:$0xff]  }
   0x2   :  { %177 = vmatpush3.bf16.msra.mxu0 %v199_v1  ;;  %v202_v4 = vld [vmem:[%s271_s1 + $0x18] sm:$0xff]   ;;  %v203_v5 = vld [vmem:[%s271_s1 + $0x20] sm:$0xff]   ;;  %v204_v6 = vld [vmem:[%s271_s1 + $0x28] sm:$0xff]   ;;  %v148_v12 = vshrl.u32 %v147_v10, 7 }
   0x3   :  { %178 = vmatprep.subr.bf16.mxu0 %v207_v0  ;;  %v205_v7 = vld [vmem:[%s271_s1 + $0x30] sm:$0xff]   ;;  %v206_v8 = vld [vmem:[%s271_s1 + $0x38] sm:$0xff]   ;;  %v24_v9 = vld [vmem:[%s272_s0] sm:$0xf] }
   0x4   :  { %v143_v11 = vld [vmem:[%s273_s3] sm:$0x1]  ;;  %v149_v13 = vsub.s32 0, %v148_v12 }
   0x5   :  { %vm144_vm1 = vcmp.ne.f32.partialorder %v143_v11, 0.0  ;;  %v166_v16 = vld [vmem:[%s274_s2] ss:$0 sm:$0xff] }
   0x6   :  { %179 = vmatpush3.bf16.msra.mxu0 %v200_v2  ;;  %v146_v15 = vsel %vm144_vm1, 1, %v209_v14 }
   0x7   :  { %180 = vmatprep.subr.bf16.mxu0 %v207_v0  ;;  %v150_v17 = vrot.slane %v146_v15, %v149_v13 }
   0x9   :  { %vm151_vm2 = vcmp.eq.s32.totalorder %v150_v17, 1 }
   0xa   :  { %181 = vmatpush3.bf16.msra.mxu0 %v201_v3 }
   0xb   :  { %182 = vmatprep.subr.bf16.mxu0 %v207_v0 }
   0xe   :  { %183 = vmatpush3.bf16.msra.mxu0 %v202_v4 }
   0xf   :  { %184 = vmatprep.subr.bf16.mxu0 %v207_v0 }
  0x12   :  { %185 = vmatpush3.bf16.msra.mxu0 %v203_v5 }
  0x13   :  { %186 = vmatprep.subr.bf16.mxu0 %v207_v0 }
  0x16   :  { %187 = vmatpush3.bf16.msra.mxu0 %v204_v6 }
  0x17   :  { %188 = vmatprep.subr.bf16.mxu0 %v207_v0 }
  0x1a   :  { %189 = vmatpush3.bf16.msra.mxu0 %v205_v7 }
  0x1b   :  { %190 = vmatprep.subr.bf16.mxu0 %v207_v0 }
  0x1e   :  { %191 = vmatpush3.bf16.msra.mxu0 %v206_v8 }
  0x21   :  { %193 = vmatmul.mubr.bf16.vlgmr.msra.gmra.mrb[0].mxu0 %v24_v9 }
  0xf4   :  { %v123_v18 = vpop.f32.mrb[0].mxu0 }
  0xf5   :  { %v142_v19 = vadd.f32 %v166_v16, %v123_v18  ;;  %v194_v20 = vpop.f32.mrb[1].mxu0 }
  0xf6   :  { %v126_v21 = vpop.f32.mrb[2].mxu0 }
  0xf7   :  { %v145_v22 = vmax.f32 %v142_v19, 0.0  ;;  %v195_v23 = vpop.f32.mrb[3].mxu0 }
  0xf9   :  { %v152_v24 = vsel %vm151_vm2, %v145_v22, %v142_v19 }
  0xfa   :  { %153 = vst [vmem:[%s275_s4] sm:$0xff] %v152_v24 }

// kernel: encoder_forward.13
= control target key start
LH: loop header
LB: loop body
LE: loop exit
PB: predicated region body
PF: predicated region fallthrough
CT: control target
= control target key end

     0   :  { %s309_s6 = smov 0   ;;  %s357_s0 = inlined_call_operand.vmem [shape: f32[2,64,16], index: 0, kind: input, shape index: {}]   ;;  %s358_s1 = inlined_call_operand.vmem [shape: f32[2,64,16], index: 1, kind: output, shape index: {}]  }
   0x1 LB: > { %s268_s7 = sadd.s32 4294967295, %s297_s6   ;;  %p272_p0 = scmp.ge.s32.totalorder %s297_s6, 1  ;;  %s297_s6 = sphi %s309_s6, %s11_s6  }
   0x2   : > { %p87_p1 = scmp.lt.s32.totalorder %s297_s6, 3 }
   0x4   : > { %p88_p2 = pnand %p272_p0, %p87_p1 }
   0x5   : > { %p107_p3 = scmp.lt.s32.totalorder (!%p88_p2), %s268_s7, 1  ;;  %vm125_vm0 = vcmask (!%p88_p2), 130048  }
   0x6   : > { %91 = sbr.rel (%p88_p2) target bundleno = 100 (0x64), region = 24 }
   0xd   : > { %s360_s7 = smov (!%p107_p3, %s268_s7), 1 }
   0xe   : > { %s279_s8 = sshll.u32 %s360_s7, 6 }
   0xf   : > { %s111_s11 = scalar_lea.vmem %s357_s0, %s279_s8  ;;  %s116_s14 = scalar_lea.vmem %s358_s1, %s279_s8 }
  0x10   : > { %v117_v0 = vld [vmem:[%s111_s11] sm:$0xff]  ;;  %v118_v1 = vld [vmem:[%s111_s11 + $0x8] sm:$0xff]  ;;  %v119_v2 = vld [vmem:[%s111_s11 + $0x10] sm:$0xff] }
  0x11   : > { %v120_v3 = vld [vmem:[%s111_s11 + $0x18] sm:$0xff]  ;;  %v126_v4 = vsel %vm125_vm0, %v117_v0, 0.0  ;;  %v127_v5 = vsel %vm125_vm0, %v118_v1, 0.0  ;;  %v129_v6 = vsel %vm125_vm0, %v119_v2, 0.0  ;;  %v121_v7 = vld [vmem:[%s111_s11 + $0x20] sm:$0xff]  ;;  %v122_v10 = vld [vmem:[%s111_s11 + $0x28] sm:$0xff] }
  0x12   : > { %v128_v8 = vadd.f32 %v127_v5, %v126_v4  ;;  %v131_v9 = vsel %vm125_vm0, %v120_v3, 0.0  ;;  %v133_v12 = vsel %vm125_vm0, %v121_v7, 0.0  ;;  %v123_v13 = vld [vmem:[%s111_s11 + $0x30] sm:$0xff]  ;;  %v135_v15 = vsel %vm125_vm0, %v122_v10, 0.0  ;;  %v124_v16 = vld [vmem:[%s111_s11 + $0x38] sm:$0xff] }
  0x13   : > { %v137_v18 = vsel %vm125_vm0, %v123_v13, 0.0  ;;  %v139_v20 = vsel %vm125_vm0, %v124_v16, 0.0 }
  0x14   : > { %v130_v11 = vadd.f32 %v129_v6, %v128_v8 }
  0x16   : > { %v132_v14 = vadd.f32 %v131_v9, %v130_v11 }
  0x18   : > { %v134_v17 = vadd.f32 %v133_v12, %v132_v14 }
  0x1a   : > { %v136_v19 = vadd.f32 %v135_v15, %v134_v17 }
  0x1c   : > { %v138_v21 = vadd.f32 %v137_v18, %v136_v19 }
  0x1e   : > { %v140_v22 = vadd.f32 %v139_v20, %v138_v21 }
  0x20   : > { %v141_v23 = vrot.slane %v140_v22, 4 }
  0x22   : > { %v142_v24 = vadd.f32 %v141_v23, %v140_v22 }
  0x24   : > { %v143_v25 = vrot.slane %v142_v24, 2 }
  0x26   : > { %v144_v26 = vadd.f32 %v143_v25, %v142_v24 }
  0x28   : > { %v145_v27 = vrot.slane %v144_v26, 1 }
  0x2a   : > { %v146_v28 = vadd.f32 %v145_v27, %v144_v26 }
  0x2c   : > { %v148_v29 = vmul.f32 0.015625, %v146_v28 }
  0x2e   : > { %v149_v30 = vsub.f32 %v117_v0, %v148_v29  ;;  %v150_v31 = vsub.f32 %v118_v1, %v148_v29  ;;  %v151_v32 = vsub.f32 %v119_v2, %v148_v29  ;;  %v152_v33 = vsub.f32 %v120_v3, %v148_v29 }
  0x2f   : > { %v153_v34 = vsub.f32 %v121_v7, %v148_v29  ;;  %v154_v35 = vsub.f32 %v122_v10, %v148_v29  ;;  %v155_v40 = vsub.f32 %v123_v13, %v148_v29  ;;  %v156_v46 = vsub.f32 %v124_v16, %v148_v29 }
  0x30   : > { %v157_v36 = vmul.f32 %v149_v30, %v149_v30  ;;  %v158_v37 = vmul.f32 %v150_v31, %v150_v31  ;;  %v159_v38 = vmul.f32 %v151_v32, %v151_v32  ;;  %v160_v39 = vmul.f32 %v152_v33, %v152_v33 }
  0x31   : > { %v161_v41 = vmul.f32 %v153_v34, %v153_v34  ;;  %v162_v47 = vmul.f32 %v154_v35, %v154_v35  ;;  %v163_v50 = vmul.f32 %v155_v40, %v155_v40  ;;  %v164_v53 = vmul.f32 %v156_v46, %v156_v46 }
  0x32   : > { %v165_v42 = vsel %vm125_vm0, %v157_v36, 0.0  ;;  %v166_v43 = vsel %vm125_vm0, %v158_v37, 0.0  ;;  %v168_v44 = vsel %vm125_vm0, %v159_v38, 0.0  ;;  %v170_v48 = vsel %vm125_vm0, %v160_v39, 0.0 }
  0x33   : > { %v167_v45 = vadd.f32 %v166_v43, %v165_v42  ;;  %v172_v51 = vsel %vm125_vm0, %v161_v41, 0.0  ;;  %v174_v54 = vsel %vm125_vm0, %v162_v47, 0.0  ;;  %v176_v56 = vsel %vm125_vm0, %v163_v50, 0.0 }
  0x34   : > { %v178_v58 = vsel %vm125_vm0, %v164_v53, 0.0 }
  0x35   : > { %v169_v49 = vadd.f32 %v168_v44, %v167_v45 }
  0x37   : > { %v171_v52 = vadd.f32 %v170_v48, %v169_v49 }
  0x39   : > { %v173_v55 = vadd.f32 %v172_v51, %v171_v52 }
  0x3b   : > { %v175_v57 = vadd.f32 %v174_v54, %v173_v55 }
  0x3d   : > { %v177_v59 = vadd.f32 %v176_v56, %v175_v57 }
  0x3f   : > { %v179_v60 = vadd.f32 %v178_v58, %v177_v59 }
  0x41   : > { %v180_v61 = vrot.slane %v179_v60, 4 }
  0x43   : > { %v181_v62 = vadd.f32 %v180_v61, %v179_v60 }
  0x45   : > { %v182_v63 = vrot.slane %v181_v62, 2 }
  0x47   : > { %v183_v0 = vadd.f32 %v182_v63, %v181_v62 }
  0x49   : > { %v184_v1 = vrot.slane %v183_v0, 1 }
  0x4b   : > { %v185_v2 = vadd.f32 %v184_v1, %v183_v0 }
  0x4d   : > { %v186_v3 = vmul.f32 0.015625, %v185_v2 }
  0x4f   : > { %v187_v4 = vadd.f32 1e-05, %v186_v3 }
  0x51   : > { %289 = vrsqrt.f32 %v187_v4 }
  0x5b   : > { %v290_v5 = vpop.eup %289 }
  0x5c   : > { %v189_v6 = vmul.f32 %v290_v5, %v149_v30  ;;  %v190_v7 = vmul.f32 %v290_v5, %v150_v31  ;;  %v191_v8 = vmul.f32 %v290_v5, %v151_v32  ;;  %v192_v9 = vmul.f32 %v290_v5, %v152_v33 }
  0x5d   : > { %v193_v10 = vmul.f32 %v290_v5, %v153_v34  ;;  %v194_v11 = vmul.f32 %v290_v5, %v154_v35  ;;  %v195_v12 = vmul.f32 %v290_v5, %v155_v40  ;;  %v196_v13 = vmul.f32 %v290_v5, %v156_v46 }
  0x5e   : > { %v197_v14 = vmax.f32 %v189_v6, 0.0  ;;  %v198_v15 = vmax.f32 %v190_v7, 0.0  ;;  %v199_v16 = vmax.f32 %v191_v8, 0.0  ;;  %v200_v17 = vmax.f32 %v192_v9, 0.0 }
  0x5f   : > { %v201_v18 = vmax.f32 %v193_v10, 0.0  ;;  %v202_v19 = vmax.f32 %v194_v11, 0.0  ;;  %v203_v20 = vmax.f32 %v195_v12, 0.0  ;;  %v204_v21 = vmax.f32 %v196_v13, 0.0 }
  0x60   : > { %205 = vst.msk [vmem:[%s116_s14] sm:$0xff] %vm125_vm0, %v197_v14  ;;  %206 = vst.msk [vmem:[%s116_s14 + $0x8] sm:$0xff] %vm125_vm0, %v198_v15 }
  0x61   : > { %207 = vst.msk [vmem:[%s116_s14 + $0x10] sm:$0xff] %vm125_vm0, %v199_v16  ;;  %208 = vst.msk [vmem:[%s116_s14 + $0x18] sm:$0xff] %vm125_vm0, %v200_v17 }
  0x62   : > { %209 = vst.msk [vmem:[%s116_s14 + $0x20] sm:$0xff] %vm125_vm0, %v201_v18  ;;  %210 = vst.msk [vmem:[%s116_s14 + $0x28] sm:$0xff] %vm125_vm0, %v202_v19 }
  0x63   : > { %211 = vst.msk [vmem:[%s116_s14 + $0x30] sm:$0xff] %vm125_vm0, %v203_v20  ;;  %212 = vst.msk [vmem:[%s116_s14 + $0x38] sm:$0xff] %vm125_vm0, %v204_v21 }
  0x64 PF: > { %s11_s6 = sadd.s32 1, %s297_s6  }
  0x65   : > { %p8_p4 = scmp.ge.s32.totalorder %s11_s6, 4  }
  0x67   :  { %10 = sbr.rel (!%p8_p4) target bundleno = 1 (0x1), region = 54 }

// kernel: encoder_forward.11
= control target key start
LH: loop header
LB: loop body
LE: loop exit
PB: predicated region body
PF: predicated region fallthrough
CT: control target
= control target key end

     0   :  { %s549_s6 = smov 0   ;;  %s1093_s0 = inlined_call_operand.vmem [shape: f32[2,256,8], index: 0, kind: input, shape index: {}]   ;;  %s1094_s1 = inlined_call_operand.vmem [shape: f32[2,256,8], index: 1, kind: output, shape index: {}]  }
   0x1 LB: > { %s508_s7 = sadd.s32 4294967295, %s537_s6   ;;  %p512_p0 = scmp.ge.s32.totalorder %s537_s6, 1  ;;  %s537_s6 = sphi %s549_s6, %s11_s6  }
   0x2   : > { %p87_p1 = scmp.lt.s32.totalorder %s537_s6, 3 }
   0x4   : > { %p88_p2 = pnand %p512_p0, %p87_p1 }
   0x5   : > { %p107_p3 = scmp.lt.s32.totalorder (!%p88_p2), %s508_s7, 1  ;;  %vm149_vm0 = vcmask (!%p88_p2), 64512  }
   0x6   : > { %91 = sbr.rel (%p88_p2) target bundleno = 209 (0xd1), region = 24 }
   0xd   : > { %s1096_s7 = smov (!%p107_p3, %s508_s7), 1 }
   0xe   : > { %s519_s8 = sshll.u32 %s1096_s7, 8 }
   0xf   : > { %s565_s11 = scalar_lea.vmem %s1093_s0, %s519_s8  ;;  %s968_s14 = scalar_lea.vmem %s1094_s1, %s519_s8 }
  0x10   : > { %v568_v0 = vld [vmem:[%s565_s11] sm:$0xff]  ;;  %v571_v1 = vld [vmem:[%s565_s11 + $0x8] sm:$0xff]  ;;  %v574_v2 = vld [vmem:[%s565_s11 + $0x10] sm:$0xff] }
  0x11   : > { %v577_v3 = vld [vmem:[%s565_s11 + $0x18] sm:$0xff]  ;;  %v150_v4 = vsel %vm149_vm0, %v568_v0, 0.0  ;;  %v151_v5 = vsel %vm149_vm0, %v571_v1, 0.0  ;;  %v153_v6 = vsel %vm149_vm0, %v574_v2, 0.0  ;;  %v586_v7 = vld [vmem:[%s565_s11 + $0x20] sm:$0xff]  ;;  %v591_v10 = vld [vmem:[%s565_s11 + $0x28] sm:$0xff] }
  0x12   : > { %v152_v8 = vadd.f32 %v151_v5, %v150_v4  ;;  %v155_v9 = vsel %vm149_vm0, %v577_v3, 0.0  ;;  %v157_v12 = vsel %vm149_vm0, %v586_v7, 0.0  ;;  %v596_v13 = vld [vmem:[%s565_s11 + $0x30] sm:$0xff]  ;;  %v159_v15 = vsel %vm149_vm0, %v591_v10, 0.0  ;;  %v601_v16 = vld [vmem:[%s565_s11 + $0x38] sm:$0xff]  ;;  %v606_v19 = vld [vmem:[%s565_s11 + $0x40] sm:$0xff] }
  0x13   : > { %v161_v18 = vsel %vm149_vm0, %v596_v13, 0.0  ;;  %v163_v21 = vsel %vm149_vm0, %v601_v16, 0.0  ;;  %v611_v22 = vld [vmem:[%s565_s11 + $0x48] sm:$0xff]  ;;  %v165_v24 = vsel %vm149_vm0, %v606_v19, 0.0  ;;  %v616_v25 = vld [vmem:[%s565_s11 + $0x50] sm:$0xff]  ;;  %v621_v28 = vld [vmem:[%s565_s11 + $0x58] sm:$0xff] }
  0x14   : > { %v154_v11 = vadd.f32 %v153_v6, %v152_v8  ;;  %v167_v27 = vsel %vm149_vm0, %v611_v22, 0.0  ;;  %v169_v30 = vsel %vm149_vm0, %v616_v25, 0.0  ;;  %v626_v31 = vld [vmem:[%s565_s11 + $0x60] sm:$0xff]  ;;  %v171_v33 = vsel %vm149_vm0, %v621_v28, 0.0  ;;  %v631_v34 = vld [vmem:[%s565_s11 + $0x68] sm:$0xff]  ;;  %v636_v37 = vld [vmem:[%s565_s11 + $0x70] sm:$0xff] }
  0x15   : > { %v173_v36 = vsel %vm149_vm0, %v626_v31, 0.0  ;;  %v175_v39 = vsel %vm149_vm0, %v631_v34, 0.0  ;;  %v641_v40 = vld [vmem:[%s565_s11 + $0x78] sm:$0xff]  ;;  %v177_v42 = vsel %vm149_vm0, %v636_v37, 0.0  ;;  %v646_v43 = vld [vmem:[%s565_s11 + $0x80] sm:$0xff]  ;;  %v651_v46 = vld [vmem:[%s565_s11 + $0x88] sm:$0xff] }
  0x16   : > { %v156_v14 = vadd.f32 %v155_v9, %v154_v11  ;;  %v179_v45 = vsel %vm149_vm0, %v641_v40, 0.0  ;;  %v181_v48 = vsel %vm149_vm0, %v646_v43, 0.0  ;;  %v656_v49 = vld [vmem:[%s565_s11 + $0x90] sm:$0xff]  ;;  %v183_v51 = vsel %vm149_vm0, %v651_v46, 0.0  ;;  %v661_v52 = vld [vmem:[%s565_s11 + $0x98] sm:$0xff]  ;;  %v666_v55 = vld [vmem:[%s565_s11 + $0xa0] sm:$0xff] }
  0x17   : > { %v185_v54 = vsel %vm149_vm0, %v656_v49, 0.0  ;;  %v187_v57 = vsel %vm149_vm0, %v661_v52, 0.0  ;;  %v671_v58 = vld [vmem:[%s565_s11 + $0xa8] sm:$0xff]  ;;  %v189_v60 = vsel %vm149_vm0, %v666_v55, 0.0  ;;  %v676_v61 = vld [vmem:[%s565_s11 + $0xb0] sm:$0xff]  ;;  %v681_v4 = vld [vmem:[%s565_s11 + $0xb8] sm:$0xff] }
  0x18   : > { %v158_v17 = vadd.f32 %v157_v12, %v156_v14  ;;  %v191_v63 = vsel %vm149_vm0, %v671_v58, 0.0  ;;  %v193_v6 = vsel %vm149_vm0, %v676_v61, 0.0  ;;  %v686_v8 = vld [vmem:[%s565_s11 + $0xc0] sm:$0xff]  ;;  %v195_v11 = vsel %vm149_vm0, %v681_v4, 0.0  ;;  %v691_v12 = vld [vmem:[%s565_s11 + $0xc8] sm:$0xff] }
  0x1a   : > { %v160_v20 = vadd.f32 %v159_v15, %v158_v17  ;;  %v197_v15 = vsel %vm149_vm0, %v686_v8, 0.0  ;;  %v696_v17 = vld [vmem:[%s565_s11 + $0xd0] sm:$0xff] }
  0x1c   : > { %v162_v23 = vadd.f32 %v161_v18, %v160_v20  ;;  %v199_v20 = vsel %vm149_vm0, %v691_v12, 0.0 }
  0x1e   : > { %v164_v26 = vadd.f32 %v163_v21, %v162_v23  ;;  %v701_v21 = vld [vmem:[%s565_s11 + $0xd8] sm:$0xff] }
  0x20   : > { %v166_v29 = vadd.f32 %v165_v24, %v164_v26  ;;  %v201_v24 = vsel %vm149_vm0, %v696_v17, 0.0  ;;  %v706_v26 = vld [vmem:[%s565_s11 + $0xe0] sm:$0xff] }
  0x22   : > { %v168_v32 = vadd.f32 %v167_v27, %v166_v29  ;;  %v203_v29 = vsel %vm149_vm0, %v701_v21, 0.0 }
  0x24   : > { %v170_v35 = vadd.f32 %v169_v30, %v168_v32  ;;  %v711_v30 = vld [vmem:[%s565_s11 + $0xe8] sm:$0xff] }
  0x26   : > { %v172_v38 = vadd.f32 %v171_v33, %v170_v35  ;;  %v205_v33 = vsel %vm149_vm0, %v706_v26, 0.0  ;;  %v716_v35 = vld [vmem:[%s565_s11 + $0xf0] sm:$0xff] }
  0x28   : > { %v174_v41 = vadd.f32 %v173_v36, %v172_v38  ;;  %v207_v38 = vsel %vm149_vm0, %v711_v30, 0.0 }
  0x2a   : > { %v176_v44 = vadd.f32 %v175_v39, %v174_v41  ;;  %v721_v39 = vld [vmem:[%s565_s11 + $0xf8] sm:$0xff] }
  0x2c   : > { %v178_v47 = vadd.f32 %v177_v42, %v176_v44  ;;  %v209_v42 = vsel %vm149_vm0, %v716_v35, 0.0 }
  0x2e   : > { %v180_v50 = vadd.f32 %v179_v45, %v178_v47  ;;  %v211_v45 = vsel %vm149_vm0, %v721_v39, 0.0 }
  0x30   : > { %v182_v53 = vadd.f32 %v181_v48, %v180_v50 }
  0x32   : > { %v184_v56 = vadd.f32 %v183_v51, %v182_v53 }
  0x34   : > { %v186_v59 = vadd.f32 %v185_v54, %v184_v56 }
  0x36   : > { %v188_v62 = vadd.f32 %v187_v57, %v186_v59 }
  0x38   : > { %v190_v5 = vadd.f32 %v189_v60, %v188_v62 }
  0x3a   : > { %v192_v9 = vadd.f32 %v191_v63, %v190_v5 }
  0x3c   : > { %v194_v14 = vadd.f32 %v193_v6, %v192_v9 }
  0x3e   : > { %v196_v18 = vadd.f32 %v195_v11, %v194_v14 }
  0x40   : > { %v198_v23 = vadd.f32 %v197_v15, %v196_v18 }
  0x42   : > { %v200_v27 = vadd.f32 %v199_v20, %v198_v23 }
  0x44   : > { %v202_v32 = vadd.f32 %v201_v24, %v200_v27 }
  0x46   : > { %v204_v36 = vadd.f32 %v203_v29, %v202_v32 }
  0x48   : > { %v206_v41 = vadd.f32 %v205_v33, %v204_v36 }
  0x4a   : > { %v208_v44 = vadd.f32 %v207_v38, %v206_v41 }
  0x4c   : > { %v210_v47 = vadd.f32 %v209_v42, %v208_v44 }
  0x4e   : > { %v212_v48 = vadd.f32 %v211_v45, %v210_v47 }
  0x50   : > { %v213_v50 = vrot.slane %v212_v48, 4 }
  0x52   : > { %v214_v51 = vadd.f32 %v213_v50, %v212_v48 }
  0x54   : > { %v215_v53 = vrot.slane %v214_v51, 2 }
  0x56   : > { %v216_v54 = vadd.f32 %v215_v53, %v214_v51 }
  0x58   : > { %v217_v56 = vrot.slane %v216_v54, 1 }
  0x5a   : > { %v218_v57 = vadd.f32 %v217_v56, %v216_v54 }
  0x5c   : > { %v727_v59 = vmul.f32 0.00390625, %v218_v57 }
  0x5e   : > { %v731_v60 = vsub.f32 %v568_v0, %v727_v59  ;;  %v735_v62 = vsub.f32 %v571_v1, %v727_v59  ;;  %v739_v63 = vsub.f32 %v574_v2, %v727_v59  ;;  %v743_v5 = vsub.f32 %v577_v3, %v727_v59 }
  0x5f   : > { %v747_v6 = vsub.f32 %v586_v7, %v727_v59  ;;  %v757_v2 = vsub.f32 %v591_v10, %v727_v59  ;;  %v763_v7 = vsub.f32 %v596_v13, %v727_v59  ;;  %v772_v10 = vsub.f32 %v601_v16, %v727_v59 }
  0x60   : > { %v253_v0 = vmul.f32 %v731_v60, %v731_v60  ;;  %v254_v9 = vmul.f32 %v735_v62, %v735_v62  ;;  %v255_v1 = vmul.f32 %v739_v63, %v739_v63  ;;  %v256_v3 = vmul.f32 %v743_v5, %v743_v5 }
  0x61   : > { %v257_v11 = vmul.f32 %v747_v6, %v747_v6  ;;  %v258_v23 = vmul.f32 %v757_v2, %v757_v2  ;;  %v779_v27 = vsub.f32 %v606_v19, %v727_v59  ;;  %v259_v29 = vmul.f32 %v763_v7, %v763_v7 }
  0x62   : > { %v285_v14 = vsel %vm149_vm0, %v253_v0, 0.0  ;;  %v286_v15 = vsel %vm149_vm0, %v254_v9, 0.0  ;;  %v288_v18 = vsel %vm149_vm0, %v255_v1, 0.0  ;;  %v290_v13 = vsel %vm149_vm0, %v256_v3, 0.0 }
  0x63   : > { %v287_v20 = vadd.f32 %v286_v15, %v285_v14  ;;  %v292_v32 = vsel %vm149_vm0, %v257_v11, 0.0  ;;  %v786_v16 = vsub.f32 %v611_v22, %v727_v59  ;;  %v260_v36 = vmul.f32 %v772_v10, %v772_v10 }
  0x64   : > { %v294_v38 = vsel %vm149_vm0, %v258_v23, 0.0  ;;  %v793_v19 = vsub.f32 %v616_v25, %v727_v59  ;;  %v261_v42 = vmul.f32 %v779_v27, %v779_v27  ;;  %v296_v44 = vsel %vm149_vm0, %v259_v29, 0.0 }
  0x65   : > { %v289_v24 = vadd.f32 %v288_v18, %v287_v20  ;;  %v800_v22 = vsub.f32 %v621_v28, %v727_v59  ;;  %v262_v47 = vmul.f32 %v786_v16, %v786_v16  ;;  %v298_v48 = vsel %vm149_vm0, %v260_v36, 0.0 }
  0x66   : > { %v807_v25 = vsub.f32 %v626_v31, %v727_v59  ;;  %v263_v51 = vmul.f32 %v793_v19, %v793_v19  ;;  %v300_v53 = vsel %vm149_vm0, %v261_v42, 0.0  ;;  %v814_v28 = vsub.f32 %v631_v34, %v727_v59 }
  0x67   : > { %v291_v33 = vadd.f32 %v290_v13, %v289_v24  ;;  %v264_v56 = vmul.f32 %v800_v22, %v800_v22  ;;  %v302_v57 = vsel %vm149_vm0, %v262_v47, 0.0  ;;  %v821_v31 = vsub.f32 %v636_v37, %v727_v59 }
  0x68   : > { %v265_v9 = vmul.f32 %v807_v25, %v807_v25  ;;  %v304_v1 = vsel %vm149_vm0, %v263_v51, 0.0  ;;  %v828_v34 = vsub.f32 %v641_v40, %v727_v59  ;;  %v266_v11 = vmul.f32 %v814_v28, %v814_v28 }
  0x69   : > { %v293_v41 = vadd.f32 %v292_v32, %v291_v33  ;;  %v306_v14 = vsel %vm149_vm0, %v264_v56, 0.0  ;;  %v835_v37 = vsub.f32 %v646_v43, %v727_v59  ;;  %v267_v18 = vmul.f32 %v821_v31, %v821_v31 }
  0x6a   : > { %v308_v20 = vsel %vm149_vm0, %v265_v9, 0.0  ;;  %v842_v40 = vsub.f32 %v651_v46, %v727_v59  ;;  %v268_v13 = vmul.f32 %v828_v34, %v828_v34  ;;  %v310_v24 = vsel %vm149_vm0, %v266_v11, 0.0 }
  0x6b   : > { %v295_v45 = vadd.f32 %v294_v38, %v293_v41  ;;  %v849_v43 = vsub.f32 %v656_v49, %v727_v59  ;;  %v269_v32 = vmul.f32 %v835_v37, %v835_v37  ;;  %v312_v33 = vsel %vm149_vm0, %v267_v18, 0.0 }
  0x6c   : > { %v856_v46 = vsub.f32 %v661_v52, %v727_v59  ;;  %v270_v38 = vmul.f32 %v842_v40, %v842_v40  ;;  %v314_v41 = vsel %vm149_vm0, %v268_v13, 0.0  ;;  %v863_v49 = vsub.f32 %v666_v55, %v727_v59 }
  0x6d   : > { %v297_v50 = vadd.f32 %v296_v44, %v295_v45  ;;  %v271_v44 = vmul.f32 %v849_v43, %v849_v43  ;;  %v316_v45 = vsel %vm149_vm0, %v269_v32, 0.0  ;;  %v870_v52 = vsub.f32 %v671_v58, %v727_v59 }
  0x6e   : > { %v877_v55 = vsub.f32 %v676_v61, %v727_v59  ;;  %v884_v58 = vsub.f32 %v681_v4, %v727_v59  ;;  %v891_v61 = vsub.f32 %v686_v8, %v727_v59  ;;  %v898_v4 = vsub.f32 %v691_v12, %v727_v59 }
  0x6f   : > { %v299_v54 = vadd.f32 %v298_v48, %v297_v50  ;;  %v272_v48 = vmul.f32 %v856_v46, %v856_v46  ;;  %v318_v50 = vsel %vm149_vm0, %v270_v38, 0.0  ;;  %v905_v8 = vsub.f32 %v696_v17, %v727_v59 }
  0x70   : > { %v912_v12 = vsub.f32 %v701_v21, %v727_v59  ;;  %v919_v17 = vsub.f32 %v706_v26, %v727_v59  ;;  %v926_v21 = vsub.f32 %v711_v30, %v727_v59  ;;  %v933_v26 = vsub.f32 %v716_v35, %v727_v59 }
  0x71   : > { %v301_v0 = vadd.f32 %v300_v53, %v299_v54  ;;  %v273_v53 = vmul.f32 %v863_v49, %v863_v49  ;;  %v320_v54 = vsel %vm149_vm0, %v271_v44, 0.0  ;;  %v940_v30 = vsub.f32 %v721_v39, %v727_v59 }
  0x72   : > { %v283_v35 = vmul.f32 %v933_v26, %v933_v26 }
  0x73   : > { %v303_v3 = vadd.f32 %v302_v57, %v301_v0  ;;  %v274_v57 = vmul.f32 %v870_v52, %v870_v52  ;;  %v322_v0 = vsel %vm149_vm0, %v272_v48, 0.0 }
  0x74   : > { %v344_v39 = vsel %vm149_vm0, %v283_v35, 0.0 }
  0x75   : > { %v305_v15 = vadd.f32 %v304_v1, %v303_v3  ;;  %v275_v1 = vmul.f32 %v877_v55, %v877_v55  ;;  %v324_v3 = vsel %vm149_vm0, %v273_v53, 0.0 }
  0x77   : > { %v307_v23 = vadd.f32 %v306_v14, %v305_v15  ;;  %v276_v14 = vmul.f32 %v884_v58, %v884_v58  ;;  %v326_v15 = vsel %vm149_vm0, %v274_v57, 0.0  ;;  %v284_v57 = vmul.f32 %v940_v30, %v940_v30 }
  0x79   : > { %v309_v29 = vadd.f32 %v308_v20, %v307_v23  ;;  %v277_v20 = vmul.f32 %v891_v61, %v891_v61  ;;  %v328_v23 = vsel %vm149_vm0, %v275_v1, 0.0  ;;  %v346_v1 = vsel %vm149_vm0, %v284_v57, 0.0 }
  0x7b   : > { %v311_v36 = vadd.f32 %v310_v24, %v309_v29  ;;  %v278_v24 = vmul.f32 %v898_v4, %v898_v4  ;;  %v330_v29 = vsel %vm149_vm0, %v276_v14, 0.0 }
  0x7d   : > { %v313_v42 = vadd.f32 %v312_v33, %v311_v36  ;;  %v279_v33 = vmul.f32 %v905_v8, %v905_v8  ;;  %v332_v36 = vsel %vm149_vm0, %v277_v20, 0.0 }
  0x7f   : > { %v315_v47 = vadd.f32 %v314_v41, %v313_v42  ;;  %v280_v41 = vmul.f32 %v912_v12, %v912_v12  ;;  %v334_v42 = vsel %vm149_vm0, %v278_v24, 0.0 }
  0x81   : > { %v317_v51 = vadd.f32 %v316_v45, %v315_v47  ;;  %v281_v45 = vmul.f32 %v919_v17, %v919_v17  ;;  %v336_v47 = vsel %vm149_vm0, %v279_v33, 0.0 }
  0x83   : > { %v319_v56 = vadd.f32 %v318_v50, %v317_v51  ;;  %v282_v50 = vmul.f32 %v926_v21, %v926_v21  ;;  %v338_v51 = vsel %vm149_vm0, %v280_v41, 0.0 }
  0x85   : > { %v321_v9 = vadd.f32 %v320_v54, %v319_v56  ;;  %v340_v54 = vsel %vm149_vm0, %v281_v45, 0.0 }
  0x87   : > { %v323_v11 = vadd.f32 %v322_v0, %v321_v9  ;;  %v342_v0 = vsel %vm149_vm0, %v282_v50, 0.0 }
  0x89   : > { %v325_v18 = vadd.f32 %v324_v3, %v323_v11 }
  0x8b   : > { %v327_v13 = vadd.f32 %v326_v15, %v325_v18 }
  0x8d   : > { %v329_v32 = vadd.f32 %v328_v23, %v327_v13 }
  0x8f   : > { %v331_v38 = vadd.f32 %v330_v29, %v329_v32 }
  0x91   : > { %v333_v44 = vadd.f32 %v332_v36, %v331_v38 }
  0x93   : > { %v335_v48 = vadd.f32 %v334_v42, %v333_v44 }
  0x95   : > { %v337_v53 = vadd.f32 %v336_v47, %v335_v48 }
  0x97   : > { %v339_v56 = vadd.f32 %v338_v51, %v337_v53 }
  0x99   : > { %v341_v9 = vadd.f32 %v340_v54, %v339_v56 }
  0x9b   : > { %v343_v59 = vadd.f32 %v342_v0, %v341_v9 }
  0x9d   : > { %v345_v3 = vadd.f32 %v344_v39, %v343_v59 }
  0x9f   : > { %v347_v11 = vadd.f32 %v346_v1, %v345_v3 }
  0xa1   : > { %v348_v14 = vrot.slane %v347_v11, 4 }
  0xa3   : > { %v349_v15 = vadd.f32 %v348_v14, %v347_v11 }
  0xa5   : > { %v350_v18 = vrot.slane %v349_v15, 2 }
  0xa7   : > { %v351_v20 = vadd.f32 %v350_v18, %v349_v15 }
  0xa9   : > { %v352_v23 = vrot.slane %v351_v20, 1 }
  0xab   : > { %v353_v13 = vadd.f32 %v352_v23, %v351_v20 }
  0xad   : > { %v354_v24 = vmul.f32 0.00390625, %v353_v13 }
  0xaf   : > { %v355_v29 = vadd.f32 1e-05, %v354_v24 }
  0xb1   : > { %529 = vrsqrt.f32 %v355_v29 }
  0xbb   : > { %v953_v32 = vpop.eup %529 }
  0xbc   : > { %v357_v33 = vmul.f32 %v953_v32, %v731_v60  ;;  %v358_v36 = vmul.f32 %v953_v32, %v735_v62  ;;  %v359_v38 = vmul.f32 %v953_v32, %v739_v63  ;;  %v360_v41 = vmul.f32 %v953_v32, %v743_v5 }
  0xbd   : > { %v361_v60 = vmul.f32 %v953_v32, %v747_v6  ;;  %v362_v62 = vmul.f32 %v953_v32, %v757_v2  ;;  %v363_v63 = vmul.f32 %v953_v32, %v763_v7  ;;  %v364_v5 = vmul.f32 %v953_v32, %v772_v10 }
  0xbe   : > { %v389_v42 = vmax.f32 %v357_v33, 0.0  ;;  %v390_v44 = vmax.f32 %v358_v36, 0.0  ;;  %v391_v45 = vmax.f32 %v359_v38, 0.0  ;;  %v392_v47 = vmax.f32 %v360_v41, 0.0 }
  0xbf   : > { %v393_v48 = vmax.f32 %v361_v60, 0.0  ;;  %v394_v50 = vmax.f32 %v362_v62, 0.0  ;;  %v395_v6 = vmax.f32 %v363_v63, 0.0  ;;  %v396_v51 = vmax.f32 %v364_v5, 0.0 }
  0xc0   : > { %421 = vst.msk [vmem:[%s968_s14] sm:$0xff] %vm149_vm0, %v389_v42  ;;  %422 = vst.msk [vmem:[%s968_s14 + $0x8] sm:$0xff] %vm149_vm0, %v390_v44  ;;  %v365_v2 = vmul.f32 %v953_v32, %v779_v27  ;;  %v366_v7 = vmul.f32 %v953_v32, %v786_v16  ;;  %v367_v10 = vmul.f32 %v953_v32, %v793_v19 }
  0xc1   : > { %423 = vst.msk [vmem:[%s968_s14 + $0x10] sm:$0xff] %vm149_vm0, %v391_v45  ;;  %424 = vst.msk [vmem:[%s968_s14 + $0x18] sm:$0xff] %vm149_vm0, %v392_v47  ;;  %v368_v53 = vmul.f32 %v953_v32, %v800_v22  ;;  %v369_v27 = vmul.f32 %v953_v32, %v807_v25  ;;  %v370_v16 = vmul.f32 %v953_v32, %v814_v28 }
  0xc2   : > { %425 = vst.msk [vmem:[%s968_s14 + $0x20] sm:$0xff] %vm149_vm0, %v393_v48  ;;  %426 = vst.msk [vmem:[%s968_s14 + $0x28] sm:$0xff] %vm149_vm0, %v394_v50  ;;  %v371_v19 = vmul.f32 %v953_v32, %v821_v31  ;;  %v372_v22 = vmul.f32 %v953_v32, %v828_v34  ;;  %v397_v35 = vmax.f32 %v365_v2, 0.0  ;;  %v398_v54 = vmax.f32 %v366_v7, 0.0 }
  0xc3   : > { %427 = vst.msk [vmem:[%s968_s14 + $0x30] sm:$0xff] %vm149_vm0, %v395_v6  ;;  %428 = vst.msk [vmem:[%s968_s14 + $0x38] sm:$0xff] %vm149_vm0, %v396_v51  ;;  %v399_v56 = vmax.f32 %v367_v10, 0.0  ;;  %v400_v57 = vmax.f32 %v368_v53, 0.0  ;;  %v401_v0 = vmax.f32 %v369_v27, 0.0  ;;  %v402_v9 = vmax.f32 %v370_v16, 0.0 }
  0xc4   : > { %v403_v25 = vmax.f32 %v371_v19, 0.0  ;;  %v404_v39 = vmax.f32 %v372_v22, 0.0  ;;  %429 = vst.msk [vmem:[%s968_s14 + $0x40] sm:$0xff] %vm149_vm0, %v397_v35  ;;  %430 = vst.msk [vmem:[%s968_s14 + $0x48] sm:$0xff] %vm149_vm0, %v398_v54  ;;  %v373_v28 = vmul.f32 %v953_v32, %v835_v37  ;;  %v374_v31 = vmul.f32 %v953_v32, %v842_v40 }
  0xc5   : > { %431 = vst.msk [vmem:[%s968_s14 + $0x50] sm:$0xff] %vm149_vm0, %v399_v56  ;;  %432 = vst.msk [vmem:[%s968_s14 + $0x58] sm:$0xff] %vm149_vm0, %v400_v57  ;;  %v375_v34 = vmul.f32 %v953_v32, %v849_v43  ;;  %v376_v59 = vmul.f32 %v953_v32, %v856_v46  ;;  %v377_v37 = vmul.f32 %v953_v32, %v863_v49 }
  0xc6   : > { %433 = vst.msk [vmem:[%s968_s14 + $0x60] sm:$0xff] %vm149_vm0, %v401_v0  ;;  %434 = vst.msk [vmem:[%s968_s14 + $0x68] sm:$0xff] %vm149_vm0, %v402_v9  ;;  %v378_v40 = vmul.f32 %v953_v32, %v870_v52  ;;  %v379_v43 = vmul.f32 %v953_v32, %v877_v55  ;;  %v380_v46 = vmul.f32 %v953_v32, %v884_v58  ;;  %v405_v1 = vmax.f32 %v373_v28, 0.0 }
  0xc7   : > { %435 = vst.msk [vmem:[%s968_s14 + $0x70] sm:$0xff] %vm149_vm0, %v403_v25  ;;  %436 = vst.msk [vmem:[%s968_s14 + $0x78] sm:$0xff] %vm149_vm0, %v404_v39  ;;  %v406_v3 = vmax.f32 %v374_v31, 0.0  ;;  %v407_v11 = vmax.f32 %v375_v34, 0.0  ;;  %v408_v14 = vmax.f32 %v376_v59, 0.0  ;;  %v409_v15 = vmax.f32 %v377_v37, 0.0 }
  0xc8   : > { %v410_v18 = vmax.f32 %v378_v40, 0.0  ;;  %v411_v49 = vmax.f32 %v379_v43, 0.0  ;;  %v412_v20 = vmax.f32 %v380_v46, 0.0  ;;  %437 = vst.msk [vmem:[%s968_s14 + $0x80] sm:$0xff] %vm149_vm0, %v405_v1  ;;  %v381_v52 = vmul.f32 %v953_v32, %v891_v61 }
  0xc9   : > { %438 = vst.msk [vmem:[%s968_s14 + $0x88] sm:$0xff] %vm149_vm0, %v406_v3  ;;  %439 = vst.msk [vmem:[%s968_s14 + $0x90] sm:$0xff] %vm149_vm0, %v407_v11  ;;  %v382_v55 = vmul.f32 %v953_v32, %v898_v4  ;;  %v383_v58 = vmul.f32 %v953_v32, %v905_v8  ;;  %v384_v23 = vmul.f32 %v953_v32, %v912_v12 }
  0xca   : > { %440 = vst.msk [vmem:[%s968_s14 + $0x98] sm:$0xff] %vm149_vm0, %v408_v14  ;;  %441 = vst.msk [vmem:[%s968_s14 + $0xa0] sm:$0xff] %vm149_vm0, %v409_v15  ;;  %v385_v61 = vmul.f32 %v953_v32, %v919_v17  ;;  %v386_v4 = vmul.f32 %v953_v32, %v926_v21  ;;  %v387_v8 = vmul.f32 %v953_v32, %v933_v26  ;;  %v413_v13 = vmax.f32 %v381_v52, 0.0 }
  0xcb   : > { %442 = vst.msk [vmem:[%s968_s14 + $0xa8] sm:$0xff] %vm149_vm0, %v410_v18  ;;  %443 = vst.msk [vmem:[%s968_s14 + $0xb0] sm:$0xff] %vm149_vm0, %v411_v49  ;;  %v388_v12 = vmul.f32 %v953_v32, %v940_v30  ;;  %v414_v24 = vmax.f32 %v382_v55, 0.0  ;;  %v415_v29 = vmax.f32 %v383_v58, 0.0  ;;  %v416_v33 = vmax.f32 %v384_v23, 0.0 }
  0xcc   : > { %444 = vst.msk [vmem:[%s968_s14 + $0xb8] sm:$0xff] %vm149_vm0, %v412_v20  ;;  %v417_v36 = vmax.f32 %v385_v61, 0.0  ;;  %v418_v38 = vmax.f32 %v386_v4, 0.0  ;;  %v419_v17 = vmax.f32 %v387_v8, 0.0  ;;  %445 = vst.msk [vmem:[%s968_s14 + $0xc0] sm:$0xff] %vm149_vm0, %v413_v13 }
  0xcd   : > { %v420_v41 = vmax.f32 %v388_v12, 0.0  ;;  %446 = vst.msk [vmem:[%s968_s14 + $0xc8] sm:$0xff] %vm149_vm0, %v414_v24  ;;  %447 = vst.msk [vmem:[%s968_s14 + $0xd0] sm:$0xff] %vm149_vm0, %v415_v29 }
  0xce   : > { %448 = vst.msk [vmem:[%s968_s14 + $0xd8] sm:$0xff] %vm149_vm0, %v416_v33  ;;  %449 = vst.msk [vmem:[%s968_s14 + $0xe0] sm:$0xff] %vm149_vm0, %v417_v36 }
  0xcf   : > { %450 = vst.msk [vmem:[%s968_s14 + $0xe8] sm:$0xff] %vm149_vm0, %v418_v38  ;;  %451 = vst.msk [vmem:[%s968_s14 + $0xf0] sm:$0xff] %vm149_vm0, %v419_v17 }
  0xd0   : > { %452 = vst.msk [vmem:[%s968_s14 + $0xf8] sm:$0xff] %vm149_vm0, %v420_v41 }
  0xd1 PF: > { %s11_s6 = sadd.s32 1, %s537_s6  }
  0xd2   : > { %p8_p4 = scmp.ge.s32.totalorder %s11_s6, 4  }
  0xd4   :  { %10 = sbr.rel (!%p8_p4) target bundleno = 1 (0x1), region = 54 }

// kernel: encoder_forward.15
= control target key start
LH: loop header
LB: loop body
LE: loop exit
PB: predicated region body
PF: predicated region fallthrough
CT: control target
= control target key end

     0   :  { %6 = vsyncpa [#allocation3], 0  ;;  %s470_s0 = inlined_call_operand.vmem [shape: f32[2,16,32], index: 0, kind: input, shape index: {}]   ;;  %s471_s1 = inlined_call_operand.hbm [shape: f32[2,16,32], index: 1, kind: output, shape index: {}]  }
   0x1   :  { %8 = vsyncpa [#allocation3 + $0x1], 0  ;;  %s361_s6 = smov 0   ;;  %s363_s7 = smov 0  }
   0x2   :  { %s365_s8 = smov 0   ;;  %s367_s9 = smov 0  }
   0x3 LB: > { %s382_s10 = sadd.s32 4294967295, %s346_s9   ;;  %s227_s11 = sadd.s32 4294967294, %s346_s9   ;;  %s346_s9 = sphi %s367_s9, %s477_s9   ;;  %s342_s8 = sphi %s365_s8, %s476_s8   ;;  %s338_s7 = sphi %s363_s7, %s475_s7   ;;  %s334_s6 = sphi %s361_s6, %s474_s6  }
   0x4   : > { %s386_s12 = sadd.s32 1, %s346_s9   ;;  %s47_s13 = sadd.s32 1, %s342_s8 }
   0x5   : > { %s44_s14 = ssub.s32 %s346_s9, %s386_s12  ;;  %p57_p0 = scmp.ne.s32.totalorder %s342_s8, %s338_s7 }
   0x6   : > { %p45_p1 = scmp.eq.s32.totalorder %s44_s14, 0  ;;  %p58_p2 = scmp.eq.s32.totalorder %s382_s10, 1 }
   0x7   : > { %p63_p3 = scmp.ne.s32.totalorder %s338_s7, %s334_s6  ;;  %p64_p4 = scmp.eq.s32.totalorder %s227_s11, 1 }
   0x8   : > { %s397_s15 = scalar_select %p45_p1, %s342_s8, %s47_s13  }
   0x9   : > { %p399_p5 = por %p58_p2, %p57_p0  ;;  %p403_p6 = por %p64_p4, %p63_p3 }
   0xa   : > { %p230_p7 = scmp.ge.s32.totalorder %s346_s9, 1  ;;  %p90_p8 = scmp.lt.s32.totalorder %s346_s9, 3 }
   0xc   : > { %p91_p9 = pnand %p230_p7, %p90_p8 }
   0xd   : > { %p110_p10 = scmp.lt.s32.totalorder (!%p91_p9), %s382_s10, 1  ;;  %vm117_vm0 = vcmask (!%p91_p9), 261120   ;;  %s107_s23 = sand.u32 (!%p91_p9), 1, %s338_s7  }
   0xe   : > { %94 = sbr.rel (%p91_p9) target bundleno = 96 (0x60), region = 24  ;;  %s231_s24 = sshll.u32 (!%p91_p9), %s107_s23, 4 }
   0xf   : > { %s109_s25 = scalar_lea.vmem (!%p91_p9), [#allocation2], %s231_s24  ;;  %s240_s27 = sshll.u32 (!%p91_p9), %s382_s10, 8 }
  0x10   : > { %s165_s26 = sshll.u32 (!%p91_p9), %s109_s25, 4  ;;  %s425_s30 = scalar_lea.hbm (!%p91_p9), %s471_s1, %s240_s27  ;;  %s420_s26 = int_to_ptr.vmem [resolvable:$true] %s165_s26 }
  0x11   : > { %s429_s2 = scalar_lea.sflag (!%p91_p9), [#allocation3], %s107_s23  ;;  %s284_s3 = scalar_lea.vmem (!%p91_p9), %s420_s26, 256 }
  0x12   : > { %p285_p11 = scmp.ne.s32.totalorder (!%p91_p9), %s420_s26, %s284_s3  ;;  %s348_s4 = smov (!%p91_p9), [#allocation2]  }
  0x13   : > { %s288_s5 = sshll.u32 (!%p91_p9), %s348_s4, 4  ;;  %s289_s5 = int_to_ptr.vmem [resolvable:$false] %s288_s5 }
  0x14   : > { %p286_p12 = pnand (!%p91_p9), %p285_p11, %p399_p5  ;;  %p291_p0 = scmp.lt.s32.totalorder (!%p91_p9), %s420_s26, %s289_s5 }
  0x15   : > { %s111_s18 = scalar_select %p110_p10, %s382_s10, 1 }
  0x16   : > { %p287_p13 = pneg %p286_p12  ;;  %s290_s10 = scalar_lea.vmem %s289_s5, 512 }
  0x17   : > { %s239_s19 = sshll.u32 %s111_s18, 4  ;;  %p292_p1 = scmp.lt.s32.totalorder %s290_s10, %s284_s3 }
  0x18   : > { %s114_s22 = scalar_lea.vmem %s470_s0, %s239_s19 }
  0x19   : > { %v115_v0 = vld [vmem:[%s114_s22] sm:$0xff]  ;;  %v116_v1 = vld [vmem:[%s114_s22 + $0x8] sm:$0xff]  ;;  %p293_p2 = por %p292_p1, %p291_p0 }
  0x1a   : > { %v118_v2 = vsel %vm117_vm0, %v115_v0, 0.0  ;;  %v119_v3 = vsel %vm117_vm0, %v116_v1, 0.0 }
  0x1b   : > { %v120_v4 = vadd.f32 %v119_v3, %v118_v2  ;;  %p294_p3 = pnand %p293_p2, %p287_p13 }
  0x1d   : > { %v121_v5 = vrot.slane %v120_v4, 4 }
  0x1f   : > { %v122_v6 = vadd.f32 %v121_v5, %v120_v4 }
  0x21   : > { %v123_v7 = vrot.slane %v122_v6, 2 }
  0x23   : > { %v124_v8 = vadd.f32 %v123_v7, %v122_v6 }
  0x25   : > { %v125_v9 = vrot.slane %v124_v8, 1 }
  0x27   : > { %v126_v10 = vadd.f32 %v125_v9, %v124_v8 }
  0x29   : > { %v128_v11 = vmul.f32 0.0625, %v126_v10 }
  0x2b   : > { %v129_v12 = vsub.f32 %v115_v0, %v128_v11  ;;  %v130_v13 = vsub.f32 %v116_v1, %v128_v11 }
  0x2d   : > { %v131_v14 = vmul.f32 %v129_v12, %v129_v12  ;;  %v132_v15 = vmul.f32 %v130_v13, %v130_v13 }
  0x2f   : > { %v133_v16 = vsel %vm117_vm0, %v131_v14, 0.0  ;;  %v134_v17 = vsel %vm117_vm0, %v132_v15, 0.0 }
  0x30   : > { %v135_v18 = vadd.f32 %v134_v17, %v133_v16 }
  0x32   : > { %v136_v19 = vrot.slane %v135_v18, 4 }
  0x34   : > { %v137_v20 = vadd.f32 %v136_v19, %v135_v18 }
  0x36   : > { %v138_v21 = vrot.slane %v137_v20, 2 }
  0x38   : > { %v139_v22 = vadd.f32 %v138_v21, %v137_v20 }
  0x3a   : > { %v140_v23 = vrot.slane %v139_v22, 1 }
  0x3c   : > { %v141_v24 = vadd.f32 %v140_v23, %v139_v22 }
  0x3e   : > { %v142_v25 = vmul.f32 0.0625, %v141_v24 }
  0x40   : > { %v143_v26 = vadd.f32 1e-05, %v142_v25 }
  0x42   : > { %282 = vrsqrt.f32 %v143_v26 }
  0x4c   : > { %v283_v27 = vpop.eup %282 }
  0x4d   : > { %v145_v28 = vmul.f32 %v283_v27, %v129_v12  ;;  %v146_v29 = vmul.f32 %v283_v27, %v130_v13 }
  0x4f   : > { %v147_v30 = vmax.f32 %v145_v28, 0.0  ;;  %v148_v31 = vmax.f32 %v146_v29, 0.0 }
  0x51   : > { %149 = vst.msk [vmem:[%s109_s25] sm:$0xff] %vm117_vm0, %v147_v30  ;;  %150 = vst.msk [vmem:[%s109_s25 + $0x8] sm:$0xff] %vm117_vm0, %v148_v31 }
  0x52   : > { %297 = shalt.err (!%p294_p3)
}
  0x53   : > { %s298_s11 = scalar_lea.hbm %s425_s30, 256  ;;  %s302_s18 = scalar_lea.hbm %s471_s1, 512 }
  0x54   : > { %p299_p4 = scmp.ne.s32.totalorder %s425_s30, %s298_s11  ;;  %p303_p9 = scmp.lt.u32.totalorder %s425_s30, %s471_s1 }
  0x55   : > { %p304_p10 = scmp.lt.u32.totalorder %s302_s18, %s298_s11  ;;  %p306_p12 = scmp.lt.u32.totalorder %s298_s11, %s425_s30 }
  0x56   : > { %p300_p7 = pnand %p299_p4, %p399_p5 }
  0x57   : > { %p305_p11 = por %p304_p10, %p303_p9 }
  0x58   : > { %p301_p8 = pneg %p300_p7 }
  0x59   : > { %p307_p13 = por %p306_p12, %p305_p11 }
  0x5b   : > { %p308_p0 = pnand %p307_p13, %p301_p8 }
  0x5d   : > { %311 = shalt.err (!%p308_p0)
}
  0x5e   : > { %s349_s21 = smov 128   ;;  %s350_s22 = smov 8  }
  0x5f   : > { %241 = dma.vmem_to_hbm [thread:$0]  (%p399_p5), %s420_s26, 256, %s425_s30, %s429_s2, %s349_s21, %s349_s21, %s350_s22  }
  0x60 PF: > { %p247_p1 = scmp.ge.s32.totalorder %s346_s9, 2  ;;  %s180_s23 = sand.u32 1, %s334_s6  }
  0x61   : > { %s181_s24 = scalar_lea.sflag [#allocation3], %s180_s23 }
  0x62   : > { %p244_p2 = pnand %p247_p1, %p403_p6 }
  0x64   : > { %329 = dma.done.wait (!%p244_p2), %s181_s24, 256  }
  0x65   : > { %331 = vsyncadd (!%p244_p2), %s181_s24, 4294967040  ;;  %p11_p3 = scmp.ge.s32.totalorder %s386_s12, 4   ;;  %s474_s6 = smov %s338_s7 }
  0x66   : > { %s475_s7 = smov %s342_s8  ;;  %s476_s8 = smov %s397_s15 }
  0x67   : > { %s477_s9 = smov %s386_s12  ;;  %13 = sbr.rel (!%p11_p3) target bundleno = 3 (0x3), region = 59 }
  0x6e   :  { %186 = vsyncpa [#allocation3], 1 }
  0x6f   :  { %188 = vsyncpa [#allocation3 + $0x1], 1 }

</bundles_post_ra>
